<compile_context>
chip_gen: v7x
topology: tpu7x:2x2x1
jax: 0.10.0
libtpu: 0.0.40
codegen_flags: <defaults>
</compile_context>

<pallas_src>
import jax
import jax.numpy as jnp
from jax import lax
from jax.experimental import pallas as pl
from jax.experimental.pallas import tpu as pltpu


# ----------------------------------------------------------------------------------------
# small helpers
# ----------------------------------------------------------------------------------------
_ALIGN = 16  # bf16 sublane tile height (also a multiple of 8)


def _align(n):
    return ((n + _ALIGN - 1) // _ALIGN) * _ALIGN


def _compiler_params(N, tile_q):
    t = min(tile_q, N)
    # tiled working set: inner/pd/key (t, N) f32/i32, one-hot (t, N) bf16,
    # a few (N, <=256) f32 activations, headroom for packed weights + Mosaic scratch.
    est = (3 * 4 + 2) * t * N + 6 * 4 * N * 256 + (4 << 20)
    vmem = int(min(48 << 20, max(32 << 20, 2 * est)))   # cap below v7x's 64 MiB physical
    return pltpu.CompilerParams(
        dimension_semantics=("parallel",),              # grid=(B,): shard batches over TCs
        vmem_limit_bytes=vmem)


# ----------------------------------------------------------------------------------------
# in-kernel building blocks
# ----------------------------------------------------------------------------------------
def _dense_multi(parts, wb_ref, relu=True):
    """Dense layer on the *virtual* concat of `parts` along channels.

    `wb_ref` (bf16) holds each part's weight rows at a 16-aligned row offset and the bias
    in the final row.  The chained `acc += dot` is kept contiguous so Mosaic can accumulate
    in the MXU result buffer (MRB) in place on v7x.
    """
    widths = [int(p.shape[-1]) for p in parts]
    offs, off = [], 0
    for w in widths:
        offs.append(off)
        off += _align(w)
    acc = None
    for p, w, o in zip(parts, widths, offs):
        y = jnp.dot(p.astype(jnp.bfloat16), wb_ref[o:o + w, :],
                    preferred_element_type=jnp.float32)
        acc = y if acc is None else acc + y
    acc = acc + wb_ref[off:off + 1, :].astype(jnp.float32)
    return jnp.maximum(acc, 0.0) if relu else acc


def _dense(h, wb_ref, relu=True):
    return _dense_multi([h], wb_ref, relu)


def _edge_conv_block(xf, block_refs, k, tile_q):
    """One EdgeConv block for a single batch element.  xf: (N, C) f32 -> (N, C_out) f32.

    block_refs[0] is the first layer packed as rows [0:C] = Wa (acts on x_i),
    [align(C):align(C)+C] = Wb (acts on x_j - x_i), row [2*align(C)] = bias.
    The projection is folded into the gather:  h_ij = (Wa - Wb) x_i + b + Wb x_j.
    Neighbours are streamed (no (k*N, .) stacking); query rows are tiled by `tile_q`.
    """
    N, C = int(xf.shape[0]), int(xf.shape[1])
    c_al = _align(C)
    xb = xf.astype(jnp.bfloat16)
    xq = xb.astype(jnp.float32)            # bf16-quantised copy keeps the knn self-consistent

    first = block_refs[0]
    wa = first[0:C, :]                     # bf16
    wb = first[c_al:c_al + C, :]           # bf16
    b0 = first[2 * c_al:2 * c_al + 1, :].astype(jnp.float32)

    # Projected features (computed once per block).
    xWa = jnp.dot(xb, wa, preferred_element_type=jnp.float32)      # (N, C1)
    xWb = jnp.dot(xb, wb, preferred_element_type=jnp.float32)      # (N, C1)
    center = xWa - xWb + b0                                        # (N, C1)
    xWb_bf = xWb.astype(jnp.bfloat16)

    # ||x_j||^2 as a (1, N) row computed on the MXU (avoids an XLU transpose of (N, 1)).
    ones_row = jnp.ones((1, C), jnp.float32)
    sq_row = lax.dot_general(ones_row, xq * xq, (((1,), (1,)), ((), ())),
                             preferred_element_type=jnp.float32)    # (1, N)

    col = lax.broadcasted_iota(jnp.int32, (1, N), 1)
    nbits = max(1, (N - 1).bit_length())
    hi_mask = ~((1 << nbits) - 1)

    def tile(r0, T):
        x_t = xb[r0:r0 + T]                                        # (T, C) bf16
        center_t = center[r0:r0 + T]                               # (T, C1) f32
        inner = lax.dot_general(x_t, xb, (((1,), (1,)), ((), ())),
                                preferred_element_type=jnp.float32)    # (T, N)
        # ||x_i - x_j||^2 minus the row-constant ||x_i||^2 (argmin-invariant).
        pd = sq_row - 2.0 * inner
        # Order-preserving int32 key with the column index in the low bits: ONE jnp.min per
        # neighbour gives a tie-broken, guaranteed-one-hot argmin (ties -> smallest index).
        bits = pltpu.bitcast(pd, jnp.int32)
        key = jnp.where(bits >= 0, bits, jnp.int32(-2147483648) - bits)
        key = (key & hi_mask) | col

        out_t = None
        for _ in range(k):                                         # stream over neighbours
            kmin = jnp.min(key, axis=-1, keepdims=True)            # (T, 1): 1 XLU reduction
            sel = key == kmin                                      # exactly one hit per row
            key = jnp.where(sel, jnp.int32(2147483647), key)
            nb = jnp.dot(sel.astype(jnp.bfloat16), xWb_bf,
                         preferred_element_type=jnp.float32)        # (T, C1) gather
            h = jnp.maximum(nb + center_t, 0.0)
            for wref in block_refs[1:]:
                h = _dense(h, wref, relu=True)
            out_t = h if out_t is None else jnp.maximum(out_t, h)  # max over neighbours
        return out_t

    if N <= tile_q:
        return tile(0, N)
    # TODO(synk): for very large N switch to fori_loop + VMEM scratch so tile live ranges
    # are bounded for the scheduler instead of a static Python loop + concatenate.
    tiles, r0 = [], 0
    while r0 < N:
        T = min(tile_q, N - r0)
        tiles.append(tile(r0, T))
        r0 += T
    return jnp.concatenate(tiles, axis=0)


# ----------------------------------------------------------------------------------------
# kernel factories
# ----------------------------------------------------------------------------------------
def make_tnet_trunk_kernel(k, n_edge, n_local, tile_q):
    """TNet trunk: edge conv + local MLP + global max-pool, one batch element per step."""
    def kernel(*refs):
        x_ref = refs[0]
        edge_refs = refs[1:1 + n_edge]
        local_refs = refs[1 + n_edge:1 + n_edge + n_local]
        out_ref = refs[-1]

        h = _edge_conv_block(x_ref[0], edge_refs, k, tile_q)
        for wb_ref in local_refs:
            h = _dense(h, wb_ref, relu=True)
        out_ref[0] = jnp.max(h, axis=0, keepdims=True)       # (1, C_local)
    return kernel


def make_main_kernel(k, ec_layer_counts, n_local, n_seg, tile_q):
    """Fused main pipeline: transform + EdgeConv stack + mlp_local + max-pool + seg head."""
    def kernel(*refs):
        i = 0
        x_ref = refs[i]; i += 1
        t_ref = refs[i]; i += 1
        ec_refs = []
        for cnt in ec_layer_counts:
            ec_refs.append(refs[i:i + cnt]); i += cnt
        local_refs = refs[i:i + n_local]; i += n_local
        seg_refs = refs[i:i + n_seg]; i += n_seg
        wT_ref = refs[i]; i += 1
        bT_ref = refs[i]; i += 1
        seg_out_ref = refs[i]
        gf_out_ref = refs[i + 1]

        # x <- bmm(trans, x) in NCW layout  ==  x_nc @ trans^T in channels-last layout
        x = lax.dot_general(
            x_ref[0].astype(jnp.bfloat16), t_ref[0].astype(jnp.bfloat16),
            (((1,), (1,)), ((), ())), preferred_element_type=jnp.float32)

        # EdgeConv stack (all intermediates stay resident in VMEM/vregs)
        feats = []
        h = x
        for block in ec_refs:
            h = _edge_conv_block(h, block, k, tile_q)
            feats.append(h)

        # mlp_local on the (virtual) concat of EdgeConv features, then global max-pool
        loc = _dense_multi(feats, local_refs[0], relu=True)
        for wb_ref in local_refs[1:]:
            loc = _dense(loc, wb_ref, relu=True)
        g = jnp.max(loc, axis=0, keepdims=True)              # (1, C_local)
        gf_out_ref[0] = g

        # segmentation head; first layer consumes [edge feats ; global feature] virtually
        # TODO(synk): dropout in mlp_seg/mlp_cls is identity in eval mode; not modelled.
        s = _dense_multi(feats + [g], seg_refs[0], relu=True)
        for wb_ref in seg_refs[1:]:
            s = _dense(s, wb_ref, relu=True)

        # final 1x1 conv computed transposed so the store is lane-dense along N
        seg_out_ref[0] = lax.dot_general(
            wT_ref[...], s.astype(jnp.bfloat16), (((1,), (1,)), ((), ())),
            preferred_element_type=jnp.float32) + bT_ref[...]    # (num_seg, N)
    return kernel


# ----------------------------------------------------------------------------------------
# pallas_call wrappers
# ----------------------------------------------------------------------------------------
def tnet_trunk(x, edge_packed, local_packed, k, tile_q, compiler_params):
    B, N, C = x.shape
    c_out = int(local_packed[-1].shape[1])
    flat = list(edge_packed) + list(local_packed)
    kernel = make_tnet_trunk_kernel(k, len(edge_packed), len(local_packed), tile_q)
    in_specs = [pl.BlockSpec((1, N, C), lambda b: (b, 0, 0))]
    in_specs += [pl.BlockSpec(p.shape, lambda b: (0, 0)) for p in flat]
    return pl.pallas_call(
        kernel,
        out_shape=jax.ShapeDtypeStruct((B, 1, c_out), jnp.float32),
        grid=(B,),
        in_specs=in_specs,
        out_specs=pl.BlockSpec((1, 1, c_out), lambda b: (b, 0, 0)),
        compiler_params=compiler_params,
    )(x, *flat)


def dgcnn_main(x, trans, ec_packed, local_packed, seg_packed, seg_last_wT, seg_last_bT,
               k, num_seg, tile_q, compiler_params):
    B, N, C = x.shape
    c_local = int(local_packed[-1].shape[1])
    ec_counts = tuple(len(block) for block in ec_packed)
    flat = [p for block in ec_packed for p in block]
    flat += list(local_packed) + list(seg_packed) + [seg_last_wT, seg_last_bT]
    kernel = make_main_kernel(k, ec_counts, len(local_packed), len(seg_packed), tile_q)
    in_specs = [pl.BlockSpec((1, N, C), lambda b: (b, 0, 0)),
                pl.BlockSpec((1, C, C), lambda b: (b, 0, 0))]
    in_specs += [pl.BlockSpec(p.shape, lambda b: (0, 0)) for p in flat]
    out_shape = (jax.ShapeDtypeStruct((B, num_seg, N), jnp.float32),
                 jax.ShapeDtypeStruct((B, 1, c_local), jnp.float32))
    out_specs = (pl.BlockSpec((1, num_seg, N), lambda b: (b, 0, 0)),
                 pl.BlockSpec((1, 1, c_local), lambda b: (b, 0, 0)))
    return pl.pallas_call(
        kernel,
        out_shape=out_shape,
        grid=(B,),
        in_specs=in_specs,
        out_specs=out_specs,
        compiler_params=compiler_params,
    )(x, trans, *flat)


# ----------------------------------------------------------------------------------------
# parameter initialization (deterministic, synthetic; BN eval folded into W, b)
# ----------------------------------------------------------------------------------------
def init_wb(key, cin, cout, scale=0.1):
    k1, k2 = jax.random.split(key)
    w = jax.random.normal(k1, (cin, cout), jnp.float32) * scale
    b = jax.random.normal(k2, (1, cout), jnp.float32) * scale
    return w, b


def init_mlp(key, cin, channels, scale=0.1):
    params = []
    for c in channels:
        key, sub = jax.random.split(key)
        params.append(init_wb(sub, cin, c, scale))
        cin = c
    return params, key


def pack_wb_parts(w, b, widths):
    """(sum(widths), cout) weight + (1, cout) bias -> bf16 array; each part's rows start
    at a 16-aligned offset, bias occupies the final row."""
    cout = w.shape[1]
    total = sum(_align(wd) for wd in widths)
    packed = jnp.zeros((total + 1, cout), jnp.float32)
    src = dst = 0
    for wd in widths:
        packed = packed.at[dst:dst + wd, :].set(w[src:src + wd, :])
        src += wd
        dst += _align(wd)
    packed = packed.at[total, :].set(jnp.reshape(b, (-1,)))
    return packed.astype(jnp.bfloat16)


def pack_wb(w, b):
    return pack_wb_parts(w, b, (int(w.shape[0]),))


def pack_edge_block(params, c_in):
    """First EdgeConv layer split into aligned [x_i] / [x_j - x_i] row groups."""
    packed = [pack_wb_parts(params[0][0], params[0][1], (c_in, c_in))]
    packed += [pack_wb(w, b) for (w, b) in params[1:]]
    return packed


# ----------------------------------------------------------------------------------------
# Model
# ----------------------------------------------------------------------------------------
class DGCNNPartSegPallas:
    def __init__(self, in_channels=3, num_classes=4, num_seg_classes=8,
                 edge_conv_channels=((16, 16), (16, 16), 16),
                 local_channels=(64,), cls_channels=(32, 32),
                 seg_channels=(32, 32, 16), k=4,
                 tnet_conv_channels=(16, 32), tnet_local_channels=(64,),
                 tnet_global_channels=(32, 16), tile_q=256, seed=0):
        self.in_channels = in_channels
        self.num_classes = num_classes
        self.num_seg_classes = num_seg_classes
        self.k = k
        self.tile_q = tile_q

        key = jax.random.PRNGKey(seed)

        # --- TNet (trunk runs in the Pallas kernel, head runs in plain XLA) ---
        tnet_edge, key = init_mlp(key, 2 * in_channels, tnet_conv_channels)
        tnet_local, key = init_mlp(key, tnet_conv_channels[-1], tnet_local_channels)
        self.tnet_edge_packed = pack_edge_block(tnet_edge, in_channels)
        self.tnet_local_packed = [pack_wb(w, b) for (w, b) in tnet_local]
        head_channels = list(tnet_global_channels) + [in_channels * in_channels]
        self.tnet_head, key = init_mlp(key, tnet_local_channels[-1], head_channels)
        self.tnet_head_relu = tuple([True] * len(tnet_global_channels) + [False])

        # --- EdgeConv stack ---
        self.ec_packed = []
        inter_channels = []
        c = in_channels
        for conv_channels in edge_conv_channels:
            if isinstance(conv_channels, int):
                conv_channels = [conv_channels]
            params, key = init_mlp(key, 2 * c, conv_channels)
            self.ec_packed.append(pack_edge_block(params, c))
            inter_channels.append(conv_channels[-1])
            c = conv_channels[-1]
        sum_inter = sum(inter_channels)

        # --- local feature MLP (first layer consumes the virtual concat of EdgeConv feats)
        mlp_local, key = init_mlp(key, sum_inter, local_channels)
        self.local_packed = [pack_wb_parts(mlp_local[0][0], mlp_local[0][1],
                                           tuple(inter_channels))]
        self.local_packed += [pack_wb(w, b) for (w, b) in mlp_local[1:]]
        self.local_out = local_channels[-1]

        # --- segmentation head: mlp_seg + conv_seg (relu), final conv transposed ---
        seg_in = sum_inter + local_channels[-1]
        seg_params, key = init_mlp(key, seg_in, list(seg_channels))
        seg_widths = tuple(inter_channels) + (local_channels[-1],)
        self.seg_packed = [pack_wb_parts(seg_params[0][0], seg_params[0][1], seg_widths)]
        self.seg_packed += [pack_wb(w, b) for (w, b) in seg_params[1:]]
        key, sub = jax.random.split(key)
        w_last, b_last = init_wb(sub, seg_channels[-1], num_seg_classes)
        self.seg_last_wT = jnp.transpose(w_last).astype(jnp.bfloat16)    # (num_seg, c_last)
        self.seg_last_bT = jnp.reshape(b_last, (num_seg_classes, 1))     # (num_seg, 1) f32

        # --- classification head (tiny (B, C_local) matmuls -> plain XLA) ---
        cls_stack = list(cls_channels) + [num_classes]
        self.cls_params, key = init_mlp(key, local_channels[-1], cls_stack)
        self.cls_relu = tuple([True] * len(cls_channels) + [False])

        self._jit_forward = jax.jit(self._forward)

    # ------------------------------------------------------------------------------------
    def _forward(self, points):
        """points: (B, C, N) float32, PyTorch layout."""
        B, C, N = points.shape
        x = jnp.transpose(points, (0, 2, 1))                 # (B, N, C) channels-last
        cp = _compiler_params(N, self.tile_q)
        preds = {}

        # ---------- TNet: fused trunk kernel, tiny head in XLA ----------
        tg = tnet_trunk(x, self.tnet_edge_packed, self.tnet_local_packed,
                        self.k, self.tile_q, cp)[:, 0, :]    # (B, C_tloc)
        h = tg
        for (w, b), r in zip(self.tnet_head, self.tnet_head_relu):
            h = jnp.dot(h, w) + b
            if r:
                h = jnp.maximum(h, 0.0)
        trans = jnp.reshape(h, (B, C, C)) + jnp.eye(C, dtype=jnp.float32)
        preds['trans_input'] = trans

        # ---------- fused main pipeline (one pallas_call, grid=(B,)) ----------
        seg_logit, gf = dgcnn_main(
            x, trans, self.ec_packed, self.local_packed, self.seg_packed,
            self.seg_last_wT, self.seg_last_bT, self.k, self.num_seg_classes,
            self.tile_q, cp)
        preds['seg_logit'] = seg_logit                       # (B, num_seg, N), no transpose
        global_feature = gf[:, 0, :]                         # (B, C_local)

        # ---------- classification head ----------
        h = global_feature
        for (w, b), r in zip(self.cls_params, self.cls_relu):
            h = jnp.dot(h, w) + b
            if r:
                h = jnp.maximum(h, 0.0)
        preds['cls_logit'] = h
        return preds

    def __call__(self, points):
        return self._jit_forward(points)


# ----------------------------------------------------------------------------------------
if __name__ == "__main__":
    B, C, N = 2, 3, 32
    key = jax.random.PRNGKey(0)
    points = jax.random.normal(key, (B, C, N), jnp.float32)

    model = DGCNNPartSegPallas(in_channels=C, num_classes=4, num_seg_classes=8, k=4)
    preds = model(points)
    preds = jax.block_until_ready(preds)

    assert preds['seg_logit'].shape == (B, 8, N)
    assert preds['cls_logit'].shape == (B, 4)
    assert preds['trans_input'].shape == (B, C, C)
    assert all(bool(jnp.all(jnp.isfinite(v))) for v in preds.values())
    print("KERNEL_OK")
</pallas_src>

<mosaic_0001>
module attributes {stable_mosaic.version = 11 : i64} {
  func.func @kernel(%arg0: i32, %arg1: memref<1x32x3xf32, #tpu.memory_space<vmem>>, %arg2: memref<33x16xbf16, #tpu.memory_space<vmem>>, %arg3: memref<17x32xbf16, #tpu.memory_space<vmem>>, %arg4: memref<33x64xbf16, #tpu.memory_space<vmem>>, %arg5: memref<1x1x64xf32, #tpu.memory_space<vmem>>) attributes {dimension_semantics = [#tpu.dimension_semantics<parallel>], iteration_bounds = array<i64: 2>, scalar_prefetch = 0 : i64, scratch_operands = 0 : i64, tpu.core_type = #tpu.core_type<tc>, window_params = [{transform_indices = @transform_0, window_bounds = array<i64: 1, 32, 3>}, {pipeline_mode = #tpu.pipeline_mode<synchronous>, transform_indices = @transform_1, window_bounds = array<i64: 33, 16>}, {pipeline_mode = #tpu.pipeline_mode<synchronous>, transform_indices = @transform_2, window_bounds = array<i64: 17, 32>}, {pipeline_mode = #tpu.pipeline_mode<synchronous>, transform_indices = @transform_3, window_bounds = array<i64: 33, 64>}, {transform_indices = @transform_4, window_bounds = array<i64: 1, 1, 64>}]} {
    %c0 = arith.constant 0 : index
    %c0_0 = arith.constant 0 : index
    %c0_1 = arith.constant 0 : index
    %0 = vector.load %arg1[%c0, %c0_0, %c0_1] : memref<1x32x3xf32, #tpu.memory_space<vmem>>, vector<1x32x3xf32>
    %1 = vector.shape_cast %0 : vector<1x32x3xf32> to vector<32x3xf32>
    %2 = arith.truncf %1 : vector<32x3xf32> to vector<32x3xbf16>
    %3 = arith.extf %2 : vector<32x3xbf16> to vector<32x3xf32>
    %c0_2 = arith.constant 0 : index
    %c0_3 = arith.constant 0 : index
    %4 = vector.load %arg2[%c0_2, %c0_3] : memref<33x16xbf16, #tpu.memory_space<vmem>>, vector<3x16xbf16>
    %c16 = arith.constant 16 : index
    %c0_4 = arith.constant 0 : index
    %5 = vector.load %arg2[%c16, %c0_4] : memref<33x16xbf16, #tpu.memory_space<vmem>>, vector<3x16xbf16>
    %c32 = arith.constant 32 : index
    %c0_5 = arith.constant 0 : index
    %6 = vector.load %arg2[%c32, %c0_5] : memref<33x16xbf16, #tpu.memory_space<vmem>>, vector<1x16xbf16>
    %7 = arith.extf %6 : vector<1x16xbf16> to vector<1x16xf32>
    %cst = arith.constant dense<0.000000e+00> : vector<32x16xf32>
    %8 = tpu.matmul %2, %4, %cst {dimension_numbers = #tpu.dot_dimension_numbers<[1], [0], [0], [1], [0, 0, 1, 1], [], []>} : vector<32x3xbf16>, vector<3x16xbf16>, vector<32x16xf32> -> vector<32x16xf32>
    %cst_6 = arith.constant dense<0.000000e+00> : vector<32x16xf32>
    %9 = tpu.matmul %2, %5, %cst_6 {dimension_numbers = #tpu.dot_dimension_numbers<[1], [0], [0], [1], [0, 0, 1, 1], [], []>} : vector<32x3xbf16>, vector<3x16xbf16>, vector<32x16xf32> -> vector<32x16xf32>
    %10 = arith.subf %8, %9 : vector<32x16xf32>
    %11 = vector.broadcast %7 : vector<1x16xf32> to vector<32x16xf32>
    %12 = arith.addf %10, %11 : vector<32x16xf32>
    %13 = arith.truncf %9 : vector<32x16xf32> to vector<32x16xbf16>
    %cst_7 = arith.constant 1.000000e+00 : f32
    %14 = vector.broadcast %cst_7 : f32 to vector<1x3xf32>
    %15 = arith.mulf %3, %3 : vector<32x3xf32>
    %cst_8 = arith.constant dense<0.000000e+00> : vector<1x32xf32>
    %16 = tpu.matmul %14, %15, %cst_8 {dimension_numbers = #tpu.dot_dimension_numbers<[1], [1], [0], [0], [0, 0, 1, 0], [], []>} : vector<1x3xf32>, vector<32x3xf32>, vector<1x32xf32> -> vector<1x32xf32>
    %17 = tpu.iota {dimensions = array<i32: 1>} : vector<1x32xi32>
    %cst_9 = arith.constant dense<0.000000e+00> : vector<32x32xf32>
    %18 = tpu.matmul %2, %2, %cst_9 {dimension_numbers = #tpu.dot_dimension_numbers<[1], [1], [0], [0], [0, 0, 1, 0], [], []>} : vector<32x3xbf16>, vector<32x3xbf16>, vector<32x32xf32> -> vector<32x32xf32>
    %cst_10 = arith.constant 2.000000e+00 : f32
    %19 = vector.broadcast %cst_10 : f32 to vector<32x32xf32>
    %20 = arith.mulf %19, %18 : vector<32x32xf32>
    %21 = vector.broadcast %16 : vector<1x32xf32> to vector<32x32xf32>
    %22 = arith.subf %21, %20 : vector<32x32xf32>
    %23 = tpu.bitcast %22 : vector<32x32xf32> -> vector<32x32xi32>
    %c0_i32 = arith.constant 0 : i32
    %24 = vector.broadcast %c0_i32 : i32 to vector<32x32xi32>
    %25 = arith.cmpi sge, %23, %24 : vector<32x32xi32>
    %c-2147483648_i32 = arith.constant -2147483648 : i32
    %26 = vector.broadcast %c-2147483648_i32 : i32 to vector<32x32xi32>
    %27 = arith.subi %26, %23 : vector<32x32xi32>
    %28 = arith.select %25, %23, %27 : vector<32x32xi1>, vector<32x32xi32>
    %c-32_i32 = arith.constant -32 : i32
    %29 = vector.broadcast %c-32_i32 : i32 to vector<32x32xi32>
    %30 = arith.andi %28, %29 : vector<32x32xi32>
    %31 = vector.broadcast %17 : vector<1x32xi32> to vector<32x32xi32>
    %32 = arith.ori %30, %31 : vector<32x32xi32>
    %cst_11 = arith.constant dense<2147483647> : vector<32xi32>
    %33 = vector.multi_reduction <minsi>, %32, %cst_11 [1] : vector<32x32xi32> to vector<32xi32>
    %34 = vector.shape_cast %33 : vector<32xi32> to vector<32x1xi32>
    %35 = vector.broadcast %34 : vector<32x1xi32> to vector<32x32xi32>
    %36 = arith.cmpi eq, %32, %35 : vector<32x32xi32>
    %c2147483647_i32 = arith.constant 2147483647 : i32
    %37 = vector.broadcast %c2147483647_i32 : i32 to vector<32x32xi32>
    %38 = arith.select %36, %37, %32 : vector<32x32xi1>, vector<32x32xi32>
    %39 = arith.extui %36 : vector<32x32xi1> to vector<32x32xi32>
    %40 = arith.sitofp %39 : vector<32x32xi32> to vector<32x32xf32>
    %41 = arith.truncf %40 : vector<32x32xf32> to vector<32x32xbf16>
    %cst_12 = arith.constant dense<0.000000e+00> : vector<32x16xf32>
    %42 = tpu.matmul %41, %13, %cst_12 {dimension_numbers = #tpu.dot_dimension_numbers<[1], [0], [0], [1], [0, 0, 1, 1], [], []>} : vector<32x32xbf16>, vector<32x16xbf16>, vector<32x16xf32> -> vector<32x16xf32>
    %43 = arith.addf %42, %12 : vector<32x16xf32>
    %cst_13 = arith.constant 0.000000e+00 : f32
    %44 = vector.broadcast %cst_13 : f32 to vector<32x16xf32>
    %45 = arith.maximumf %43, %44 : vector<32x16xf32>
    %46 = arith.truncf %45 : vector<32x16xf32> to vector<32x16xbf16>
    %c0_14 = arith.constant 0 : index
    %c0_15 = arith.constant 0 : index
    %47 = vector.load %arg3[%c0_14, %c0_15] : memref<17x32xbf16, #tpu.memory_space<vmem>>, vector<16x32xbf16>
    %cst_16 = arith.constant dense<0.000000e+00> : vector<32x32xf32>
    %48 = tpu.matmul %46, %47, %cst_16 {dimension_numbers = #tpu.dot_dimension_numbers<[1], [0], [0], [1], [0, 0, 1, 1], [], []>} : vector<32x16xbf16>, vector<16x32xbf16>, vector<32x32xf32> -> vector<32x32xf32>
    %c16_17 = arith.constant 16 : index
    %c0_18 = arith.constant 0 : index
    %49 = vector.load %arg3[%c16_17, %c0_18] : memref<17x32xbf16, #tpu.memory_space<vmem>>, vector<1x32xbf16>
    %50 = arith.extf %49 : vector<1x32xbf16> to vector<1x32xf32>
    %51 = vector.broadcast %50 : vector<1x32xf32> to vector<32x32xf32>
    %52 = arith.addf %48, %51 : vector<32x32xf32>
    %cst_19 = arith.constant 0.000000e+00 : f32
    %53 = vector.broadcast %cst_19 : f32 to vector<32x32xf32>
    %54 = arith.maximumf %52, %53 : vector<32x32xf32>
    %cst_20 = arith.constant dense<2147483647> : vector<32xi32>
    %55 = vector.multi_reduction <minsi>, %38, %cst_20 [1] : vector<32x32xi32> to vector<32xi32>
    %56 = vector.shape_cast %55 : vector<32xi32> to vector<32x1xi32>
    %57 = vector.broadcast %56 : vector<32x1xi32> to vector<32x32xi32>
    %58 = arith.cmpi eq, %38, %57 : vector<32x32xi32>
    %c2147483647_i32_21 = arith.constant 2147483647 : i32
    %59 = vector.broadcast %c2147483647_i32_21 : i32 to vector<32x32xi32>
    %60 = arith.select %58, %59, %38 : vector<32x32xi1>, vector<32x32xi32>
    %61 = arith.extui %58 : vector<32x32xi1> to vector<32x32xi32>
    %62 = arith.sitofp %61 : vector<32x32xi32> to vector<32x32xf32>
    %63 = arith.truncf %62 : vector<32x32xf32> to vector<32x32xbf16>
    %cst_22 = arith.constant dense<0.000000e+00> : vector<32x16xf32>
    %64 = tpu.matmul %63, %13, %cst_22 {dimension_numbers = #tpu.dot_dimension_numbers<[1], [0], [0], [1], [0, 0, 1, 1], [], []>} : vector<32x32xbf16>, vector<32x16xbf16>, vector<32x16xf32> -> vector<32x16xf32>
    %65 = arith.addf %64, %12 : vector<32x16xf32>
    %cst_23 = arith.constant 0.000000e+00 : f32
    %66 = vector.broadcast %cst_23 : f32 to vector<32x16xf32>
    %67 = arith.maximumf %65, %66 : vector<32x16xf32>
    %68 = arith.truncf %67 : vector<32x16xf32> to vector<32x16xbf16>
    %c0_24 = arith.constant 0 : index
    %c0_25 = arith.constant 0 : index
    %69 = vector.load %arg3[%c0_24, %c0_25] : memref<17x32xbf16, #tpu.memory_space<vmem>>, vector<16x32xbf16>
    %cst_26 = arith.constant dense<0.000000e+00> : vector<32x32xf32>
    %70 = tpu.matmul %68, %69, %cst_26 {dimension_numbers = #tpu.dot_dimension_numbers<[1], [0], [0], [1], [0, 0, 1, 1], [], []>} : vector<32x16xbf16>, vector<16x32xbf16>, vector<32x32xf32> -> vector<32x32xf32>
    %c16_27 = arith.constant 16 : index
    %c0_28 = arith.constant 0 : index
    %71 = vector.load %arg3[%c16_27, %c0_28] : memref<17x32xbf16, #tpu.memory_space<vmem>>, vector<1x32xbf16>
    %72 = arith.extf %71 : vector<1x32xbf16> to vector<1x32xf32>
    %73 = vector.broadcast %72 : vector<1x32xf32> to vector<32x32xf32>
    %74 = arith.addf %70, %73 : vector<32x32xf32>
    %cst_29 = arith.constant 0.000000e+00 : f32
    %75 = vector.broadcast %cst_29 : f32 to vector<32x32xf32>
    %76 = arith.maximumf %74, %75 : vector<32x32xf32>
    %77 = arith.maximumf %54, %76 : vector<32x32xf32>
    %cst_30 = arith.constant dense<2147483647> : vector<32xi32>
    %78 = vector.multi_reduction <minsi>, %60, %cst_30 [1] : vector<32x32xi32> to vector<32xi32>
    %79 = vector.shape_cast %78 : vector<32xi32> to vector<32x1xi32>
    %80 = vector.broadcast %79 : vector<32x1xi32> to vector<32x32xi32>
    %81 = arith.cmpi eq, %60, %80 : vector<32x32xi32>
    %c2147483647_i32_31 = arith.constant 2147483647 : i32
    %82 = vector.broadcast %c2147483647_i32_31 : i32 to vector<32x32xi32>
    %83 = arith.select %81, %82, %60 : vector<32x32xi1>, vector<32x32xi32>
    %84 = arith.extui %81 : vector<32x32xi1> to vector<32x32xi32>
    %85 = arith.sitofp %84 : vector<32x32xi32> to vector<32x32xf32>
    %86 = arith.truncf %85 : vector<32x32xf32> to vector<32x32xbf16>
    %cst_32 = arith.constant dense<0.000000e+00> : vector<32x16xf32>
    %87 = tpu.matmul %86, %13, %cst_32 {dimension_numbers = #tpu.dot_dimension_numbers<[1], [0], [0], [1], [0, 0, 1, 1], [], []>} : vector<32x32xbf16>, vector<32x16xbf16>, vector<32x16xf32> -> vector<32x16xf32>
    %88 = arith.addf %87, %12 : vector<32x16xf32>
    %cst_33 = arith.constant 0.000000e+00 : f32
    %89 = vector.broadcast %cst_33 : f32 to vector<32x16xf32>
    %90 = arith.maximumf %88, %89 : vector<32x16xf32>
    %91 = arith.truncf %90 : vector<32x16xf32> to vector<32x16xbf16>
    %c0_34 = arith.constant 0 : index
    %c0_35 = arith.constant 0 : index
    %92 = vector.load %arg3[%c0_34, %c0_35] : memref<17x32xbf16, #tpu.memory_space<vmem>>, vector<16x32xbf16>
    %cst_36 = arith.constant dense<0.000000e+00> : vector<32x32xf32>
    %93 = tpu.matmul %91, %92, %cst_36 {dimension_numbers = #tpu.dot_dimension_numbers<[1], [0], [0], [1], [0, 0, 1, 1], [], []>} : vector<32x16xbf16>, vector<16x32xbf16>, vector<32x32xf32> -> vector<32x32xf32>
    %c16_37 = arith.constant 16 : index
    %c0_38 = arith.constant 0 : index
    %94 = vector.load %arg3[%c16_37, %c0_38] : memref<17x32xbf16, #tpu.memory_space<vmem>>, vector<1x32xbf16>
    %95 = arith.extf %94 : vector<1x32xbf16> to vector<1x32xf32>
    %96 = vector.broadcast %95 : vector<1x32xf32> to vector<32x32xf32>
    %97 = arith.addf %93, %96 : vector<32x32xf32>
    %cst_39 = arith.constant 0.000000e+00 : f32
    %98 = vector.broadcast %cst_39 : f32 to vector<32x32xf32>
    %99 = arith.maximumf %97, %98 : vector<32x32xf32>
    %100 = arith.maximumf %77, %99 : vector<32x32xf32>
    %cst_40 = arith.constant dense<2147483647> : vector<32xi32>
    %101 = vector.multi_reduction <minsi>, %83, %cst_40 [1] : vector<32x32xi32> to vector<32xi32>
    %102 = vector.shape_cast %101 : vector<32xi32> to vector<32x1xi32>
    %103 = vector.broadcast %102 : vector<32x1xi32> to vector<32x32xi32>
    %104 = arith.cmpi eq, %83, %103 : vector<32x32xi32>
    %105 = arith.extui %104 : vector<32x32xi1> to vector<32x32xi32>
    %106 = arith.sitofp %105 : vector<32x32xi32> to vector<32x32xf32>
    %107 = arith.truncf %106 : vector<32x32xf32> to vector<32x32xbf16>
    %cst_41 = arith.constant dense<0.000000e+00> : vector<32x16xf32>
    %108 = tpu.matmul %107, %13, %cst_41 {dimension_numbers = #tpu.dot_dimension_numbers<[1], [0], [0], [1], [0, 0, 1, 1], [], []>} : vector<32x32xbf16>, vector<32x16xbf16>, vector<32x16xf32> -> vector<32x16xf32>
    %109 = arith.addf %108, %12 : vector<32x16xf32>
    %cst_42 = arith.constant 0.000000e+00 : f32
    %110 = vector.broadcast %cst_42 : f32 to vector<32x16xf32>
    %111 = arith.maximumf %109, %110 : vector<32x16xf32>
    %112 = arith.truncf %111 : vector<32x16xf32> to vector<32x16xbf16>
    %c0_43 = arith.constant 0 : index
    %c0_44 = arith.constant 0 : index
    %113 = vector.load %arg3[%c0_43, %c0_44] : memref<17x32xbf16, #tpu.memory_space<vmem>>, vector<16x32xbf16>
    %cst_45 = arith.constant dense<0.000000e+00> : vector<32x32xf32>
    %114 = tpu.matmul %112, %113, %cst_45 {dimension_numbers = #tpu.dot_dimension_numbers<[1], [0], [0], [1], [0, 0, 1, 1], [], []>} : vector<32x16xbf16>, vector<16x32xbf16>, vector<32x32xf32> -> vector<32x32xf32>
    %c16_46 = arith.constant 16 : index
    %c0_47 = arith.constant 0 : index
    %115 = vector.load %arg3[%c16_46, %c0_47] : memref<17x32xbf16, #tpu.memory_space<vmem>>, vector<1x32xbf16>
    %116 = arith.extf %115 : vector<1x32xbf16> to vector<1x32xf32>
    %117 = vector.broadcast %116 : vector<1x32xf32> to vector<32x32xf32>
    %118 = arith.addf %114, %117 : vector<32x32xf32>
    %cst_48 = arith.constant 0.000000e+00 : f32
    %119 = vector.broadcast %cst_48 : f32 to vector<32x32xf32>
    %120 = arith.maximumf %118, %119 : vector<32x32xf32>
    %121 = arith.maximumf %100, %120 : vector<32x32xf32>
    %122 = arith.truncf %121 : vector<32x32xf32> to vector<32x32xbf16>
    %c0_49 = arith.constant 0 : index
    %c0_50 = arith.constant 0 : index
    %123 = vector.load %arg4[%c0_49, %c0_50] : memref<33x64xbf16, #tpu.memory_space<vmem>>, vector<32x64xbf16>
    %cst_51 = arith.constant dense<0.000000e+00> : vector<32x64xf32>
    %124 = tpu.matmul %122, %123, %cst_51 {dimension_numbers = #tpu.dot_dimension_numbers<[1], [0], [0], [1], [0, 0, 1, 1], [], []>} : vector<32x32xbf16>, vector<32x64xbf16>, vector<32x64xf32> -> vector<32x64xf32>
    %c32_52 = arith.constant 32 : index
    %c0_53 = arith.constant 0 : index
    %125 = vector.load %arg4[%c32_52, %c0_53] : memref<33x64xbf16, #tpu.memory_space<vmem>>, vector<1x64xbf16>
    %126 = arith.extf %125 : vector<1x64xbf16> to vector<1x64xf32>
    %127 = vector.broadcast %126 : vector<1x64xf32> to vector<32x64xf32>
    %128 = arith.addf %124, %127 : vector<32x64xf32>
    %cst_54 = arith.constant 0.000000e+00 : f32
    %129 = vector.broadcast %cst_54 : f32 to vector<32x64xf32>
    %130 = arith.maximumf %128, %129 : vector<32x64xf32>
    %cst_55 = arith.constant dense<0xFF800000> : vector<64xf32>
    %131 = vector.multi_reduction <maximumf>, %130, %cst_55 [0] : vector<32x64xf32> to vector<64xf32>
    %132 = vector.shape_cast %131 : vector<64xf32> to vector<1x64xf32>
    %c0_56 = arith.constant 0 : index
    %c0_57 = arith.constant 0 : index
    %c0_58 = arith.constant 0 : index
    %133 = vector.load %arg5[%c0_56, %c0_57, %c0_58] : memref<1x1x64xf32, #tpu.memory_space<vmem>>, vector<1x1x64xf32>
    %134 = vector.shape_cast %133 : vector<1x1x64xf32> to vector<1x64xf32>
    %135 = vector.shape_cast %132 : vector<1x64xf32> to vector<1x1x64xf32>
    tpu.vector_store %arg5[%c0_56, %c0_57, %c0_58], %135 {strides = array<i32>} : memref<1x1x64xf32, #tpu.memory_space<vmem>>, vector<1x1x64xf32>,
    return
  }
  func.func @transform_0(%arg0: i32) -> (i32, i32, i32) {
    %c0_i32 = arith.constant 0 : i32
    %c0_i32_0 = arith.constant 0 : i32
    %c0_i32_1 = arith.constant 0 : i32
    return %arg0, %c0_i32, %c0_i32_0 : i32, i32, i32
  }
  func.func @transform_1(%arg0: i32) -> (i32, i32) {
    %c0_i32 = arith.constant 0 : i32
    %c0_i32_0 = arith.constant 0 : i32
    %c0_i32_1 = arith.constant 0 : i32
    return %c0_i32, %c0_i32_0 : i32, i32
  }
  func.func @transform_2(%arg0: i32) -> (i32, i32) {
    %c0_i32 = arith.constant 0 : i32
    %c0_i32_0 = arith.constant 0 : i32
    %c0_i32_1 = arith.constant 0 : i32
    return %c0_i32, %c0_i32_0 : i32, i32
  }
  func.func @transform_3(%arg0: i32) -> (i32, i32) {
    %c0_i32 = arith.constant 0 : i32
    %c0_i32_0 = arith.constant 0 : i32
    %c0_i32_1 = arith.constant 0 : i32
    return %c0_i32, %c0_i32_0 : i32, i32
  }
  func.func @transform_4(%arg0: i32) -> (i32, i32, i32) {
    %c0_i32 = arith.constant 0 : i32
    %c0_i32_0 = arith.constant 0 : i32
    %c0_i32_1 = arith.constant 0 : i32
    return %arg0, %c0_i32, %c0_i32_0 : i32, i32, i32
  }
}

module attributes {stable_mosaic.version = 11 : i64} {
  func.func @kernel(%arg0: i32, %arg1: memref<1x32x3xf32, #tpu.memory_space<vmem>>, %arg2: memref<1x3x3xf32, #tpu.memory_space<vmem>>, %arg3: memref<33x16xbf16, #tpu.memory_space<vmem>>, %arg4: memref<17x16xbf16, #tpu.memory_space<vmem>>, %arg5: memref<33x16xbf16, #tpu.memory_space<vmem>>, %arg6: memref<17x16xbf16, #tpu.memory_space<vmem>>, %arg7: memref<33x16xbf16, #tpu.memory_space<vmem>>, %arg8: memref<49x64xbf16, #tpu.memory_space<vmem>>, %arg9: memref<113x32xbf16, #tpu.memory_space<vmem>>, %arg10: memref<33x32xbf16, #tpu.memory_space<vmem>>, %arg11: memref<33x16xbf16, #tpu.memory_space<vmem>>, %arg12: memref<8x16xbf16, #tpu.memory_space<vmem>>, %arg13: memref<8x1xf32, #tpu.memory_space<vmem>>, %arg14: memref<1x8x32xf32, #tpu.memory_space<vmem>>, %arg15: memref<1x1x64xf32, #tpu.memory_space<vmem>>) attributes {dimension_semantics = [#tpu.dimension_semantics<parallel>], iteration_bounds = array<i64: 2>, scalar_prefetch = 0 : i64, scratch_operands = 0 : i64, tpu.core_type = #tpu.core_type<tc>, window_params = [{transform_indices = @transform_0, window_bounds = array<i64: 1, 32, 3>}, {transform_indices = @transform_1, window_bounds = array<i64: 1, 3, 3>}, {pipeline_mode = #tpu.pipeline_mode<synchronous>, transform_indices = @transform_2, window_bounds = array<i64: 33, 16>}, {pipeline_mode = #tpu.pipeline_mode<synchronous>, transform_indices = @transform_3, window_bounds = array<i64: 17, 16>}, {pipeline_mode = #tpu.pipeline_mode<synchronous>, transform_indices = @transform_4, window_bounds = array<i64: 33, 16>}, {pipeline_mode = #tpu.pipeline_mode<synchronous>, transform_indices = @transform_5, window_bounds = array<i64: 17, 16>}, {pipeline_mode = #tpu.pipeline_mode<synchronous>, transform_indices = @transform_6, window_bounds = array<i64: 33, 16>}, {pipeline_mode = #tpu.pipeline_mode<synchronous>, transform_indices = @transform_7, window_bounds = array<i64: 49, 64>}, {pipeline_mode = #tpu.pipeline_mode<synchronous>, transform_indices = @transform_8, window_bounds = array<i64: 113, 32>}, {pipeline_mode = #tpu.pipeline_mode<synchronous>, transform_indices = @transform_9, window_bounds = array<i64: 33, 32>}, {pipeline_mode = #tpu.pipeline_mode<synchronous>, transform_indices = @transform_10, window_bounds = array<i64: 33, 16>}, {pipeline_mode = #tpu.pipeline_mode<synchronous>, transform_indices = @transform_11, window_bounds = array<i64: 8, 16>}, {pipeline_mode = #tpu.pipeline_mode<synchronous>, transform_indices = @transform_12, window_bounds = array<i64: 8, 1>}, {transform_indices = @transform_13, window_bounds = array<i64: 1, 8, 32>}, {transform_indices = @transform_14, window_bounds = array<i64: 1, 1, 64>}]} {
    %c0 = arith.constant 0 : index
    %c0_0 = arith.constant 0 : index
    %c0_1 = arith.constant 0 : index
    %0 = vector.load %arg1[%c0, %c0_0, %c0_1] : memref<1x32x3xf32, #tpu.memory_space<vmem>>, vector<1x32x3xf32>
    %1 = vector.shape_cast %0 : vector<1x32x3xf32> to vector<32x3xf32>
    %2 = arith.truncf %1 : vector<32x3xf32> to vector<32x3xbf16>
    %c0_2 = arith.constant 0 : index
    %c0_3 = arith.constant 0 : index
    %c0_4 = arith.constant 0 : index
    %3 = vector.load %arg2[%c0_2, %c0_3, %c0_4] : memref<1x3x3xf32, #tpu.memory_space<vmem>>, vector<1x3x3xf32>
    %4 = vector.shape_cast %3 : vector<1x3x3xf32> to vector<3x3xf32>
    %5 = arith.truncf %4 : vector<3x3xf32> to vector<3x3xbf16>
    %cst = arith.constant dense<0.000000e+00> : vector<32x3xf32>
    %6 = tpu.matmul %2, %5, %cst {dimension_numbers = #tpu.dot_dimension_numbers<[1], [1], [0], [0], [0, 0, 1, 0], [], []>} : vector<32x3xbf16>, vector<3x3xbf16>, vector<32x3xf32> -> vector<32x3xf32>
    %7 = arith.truncf %6 : vector<32x3xf32> to vector<32x3xbf16>
    %8 = arith.extf %7 : vector<32x3xbf16> to vector<32x3xf32>
    %c0_5 = arith.constant 0 : index
    %c0_6 = arith.constant 0 : index
    %9 = vector.load %arg3[%c0_5, %c0_6] : memref<33x16xbf16, #tpu.memory_space<vmem>>, vector<3x16xbf16>
    %c16 = arith.constant 16 : index
    %c0_7 = arith.constant 0 : index
    %10 = vector.load %arg3[%c16, %c0_7] : memref<33x16xbf16, #tpu.memory_space<vmem>>, vector<3x16xbf16>
    %c32 = arith.constant 32 : index
    %c0_8 = arith.constant 0 : index
    %11 = vector.load %arg3[%c32, %c0_8] : memref<33x16xbf16, #tpu.memory_space<vmem>>, vector<1x16xbf16>
    %12 = arith.extf %11 : vector<1x16xbf16> to vector<1x16xf32>
    %cst_9 = arith.constant dense<0.000000e+00> : vector<32x16xf32>
    %13 = tpu.matmul %7, %9, %cst_9 {dimension_numbers = #tpu.dot_dimension_numbers<[1], [0], [0], [1], [0, 0, 1, 1], [], []>} : vector<32x3xbf16>, vector<3x16xbf16>, vector<32x16xf32> -> vector<32x16xf32>
    %cst_10 = arith.constant dense<0.000000e+00> : vector<32x16xf32>
    %14 = tpu.matmul %7, %10, %cst_10 {dimension_numbers = #tpu.dot_dimension_numbers<[1], [0], [0], [1], [0, 0, 1, 1], [], []>} : vector<32x3xbf16>, vector<3x16xbf16>, vector<32x16xf32> -> vector<32x16xf32>
    %15 = arith.subf %13, %14 : vector<32x16xf32>
    %16 = vector.broadcast %12 : vector<1x16xf32> to vector<32x16xf32>
    %17 = arith.addf %15, %16 : vector<32x16xf32>
    %18 = arith.truncf %14 : vector<32x16xf32> to vector<32x16xbf16>
    %cst_11 = arith.constant 1.000000e+00 : f32
    %19 = vector.broadcast %cst_11 : f32 to vector<1x3xf32>
    %20 = arith.mulf %8, %8 : vector<32x3xf32>
    %cst_12 = arith.constant dense<0.000000e+00> : vector<1x32xf32>
    %21 = tpu.matmul %19, %20, %cst_12 {dimension_numbers = #tpu.dot_dimension_numbers<[1], [1], [0], [0], [0, 0, 1, 0], [], []>} : vector<1x3xf32>, vector<32x3xf32>, vector<1x32xf32> -> vector<1x32xf32>
    %22 = tpu.iota {dimensions = array<i32: 1>} : vector<1x32xi32>
    %cst_13 = arith.constant dense<0.000000e+00> : vector<32x32xf32>
    %23 = tpu.matmul %7, %7, %cst_13 {dimension_numbers = #tpu.dot_dimension_numbers<[1], [1], [0], [0], [0, 0, 1, 0], [], []>} : vector<32x3xbf16>, vector<32x3xbf16>, vector<32x32xf32> -> vector<32x32xf32>
    %cst_14 = arith.constant 2.000000e+00 : f32
    %24 = vector.broadcast %cst_14 : f32 to vector<32x32xf32>
    %25 = arith.mulf %24, %23 : vector<32x32xf32>
    %26 = vector.broadcast %21 : vector<1x32xf32> to vector<32x32xf32>
    %27 = arith.subf %26, %25 : vector<32x32xf32>
    %28 = tpu.bitcast %27 : vector<32x32xf32> -> vector<32x32xi32>
    %c0_i32 = arith.constant 0 : i32
    %29 = vector.broadcast %c0_i32 : i32 to vector<32x32xi32>
    %30 = arith.cmpi sge, %28, %29 : vector<32x32xi32>
    %c-2147483648_i32 = arith.constant -2147483648 : i32
    %31 = vector.broadcast %c-2147483648_i32 : i32 to vector<32x32xi32>
    %32 = arith.subi %31, %28 : vector<32x32xi32>
    %33 = arith.select %30, %28, %32 : vector<32x32xi1>, vector<32x32xi32>
    %c-32_i32 = arith.constant -32 : i32
    %34 = vector.broadcast %c-32_i32 : i32 to vector<32x32xi32>
    %35 = arith.andi %33, %34 : vector<32x32xi32>
    %36 = vector.broadcast %22 : vector<1x32xi32> to vector<32x32xi32>
    %37 = arith.ori %35, %36 : vector<32x32xi32>
    %cst_15 = arith.constant dense<2147483647> : vector<32xi32>
    %38 = vector.multi_reduction <minsi>, %37, %cst_15 [1] : vector<32x32xi32> to vector<32xi32>
    %39 = vector.shape_cast %38 : vector<32xi32> to vector<32x1xi32>
    %40 = vector.broadcast %39 : vector<32x1xi32> to vector<32x32xi32>
    %41 = arith.cmpi eq, %37, %40 : vector<32x32xi32>
    %c2147483647_i32 = arith.constant 2147483647 : i32
    %42 = vector.broadcast %c2147483647_i32 : i32 to vector<32x32xi32>
    %43 = arith.select %41, %42, %37 : vector<32x32xi1>, vector<32x32xi32>
    %44 = arith.extui %41 : vector<32x32xi1> to vector<32x32xi32>
    %45 = arith.sitofp %44 : vector<32x32xi32> to vector<32x32xf32>
    %46 = arith.truncf %45 : vector<32x32xf32> to vector<32x32xbf16>
    %cst_16 = arith.constant dense<0.000000e+00> : vector<32x16xf32>
    %47 = tpu.matmul %46, %18, %cst_16 {dimension_numbers = #tpu.dot_dimension_numbers<[1], [0], [0], [1], [0, 0, 1, 1], [], []>} : vector<32x32xbf16>, vector<32x16xbf16>, vector<32x16xf32> -> vector<32x16xf32>
    %48 = arith.addf %47, %17 : vector<32x16xf32>
    %cst_17 = arith.constant 0.000000e+00 : f32
    %49 = vector.broadcast %cst_17 : f32 to vector<32x16xf32>
    %50 = arith.maximumf %48, %49 : vector<32x16xf32>
    %51 = arith.truncf %50 : vector<32x16xf32> to vector<32x16xbf16>
    %c0_18 = arith.constant 0 : index
    %c0_19 = arith.constant 0 : index
    %52 = vector.load %arg4[%c0_18, %c0_19] : memref<17x16xbf16, #tpu.memory_space<vmem>>, vector<16x16xbf16>
    %cst_20 = arith.constant dense<0.000000e+00> : vector<32x16xf32>
    %53 = tpu.matmul %51, %52, %cst_20 {dimension_numbers = #tpu.dot_dimension_numbers<[1], [0], [0], [1], [0, 0, 1, 1], [], []>} : vector<32x16xbf16>, vector<16x16xbf16>, vector<32x16xf32> -> vector<32x16xf32>
    %c16_21 = arith.constant 16 : index
    %c0_22 = arith.constant 0 : index
    %54 = vector.load %arg4[%c16_21, %c0_22] : memref<17x16xbf16, #tpu.memory_space<vmem>>, vector<1x16xbf16>
    %55 = arith.extf %54 : vector<1x16xbf16> to vector<1x16xf32>
    %56 = vector.broadcast %55 : vector<1x16xf32> to vector<32x16xf32>
    %57 = arith.addf %53, %56 : vector<32x16xf32>
    %cst_23 = arith.constant 0.000000e+00 : f32
    %58 = vector.broadcast %cst_23 : f32 to vector<32x16xf32>
    %59 = arith.maximumf %57, %58 : vector<32x16xf32>
    %cst_24 = arith.constant dense<2147483647> : vector<32xi32>
    %60 = vector.multi_reduction <minsi>, %43, %cst_24 [1] : vector<32x32xi32> to vector<32xi32>
    %61 = vector.shape_cast %60 : vector<32xi32> to vector<32x1xi32>
    %62 = vector.broadcast %61 : vector<32x1xi32> to vector<32x32xi32>
    %63 = arith.cmpi eq, %43, %62 : vector<32x32xi32>
    %c2147483647_i32_25 = arith.constant 2147483647 : i32
    %64 = vector.broadcast %c2147483647_i32_25 : i32 to vector<32x32xi32>
    %65 = arith.select %63, %64, %43 : vector<32x32xi1>, vector<32x32xi32>
    %66 = arith.extui %63 : vector<32x32xi1> to vector<32x32xi32>
    %67 = arith.sitofp %66 : vector<32x32xi32> to vector<32x32xf32>
    %68 = arith.truncf %67 : vector<32x32xf32> to vector<32x32xbf16>
    %cst_26 = arith.constant dense<0.000000e+00> : vector<32x16xf32>
    %69 = tpu.matmul %68, %18, %cst_26 {dimension_numbers = #tpu.dot_dimension_numbers<[1], [0], [0], [1], [0, 0, 1, 1], [], []>} : vector<32x32xbf16>, vector<32x16xbf16>, vector<32x16xf32> -> vector<32x16xf32>
    %70 = arith.addf %69, %17 : vector<32x16xf32>
    %cst_27 = arith.constant 0.000000e+00 : f32
    %71 = vector.broadcast %cst_27 : f32 to vector<32x16xf32>
    %72 = arith.maximumf %70, %71 : vector<32x16xf32>
    %73 = arith.truncf %72 : vector<32x16xf32> to vector<32x16xbf16>
    %c0_28 = arith.constant 0 : index
    %c0_29 = arith.constant 0 : index
    %74 = vector.load %arg4[%c0_28, %c0_29] : memref<17x16xbf16, #tpu.memory_space<vmem>>, vector<16x16xbf16>
    %cst_30 = arith.constant dense<0.000000e+00> : vector<32x16xf32>
    %75 = tpu.matmul %73, %74, %cst_30 {dimension_numbers = #tpu.dot_dimension_numbers<[1], [0], [0], [1], [0, 0, 1, 1], [], []>} : vector<32x16xbf16>, vector<16x16xbf16>, vector<32x16xf32> -> vector<32x16xf32>
    %c16_31 = arith.constant 16 : index
    %c0_32 = arith.constant 0 : index
    %76 = vector.load %arg4[%c16_31, %c0_32] : memref<17x16xbf16, #tpu.memory_space<vmem>>, vector<1x16xbf16>
    %77 = arith.extf %76 : vector<1x16xbf16> to vector<1x16xf32>
    %78 = vector.broadcast %77 : vector<1x16xf32> to vector<32x16xf32>
    %79 = arith.addf %75, %78 : vector<32x16xf32>
    %cst_33 = arith.constant 0.000000e+00 : f32
    %80 = vector.broadcast %cst_33 : f32 to vector<32x16xf32>
    %81 = arith.maximumf %79, %80 : vector<32x16xf32>
    %82 = arith.maximumf %59, %81 : vector<32x16xf32>
    %cst_34 = arith.constant dense<2147483647> : vector<32xi32>
    %83 = vector.multi_reduction <minsi>, %65, %cst_34 [1] : vector<32x32xi32> to vector<32xi32>
    %84 = vector.shape_cast %83 : vector<32xi32> to vector<32x1xi32>
    %85 = vector.broadcast %84 : vector<32x1xi32> to vector<32x32xi32>
    %86 = arith.cmpi eq, %65, %85 : vector<32x32xi32>
    %c2147483647_i32_35 = arith.constant 2147483647 : i32
    %87 = vector.broadcast %c2147483647_i32_35 : i32 to vector<32x32xi32>
    %88 = arith.select %86, %87, %65 : vector<32x32xi1>, vector<32x32xi32>
    %89 = arith.extui %86 : vector<32x32xi1> to vector<32x32xi32>
    %90 = arith.sitofp %89 : vector<32x32xi32> to vector<32x32xf32>
    %91 = arith.truncf %90 : vector<32x32xf32> to vector<32x32xbf16>
    %cst_36 = arith.constant dense<0.000000e+00> : vector<32x16xf32>
    %92 = tpu.matmul %91, %18, %cst_36 {dimension_numbers = #tpu.dot_dimension_numbers<[1], [0], [0], [1], [0, 0, 1, 1], [], []>} : vector<32x32xbf16>, vector<32x16xbf16>, vector<32x16xf32> -> vector<32x16xf32>
    %93 = arith.addf %92, %17 : vector<32x16xf32>
    %cst_37 = arith.constant 0.000000e+00 : f32
    %94 = vector.broadcast %cst_37 : f32 to vector<32x16xf32>
    %95 = arith.maximumf %93, %94 : vector<32x16xf32>
    %96 = arith.truncf %95 : vector<32x16xf32> to vector<32x16xbf16>
    %c0_38 = arith.constant 0 : index
    %c0_39 = arith.constant 0 : index
    %97 = vector.load %arg4[%c0_38, %c0_39] : memref<17x16xbf16, #tpu.memory_space<vmem>>, vector<16x16xbf16>
    %cst_40 = arith.constant dense<0.000000e+00> : vector<32x16xf32>
    %98 = tpu.matmul %96, %97, %cst_40 {dimension_numbers = #tpu.dot_dimension_numbers<[1], [0], [0], [1], [0, 0, 1, 1], [], []>} : vector<32x16xbf16>, vector<16x16xbf16>, vector<32x16xf32> -> vector<32x16xf32>
    %c16_41 = arith.constant 16 : index
    %c0_42 = arith.constant 0 : index
    %99 = vector.load %arg4[%c16_41, %c0_42] : memref<17x16xbf16, #tpu.memory_space<vmem>>, vector<1x16xbf16>
    %100 = arith.extf %99 : vector<1x16xbf16> to vector<1x16xf32>
    %101 = vector.broadcast %100 : vector<1x16xf32> to vector<32x16xf32>
    %102 = arith.addf %98, %101 : vector<32x16xf32>
    %cst_43 = arith.constant 0.000000e+00 : f32
    %103 = vector.broadcast %cst_43 : f32 to vector<32x16xf32>
    %104 = arith.maximumf %102, %103 : vector<32x16xf32>
    %105 = arith.maximumf %82, %104 : vector<32x16xf32>
    %cst_44 = arith.constant dense<2147483647> : vector<32xi32>
    %106 = vector.multi_reduction <minsi>, %88, %cst_44 [1] : vector<32x32xi32> to vector<32xi32>
    %107 = vector.shape_cast %106 : vector<32xi32> to vector<32x1xi32>
    %108 = vector.broadcast %107 : vector<32x1xi32> to vector<32x32xi32>
    %109 = arith.cmpi eq, %88, %108 : vector<32x32xi32>
    %110 = arith.extui %109 : vector<32x32xi1> to vector<32x32xi32>
    %111 = arith.sitofp %110 : vector<32x32xi32> to vector<32x32xf32>
    %112 = arith.truncf %111 : vector<32x32xf32> to vector<32x32xbf16>
    %cst_45 = arith.constant dense<0.000000e+00> : vector<32x16xf32>
    %113 = tpu.matmul %112, %18, %cst_45 {dimension_numbers = #tpu.dot_dimension_numbers<[1], [0], [0], [1], [0, 0, 1, 1], [], []>} : vector<32x32xbf16>, vector<32x16xbf16>, vector<32x16xf32> -> vector<32x16xf32>
    %114 = arith.addf %113, %17 : vector<32x16xf32>
    %cst_46 = arith.constant 0.000000e+00 : f32
    %115 = vector.broadcast %cst_46 : f32 to vector<32x16xf32>
    %116 = arith.maximumf %114, %115 : vector<32x16xf32>
    %117 = arith.truncf %116 : vector<32x16xf32> to vector<32x16xbf16>
    %c0_47 = arith.constant 0 : index
    %c0_48 = arith.constant 0 : index
    %118 = vector.load %arg4[%c0_47, %c0_48] : memref<17x16xbf16, #tpu.memory_space<vmem>>, vector<16x16xbf16>
    %cst_49 = arith.constant dense<0.000000e+00> : vector<32x16xf32>
    %119 = tpu.matmul %117, %118, %cst_49 {dimension_numbers = #tpu.dot_dimension_numbers<[1], [0], [0], [1], [0, 0, 1, 1], [], []>} : vector<32x16xbf16>, vector<16x16xbf16>, vector<32x16xf32> -> vector<32x16xf32>
    %c16_50 = arith.constant 16 : index
    %c0_51 = arith.constant 0 : index
    %120 = vector.load %arg4[%c16_50, %c0_51] : memref<17x16xbf16, #tpu.memory_space<vmem>>, vector<1x16xbf16>
    %121 = arith.extf %120 : vector<1x16xbf16> to vector<1x16xf32>
    %122 = vector.broadcast %121 : vector<1x16xf32> to vector<32x16xf32>
    %123 = arith.addf %119, %122 : vector<32x16xf32>
    %cst_52 = arith.constant 0.000000e+00 : f32
    %124 = vector.broadcast %cst_52 : f32 to vector<32x16xf32>
    %125 = arith.maximumf %123, %124 : vector<32x16xf32>
    %126 = arith.maximumf %105, %125 : vector<32x16xf32>
    %127 = arith.truncf %126 : vector<32x16xf32> to vector<32x16xbf16>
    %128 = arith.extf %127 : vector<32x16xbf16> to vector<32x16xf32>
    %c0_53 = arith.constant 0 : index
    %c0_54 = arith.constant 0 : index
    %129 = vector.load %arg5[%c0_53, %c0_54] : memref<33x16xbf16, #tpu.memory_space<vmem>>, vector<16x16xbf16>
    %c16_55 = arith.constant 16 : index
    %c0_56 = arith.constant 0 : index
    %130 = vector.load %arg5[%c16_55, %c0_56] : memref<33x16xbf16, #tpu.memory_space<vmem>>, vector<16x16xbf16>
    %c32_57 = arith.constant 32 : index
    %c0_58 = arith.constant 0 : index
    %131 = vector.load %arg5[%c32_57, %c0_58] : memref<33x16xbf16, #tpu.memory_space<vmem>>, vector<1x16xbf16>
    %132 = arith.extf %131 : vector<1x16xbf16> to vector<1x16xf32>
    %cst_59 = arith.constant dense<0.000000e+00> : vector<32x16xf32>
    %133 = tpu.matmul %127, %129, %cst_59 {dimension_numbers = #tpu.dot_dimension_numbers<[1], [0], [0], [1], [0, 0, 1, 1], [], []>} : vector<32x16xbf16>, vector<16x16xbf16>, vector<32x16xf32> -> vector<32x16xf32>
    %cst_60 = arith.constant dense<0.000000e+00> : vector<32x16xf32>
    %134 = tpu.matmul %127, %130, %cst_60 {dimension_numbers = #tpu.dot_dimension_numbers<[1], [0], [0], [1], [0, 0, 1, 1], [], []>} : vector<32x16xbf16>, vector<16x16xbf16>, vector<32x16xf32> -> vector<32x16xf32>
    %135 = arith.subf %133, %134 : vector<32x16xf32>
    %136 = vector.broadcast %132 : vector<1x16xf32> to vector<32x16xf32>
    %137 = arith.addf %135, %136 : vector<32x16xf32>
    %138 = arith.truncf %134 : vector<32x16xf32> to vector<32x16xbf16>
    %cst_61 = arith.constant 1.000000e+00 : f32
    %139 = vector.broadcast %cst_61 : f32 to vector<1x16xf32>
    %140 = arith.mulf %128, %128 : vector<32x16xf32>
    %cst_62 = arith.constant dense<0.000000e+00> : vector<1x32xf32>
    %141 = tpu.matmul %139, %140, %cst_62 {dimension_numbers = #tpu.dot_dimension_numbers<[1], [1], [0], [0], [0, 0, 1, 0], [], []>} : vector<1x16xf32>, vector<32x16xf32>, vector<1x32xf32> -> vector<1x32xf32>
    %142 = tpu.iota {dimensions = array<i32: 1>} : vector<1x32xi32>
    %cst_63 = arith.constant dense<0.000000e+00> : vector<32x32xf32>
    %143 = tpu.matmul %127, %127, %cst_63 {dimension_numbers = #tpu.dot_dimension_numbers<[1], [1], [0], [0], [0, 0, 1, 0], [], []>} : vector<32x16xbf16>, vector<32x16xbf16>, vector<32x32xf32> -> vector<32x32xf32>
    %cst_64 = arith.constant 2.000000e+00 : f32
    %144 = vector.broadcast %cst_64 : f32 to vector<32x32xf32>
    %145 = arith.mulf %144, %143 : vector<32x32xf32>
    %146 = vector.broadcast %141 : vector<1x32xf32> to vector<32x32xf32>
    %147 = arith.subf %146, %145 : vector<32x32xf32>
    %148 = tpu.bitcast %147 : vector<32x32xf32> -> vector<32x32xi32>
    %c0_i32_65 = arith.constant 0 : i32
    %149 = vector.broadcast %c0_i32_65 : i32 to vector<32x32xi32>
    %150 = arith.cmpi sge, %148, %149 : vector<32x32xi32>
    %c-2147483648_i32_66 = arith.constant -2147483648 : i32
    %151 = vector.broadcast %c-2147483648_i32_66 : i32 to vector<32x32xi32>
    %152 = arith.subi %151, %148 : vector<32x32xi32>
    %153 = arith.select %150, %148, %152 : vector<32x32xi1>, vector<32x32xi32>
    %c-32_i32_67 = arith.constant -32 : i32
    %154 = vector.broadcast %c-32_i32_67 : i32 to vector<32x32xi32>
    %155 = arith.andi %153, %154 : vector<32x32xi32>
    %156 = vector.broadcast %142 : vector<1x32xi32> to vector<32x32xi32>
    %157 = arith.ori %155, %156 : vector<32x32xi32>
    %cst_68 = arith.constant dense<2147483647> : vector<32xi32>
    %158 = vector.multi_reduction <minsi>, %157, %cst_68 [1] : vector<32x32xi32> to vector<32xi32>
    %159 = vector.shape_cast %158 : vector<32xi32> to vector<32x1xi32>
    %160 = vector.broadcast %159 : vector<32x1xi32> to vector<32x32xi32>
    %161 = arith.cmpi eq, %157, %160 : vector<32x32xi32>
    %c2147483647_i32_69 = arith.constant 2147483647 : i32
    %162 = vector.broadcast %c2147483647_i32_69 : i32 to vector<32x32xi32>
    %163 = arith.select %161, %162, %157 : vector<32x32xi1>, vector<32x32xi32>
    %164 = arith.extui %161 : vector<32x32xi1> to vector<32x32xi32>
    %165 = arith.sitofp %164 : vector<32x32xi32> to vector<32x32xf32>
    %166 = arith.truncf %165 : vector<32x32xf32> to vector<32x32xbf16>
    %cst_70 = arith.constant dense<0.000000e+00> : vector<32x16xf32>
    %167 = tpu.matmul %166, %138, %cst_70 {dimension_numbers = #tpu.dot_dimension_numbers<[1], [0], [0], [1], [0, 0, 1, 1], [], []>} : vector<32x32xbf16>, vector<32x16xbf16>, vector<32x16xf32> -> vector<32x16xf32>
    %168 = arith.addf %167, %137 : vector<32x16xf32>
    %cst_71 = arith.constant 0.000000e+00 : f32
    %169 = vector.broadcast %cst_71 : f32 to vector<32x16xf32>
    %170 = arith.maximumf %168, %169 : vector<32x16xf32>
    %171 = arith.truncf %170 : vector<32x16xf32> to vector<32x16xbf16>
    %c0_72 = arith.constant 0 : index
    %c0_73 = arith.constant 0 : index
    %172 = vector.load %arg6[%c0_72, %c0_73] : memref<17x16xbf16, #tpu.memory_space<vmem>>, vector<16x16xbf16>
    %cst_74 = arith.constant dense<0.000000e+00> : vector<32x16xf32>
    %173 = tpu.matmul %171, %172, %cst_74 {dimension_numbers = #tpu.dot_dimension_numbers<[1], [0], [0], [1], [0, 0, 1, 1], [], []>} : vector<32x16xbf16>, vector<16x16xbf16>, vector<32x16xf32> -> vector<32x16xf32>
    %c16_75 = arith.constant 16 : index
    %c0_76 = arith.constant 0 : index
    %174 = vector.load %arg6[%c16_75, %c0_76] : memref<17x16xbf16, #tpu.memory_space<vmem>>, vector<1x16xbf16>
    %175 = arith.extf %174 : vector<1x16xbf16> to vector<1x16xf32>
    %176 = vector.broadcast %175 : vector<1x16xf32> to vector<32x16xf32>
    %177 = arith.addf %173, %176 : vector<32x16xf32>
    %cst_77 = arith.constant 0.000000e+00 : f32
    %178 = vector.broadcast %cst_77 : f32 to vector<32x16xf32>
    %179 = arith.maximumf %177, %178 : vector<32x16xf32>
    %cst_78 = arith.constant dense<2147483647> : vector<32xi32>
    %180 = vector.multi_reduction <minsi>, %163, %cst_78 [1] : vector<32x32xi32> to vector<32xi32>
    %181 = vector.shape_cast %180 : vector<32xi32> to vector<32x1xi32>
    %182 = vector.broadcast %181 : vector<32x1xi32> to vector<32x32xi32>
    %183 = arith.cmpi eq, %163, %182 : vector<32x32xi32>
    %c2147483647_i32_79 = arith.constant 2147483647 : i32
    %184 = vector.broadcast %c2147483647_i32_79 : i32 to vector<32x32xi32>
    %185 = arith.select %183, %184, %163 : vector<32x32xi1>, vector<32x32xi32>
    %186 = arith.extui %183 : vector<32x32xi1> to vector<32x32xi32>
    %187 = arith.sitofp %186 : vector<32x32xi32> to vector<32x32xf32>
    %188 = arith.truncf %187 : vector<32x32xf32> to vector<32x32xbf16>
    %cst_80 = arith.constant dense<0.000000e+00> : vector<32x16xf32>
    %189 = tpu.matmul %188, %138, %cst_80 {dimension_numbers = #tpu.dot_dimension_numbers<[1], [0], [0], [1], [0, 0, 1, 1], [], []>} : vector<32x32xbf16>, vector<32x16xbf16>, vector<32x16xf32> -> vector<32x16xf32>
    %190 = arith.addf %189, %137 : vector<32x16xf32>
    %cst_81 = arith.constant 0.000000e+00 : f32
    %191 = vector.broadcast %cst_81 : f32 to vector<32x16xf32>
    %192 = arith.maximumf %190, %191 : vector<32x16xf32>
    %193 = arith.truncf %192 : vector<32x16xf32> to vector<32x16xbf16>
    %c0_82 = arith.constant 0 : index
    %c0_83 = arith.constant 0 : index
    %194 = vector.load %arg6[%c0_82, %c0_83] : memref<17x16xbf16, #tpu.memory_space<vmem>>, vector<16x16xbf16>
    %cst_84 = arith.constant dense<0.000000e+00> : vector<32x16xf32>
    %195 = tpu.matmul %193, %194, %cst_84 {dimension_numbers = #tpu.dot_dimension_numbers<[1], [0], [0], [1], [0, 0, 1, 1], [], []>} : vector<32x16xbf16>, vector<16x16xbf16>, vector<32x16xf32> -> vector<32x16xf32>
    %c16_85 = arith.constant 16 : index
    %c0_86 = arith.constant 0 : index
    %196 = vector.load %arg6[%c16_85, %c0_86] : memref<17x16xbf16, #tpu.memory_space<vmem>>, vector<1x16xbf16>
    %197 = arith.extf %196 : vector<1x16xbf16> to vector<1x16xf32>
    %198 = vector.broadcast %197 : vector<1x16xf32> to vector<32x16xf32>
    %199 = arith.addf %195, %198 : vector<32x16xf32>
    %cst_87 = arith.constant 0.000000e+00 : f32
    %200 = vector.broadcast %cst_87 : f32 to vector<32x16xf32>
    %201 = arith.maximumf %199, %200 : vector<32x16xf32>
    %202 = arith.maximumf %179, %201 : vector<32x16xf32>
    %cst_88 = arith.constant dense<2147483647> : vector<32xi32>
    %203 = vector.multi_reduction <minsi>, %185, %cst_88 [1] : vector<32x32xi32> to vector<32xi32>
    %204 = vector.shape_cast %203 : vector<32xi32> to vector<32x1xi32>
    %205 = vector.broadcast %204 : vector<32x1xi32> to vector<32x32xi32>
    %206 = arith.cmpi eq, %185, %205 : vector<32x32xi32>
    %c2147483647_i32_89 = arith.constant 2147483647 : i32
    %207 = vector.broadcast %c2147483647_i32_89 : i32 to vector<32x32xi32>
    %208 = arith.select %206, %207, %185 : vector<32x32xi1>, vector<32x32xi32>
    %209 = arith.extui %206 : vector<32x32xi1> to vector<32x32xi32>
    %210 = arith.sitofp %209 : vector<32x32xi32> to vector<32x32xf32>
    %211 = arith.truncf %210 : vector<32x32xf32> to vector<32x32xbf16>
    %cst_90 = arith.constant dense<0.000000e+00> : vector<32x16xf32>
    %212 = tpu.matmul %211, %138, %cst_90 {dimension_numbers = #tpu.dot_dimension_numbers<[1], [0], [0], [1], [0, 0, 1, 1], [], []>} : vector<32x32xbf16>, vector<32x16xbf16>, vector<32x16xf32> -> vector<32x16xf32>
    %213 = arith.addf %212, %137 : vector<32x16xf32>
    %cst_91 = arith.constant 0.000000e+00 : f32
    %214 = vector.broadcast %cst_91 : f32 to vector<32x16xf32>
    %215 = arith.maximumf %213, %214 : vector<32x16xf32>
    %216 = arith.truncf %215 : vector<32x16xf32> to vector<32x16xbf16>
    %c0_92 = arith.constant 0 : index
    %c0_93 = arith.constant 0 : index
    %217 = vector.load %arg6[%c0_92, %c0_93] : memref<17x16xbf16, #tpu.memory_space<vmem>>, vector<16x16xbf16>
    %cst_94 = arith.constant dense<0.000000e+00> : vector<32x16xf32>
    %218 = tpu.matmul %216, %217, %cst_94 {dimension_numbers = #tpu.dot_dimension_numbers<[1], [0], [0], [1], [0, 0, 1, 1], [], []>} : vector<32x16xbf16>, vector<16x16xbf16>, vector<32x16xf32> -> vector<32x16xf32>
    %c16_95 = arith.constant 16 : index
    %c0_96 = arith.constant 0 : index
    %219 = vector.load %arg6[%c16_95, %c0_96] : memref<17x16xbf16, #tpu.memory_space<vmem>>, vector<1x16xbf16>
    %220 = arith.extf %219 : vector<1x16xbf16> to vector<1x16xf32>
    %221 = vector.broadcast %220 : vector<1x16xf32> to vector<32x16xf32>
    %222 = arith.addf %218, %221 : vector<32x16xf32>
    %cst_97 = arith.constant 0.000000e+00 : f32
    %223 = vector.broadcast %cst_97 : f32 to vector<32x16xf32>
    %224 = arith.maximumf %222, %223 : vector<32x16xf32>
    %225 = arith.maximumf %202, %224 : vector<32x16xf32>
    %cst_98 = arith.constant dense<2147483647> : vector<32xi32>
    %226 = vector.multi_reduction <minsi>, %208, %cst_98 [1] : vector<32x32xi32> to vector<32xi32>
    %227 = vector.shape_cast %226 : vector<32xi32> to vector<32x1xi32>
    %228 = vector.broadcast %227 : vector<32x1xi32> to vector<32x32xi32>
    %229 = arith.cmpi eq, %208, %228 : vector<32x32xi32>
    %230 = arith.extui %229 : vector<32x32xi1> to vector<32x32xi32>
    %231 = arith.sitofp %230 : vector<32x32xi32> to vector<32x32xf32>
    %232 = arith.truncf %231 : vector<32x32xf32> to vector<32x32xbf16>
    %cst_99 = arith.constant dense<0.000000e+00> : vector<32x16xf32>
    %233 = tpu.matmul %232, %138, %cst_99 {dimension_numbers = #tpu.dot_dimension_numbers<[1], [0], [0], [1], [0, 0, 1, 1], [], []>} : vector<32x32xbf16>, vector<32x16xbf16>, vector<32x16xf32> -> vector<32x16xf32>
    %234 = arith.addf %233, %137 : vector<32x16xf32>
    %cst_100 = arith.constant 0.000000e+00 : f32
    %235 = vector.broadcast %cst_100 : f32 to vector<32x16xf32>
    %236 = arith.maximumf %234, %235 : vector<32x16xf32>
    %237 = arith.truncf %236 : vector<32x16xf32> to vector<32x16xbf16>
    %c0_101 = arith.constant 0 : index
    %c0_102 = arith.constant 0 : index
    %238 = vector.load %arg6[%c0_101, %c0_102] : memref<17x16xbf16, #tpu.memory_space<vmem>>, vector<16x16xbf16>
    %cst_103 = arith.constant dense<0.000000e+00> : vector<32x16xf32>
    %239 = tpu.matmul %237, %238, %cst_103 {dimension_numbers = #tpu.dot_dimension_numbers<[1], [0], [0], [1], [0, 0, 1, 1], [], []>} : vector<32x16xbf16>, vector<16x16xbf16>, vector<32x16xf32> -> vector<32x16xf32>
    %c16_104 = arith.constant 16 : index
    %c0_105 = arith.constant 0 : index
    %240 = vector.load %arg6[%c16_104, %c0_105] : memref<17x16xbf16, #tpu.memory_space<vmem>>, vector<1x16xbf16>
    %241 = arith.extf %240 : vector<1x16xbf16> to vector<1x16xf32>
    %242 = vector.broadcast %241 : vector<1x16xf32> to vector<32x16xf32>
    %243 = arith.addf %239, %242 : vector<32x16xf32>
    %cst_106 = arith.constant 0.000000e+00 : f32
    %244 = vector.broadcast %cst_106 : f32 to vector<32x16xf32>
    %245 = arith.maximumf %243, %244 : vector<32x16xf32>
    %246 = arith.maximumf %225, %245 : vector<32x16xf32>
    %247 = arith.truncf %246 : vector<32x16xf32> to vector<32x16xbf16>
    %248 = arith.extf %247 : vector<32x16xbf16> to vector<32x16xf32>
    %c0_107 = arith.constant 0 : index
    %c0_108 = arith.constant 0 : index
    %249 = vector.load %arg7[%c0_107, %c0_108] : memref<33x16xbf16, #tpu.memory_space<vmem>>, vector<16x16xbf16>
    %c16_109 = arith.constant 16 : index
    %c0_110 = arith.constant 0 : index
    %250 = vector.load %arg7[%c16_109, %c0_110] : memref<33x16xbf16, #tpu.memory_space<vmem>>, vector<16x16xbf16>
    %c32_111 = arith.constant 32 : index
    %c0_112 = arith.constant 0 : index
    %251 = vector.load %arg7[%c32_111, %c0_112] : memref<33x16xbf16, #tpu.memory_space<vmem>>, vector<1x16xbf16>
    %252 = arith.extf %251 : vector<1x16xbf16> to vector<1x16xf32>
    %cst_113 = arith.constant dense<0.000000e+00> : vector<32x16xf32>
    %253 = tpu.matmul %247, %249, %cst_113 {dimension_numbers = #tpu.dot_dimension_numbers<[1], [0], [0], [1], [0, 0, 1, 1], [], []>} : vector<32x16xbf16>, vector<16x16xbf16>, vector<32x16xf32> -> vector<32x16xf32>
    %cst_114 = arith.constant dense<0.000000e+00> : vector<32x16xf32>
    %254 = tpu.matmul %247, %250, %cst_114 {dimension_numbers = #tpu.dot_dimension_numbers<[1], [0], [0], [1], [0, 0, 1, 1], [], []>} : vector<32x16xbf16>, vector<16x16xbf16>, vector<32x16xf32> -> vector<32x16xf32>
    %255 = arith.subf %253, %254 : vector<32x16xf32>
    %256 = vector.broadcast %252 : vector<1x16xf32> to vector<32x16xf32>
    %257 = arith.addf %255, %256 : vector<32x16xf32>
    %258 = arith.truncf %254 : vector<32x16xf32> to vector<32x16xbf16>
    %cst_115 = arith.constant 1.000000e+00 : f32
    %259 = vector.broadcast %cst_115 : f32 to vector<1x16xf32>
    %260 = arith.mulf %248, %248 : vector<32x16xf32>
    %cst_116 = arith.constant dense<0.000000e+00> : vector<1x32xf32>
    %261 = tpu.matmul %259, %260, %cst_116 {dimension_numbers = #tpu.dot_dimension_numbers<[1], [1], [0], [0], [0, 0, 1, 0], [], []>} : vector<1x16xf32>, vector<32x16xf32>, vector<1x32xf32> -> vector<1x32xf32>
    %262 = tpu.iota {dimensions = array<i32: 1>} : vector<1x32xi32>
    %cst_117 = arith.constant dense<0.000000e+00> : vector<32x32xf32>
    %263 = tpu.matmul %247, %247, %cst_117 {dimension_numbers = #tpu.dot_dimension_numbers<[1], [1], [0], [0], [0, 0, 1, 0], [], []>} : vector<32x16xbf16>, vector<32x16xbf16>, vector<32x32xf32> -> vector<32x32xf32>
    %cst_118 = arith.constant 2.000000e+00 : f32
    %264 = vector.broadcast %cst_118 : f32 to vector<32x32xf32>
    %265 = arith.mulf %264, %263 : vector<32x32xf32>
    %266 = vector.broadcast %261 : vector<1x32xf32> to vector<32x32xf32>
    %267 = arith.subf %266, %265 : vector<32x32xf32>
    %268 = tpu.bitcast %267 : vector<32x32xf32> -> vector<32x32xi32>
    %c0_i32_119 = arith.constant 0 : i32
    %269 = vector.broadcast %c0_i32_119 : i32 to vector<32x32xi32>
    %270 = arith.cmpi sge, %268, %269 : vector<32x32xi32>
    %c-2147483648_i32_120 = arith.constant -2147483648 : i32
    %271 = vector.broadcast %c-2147483648_i32_120 : i32 to vector<32x32xi32>
    %272 = arith.subi %271, %268 : vector<32x32xi32>
    %273 = arith.select %270, %268, %272 : vector<32x32xi1>, vector<32x32xi32>
    %c-32_i32_121 = arith.constant -32 : i32
    %274 = vector.broadcast %c-32_i32_121 : i32 to vector<32x32xi32>
    %275 = arith.andi %273, %274 : vector<32x32xi32>
    %276 = vector.broadcast %262 : vector<1x32xi32> to vector<32x32xi32>
    %277 = arith.ori %275, %276 : vector<32x32xi32>
    %cst_122 = arith.constant dense<2147483647> : vector<32xi32>
    %278 = vector.multi_reduction <minsi>, %277, %cst_122 [1] : vector<32x32xi32> to vector<32xi32>
    %279 = vector.shape_cast %278 : vector<32xi32> to vector<32x1xi32>
    %280 = vector.broadcast %279 : vector<32x1xi32> to vector<32x32xi32>
    %281 = arith.cmpi eq, %277, %280 : vector<32x32xi32>
    %c2147483647_i32_123 = arith.constant 2147483647 : i32
    %282 = vector.broadcast %c2147483647_i32_123 : i32 to vector<32x32xi32>
    %283 = arith.select %281, %282, %277 : vector<32x32xi1>, vector<32x32xi32>
    %284 = arith.extui %281 : vector<32x32xi1> to vector<32x32xi32>
    %285 = arith.sitofp %284 : vector<32x32xi32> to vector<32x32xf32>
    %286 = arith.truncf %285 : vector<32x32xf32> to vector<32x32xbf16>
    %cst_124 = arith.constant dense<0.000000e+00> : vector<32x16xf32>
    %287 = tpu.matmul %286, %258, %cst_124 {dimension_numbers = #tpu.dot_dimension_numbers<[1], [0], [0], [1], [0, 0, 1, 1], [], []>} : vector<32x32xbf16>, vector<32x16xbf16>, vector<32x16xf32> -> vector<32x16xf32>
    %288 = arith.addf %287, %257 : vector<32x16xf32>
    %cst_125 = arith.constant 0.000000e+00 : f32
    %289 = vector.broadcast %cst_125 : f32 to vector<32x16xf32>
    %290 = arith.maximumf %288, %289 : vector<32x16xf32>
    %cst_126 = arith.constant dense<2147483647> : vector<32xi32>
    %291 = vector.multi_reduction <minsi>, %283, %cst_126 [1] : vector<32x32xi32> to vector<32xi32>
    %292 = vector.shape_cast %291 : vector<32xi32> to vector<32x1xi32>
    %293 = vector.broadcast %292 : vector<32x1xi32> to vector<32x32xi32>
    %294 = arith.cmpi eq, %283, %293 : vector<32x32xi32>
    %c2147483647_i32_127 = arith.constant 2147483647 : i32
    %295 = vector.broadcast %c2147483647_i32_127 : i32 to vector<32x32xi32>
    %296 = arith.select %294, %295, %283 : vector<32x32xi1>, vector<32x32xi32>
    %297 = arith.extui %294 : vector<32x32xi1> to vector<32x32xi32>
    %298 = arith.sitofp %297 : vector<32x32xi32> to vector<32x32xf32>
    %299 = arith.truncf %298 : vector<32x32xf32> to vector<32x32xbf16>
    %cst_128 = arith.constant dense<0.000000e+00> : vector<32x16xf32>
    %300 = tpu.matmul %299, %258, %cst_128 {dimension_numbers = #tpu.dot_dimension_numbers<[1], [0], [0], [1], [0, 0, 1, 1], [], []>} : vector<32x32xbf16>, vector<32x16xbf16>, vector<32x16xf32> -> vector<32x16xf32>
    %301 = arith.addf %300, %257 : vector<32x16xf32>
    %cst_129 = arith.constant 0.000000e+00 : f32
    %302 = vector.broadcast %cst_129 : f32 to vector<32x16xf32>
    %303 = arith.maximumf %301, %302 : vector<32x16xf32>
    %304 = arith.maximumf %290, %303 : vector<32x16xf32>
    %cst_130 = arith.constant dense<2147483647> : vector<32xi32>
    %305 = vector.multi_reduction <minsi>, %296, %cst_130 [1] : vector<32x32xi32> to vector<32xi32>
    %306 = vector.shape_cast %305 : vector<32xi32> to vector<32x1xi32>
    %307 = vector.broadcast %306 : vector<32x1xi32> to vector<32x32xi32>
    %308 = arith.cmpi eq, %296, %307 : vector<32x32xi32>
    %c2147483647_i32_131 = arith.constant 2147483647 : i32
    %309 = vector.broadcast %c2147483647_i32_131 : i32 to vector<32x32xi32>
    %310 = arith.select %308, %309, %296 : vector<32x32xi1>, vector<32x32xi32>
    %311 = arith.extui %308 : vector<32x32xi1> to vector<32x32xi32>
    %312 = arith.sitofp %311 : vector<32x32xi32> to vector<32x32xf32>
    %313 = arith.truncf %312 : vector<32x32xf32> to vector<32x32xbf16>
    %cst_132 = arith.constant dense<0.000000e+00> : vector<32x16xf32>
    %314 = tpu.matmul %313, %258, %cst_132 {dimension_numbers = #tpu.dot_dimension_numbers<[1], [0], [0], [1], [0, 0, 1, 1], [], []>} : vector<32x32xbf16>, vector<32x16xbf16>, vector<32x16xf32> -> vector<32x16xf32>
    %315 = arith.addf %314, %257 : vector<32x16xf32>
    %cst_133 = arith.constant 0.000000e+00 : f32
    %316 = vector.broadcast %cst_133 : f32 to vector<32x16xf32>
    %317 = arith.maximumf %315, %316 : vector<32x16xf32>
    %318 = arith.maximumf %304, %317 : vector<32x16xf32>
    %cst_134 = arith.constant dense<2147483647> : vector<32xi32>
    %319 = vector.multi_reduction <minsi>, %310, %cst_134 [1] : vector<32x32xi32> to vector<32xi32>
    %320 = vector.shape_cast %319 : vector<32xi32> to vector<32x1xi32>
    %321 = vector.broadcast %320 : vector<32x1xi32> to vector<32x32xi32>
    %322 = arith.cmpi eq, %310, %321 : vector<32x32xi32>
    %323 = arith.extui %322 : vector<32x32xi1> to vector<32x32xi32>
    %324 = arith.sitofp %323 : vector<32x32xi32> to vector<32x32xf32>
    %325 = arith.truncf %324 : vector<32x32xf32> to vector<32x32xbf16>
    %cst_135 = arith.constant dense<0.000000e+00> : vector<32x16xf32>
    %326 = tpu.matmul %325, %258, %cst_135 {dimension_numbers = #tpu.dot_dimension_numbers<[1], [0], [0], [1], [0, 0, 1, 1], [], []>} : vector<32x32xbf16>, vector<32x16xbf16>, vector<32x16xf32> -> vector<32x16xf32>
    %327 = arith.addf %326, %257 : vector<32x16xf32>
    %cst_136 = arith.constant 0.000000e+00 : f32
    %328 = vector.broadcast %cst_136 : f32 to vector<32x16xf32>
    %329 = arith.maximumf %327, %328 : vector<32x16xf32>
    %330 = arith.maximumf %318, %329 : vector<32x16xf32>
    %331 = arith.truncf %126 : vector<32x16xf32> to vector<32x16xbf16>
    %c0_137 = arith.constant 0 : index
    %c0_138 = arith.constant 0 : index
    %332 = vector.load %arg8[%c0_137, %c0_138] : memref<49x64xbf16, #tpu.memory_space<vmem>>, vector<16x64xbf16>
    %cst_139 = arith.constant dense<0.000000e+00> : vector<32x64xf32>
    %333 = tpu.matmul %331, %332, %cst_139 {dimension_numbers = #tpu.dot_dimension_numbers<[1], [0], [0], [1], [0, 0, 1, 1], [], []>} : vector<32x16xbf16>, vector<16x64xbf16>, vector<32x64xf32> -> vector<32x64xf32>
    %334 = arith.truncf %246 : vector<32x16xf32> to vector<32x16xbf16>
    %c16_140 = arith.constant 16 : index
    %c0_141 = arith.constant 0 : index
    %335 = vector.load %arg8[%c16_140, %c0_141] : memref<49x64xbf16, #tpu.memory_space<vmem>>, vector<16x64xbf16>
    %cst_142 = arith.constant dense<0.000000e+00> : vector<32x64xf32>
    %336 = tpu.matmul %334, %335, %cst_142 {dimension_numbers = #tpu.dot_dimension_numbers<[1], [0], [0], [1], [0, 0, 1, 1], [], []>} : vector<32x16xbf16>, vector<16x64xbf16>, vector<32x64xf32> -> vector<32x64xf32>
    %337 = arith.addf %333, %336 : vector<32x64xf32>
    %338 = arith.truncf %330 : vector<32x16xf32> to vector<32x16xbf16>
    %c32_143 = arith.constant 32 : index
    %c0_144 = arith.constant 0 : index
    %339 = vector.load %arg8[%c32_143, %c0_144] : memref<49x64xbf16, #tpu.memory_space<vmem>>, vector<16x64xbf16>
    %cst_145 = arith.constant dense<0.000000e+00> : vector<32x64xf32>
    %340 = tpu.matmul %338, %339, %cst_145 {dimension_numbers = #tpu.dot_dimension_numbers<[1], [0], [0], [1], [0, 0, 1, 1], [], []>} : vector<32x16xbf16>, vector<16x64xbf16>, vector<32x64xf32> -> vector<32x64xf32>
    %341 = arith.addf %337, %340 : vector<32x64xf32>
    %c48 = arith.constant 48 : index
    %c0_146 = arith.constant 0 : index
    %342 = vector.load %arg8[%c48, %c0_146] : memref<49x64xbf16, #tpu.memory_space<vmem>>, vector<1x64xbf16>
    %343 = arith.extf %342 : vector<1x64xbf16> to vector<1x64xf32>
    %344 = vector.broadcast %343 : vector<1x64xf32> to vector<32x64xf32>
    %345 = arith.addf %341, %344 : vector<32x64xf32>
    %cst_147 = arith.constant 0.000000e+00 : f32
    %346 = vector.broadcast %cst_147 : f32 to vector<32x64xf32>
    %347 = arith.maximumf %345, %346 : vector<32x64xf32>
    %cst_148 = arith.constant dense<0xFF800000> : vector<64xf32>
    %348 = vector.multi_reduction <maximumf>, %347, %cst_148 [0] : vector<32x64xf32> to vector<64xf32>
    %349 = vector.shape_cast %348 : vector<64xf32> to vector<1x64xf32>
    %c0_149 = arith.constant 0 : index
    %c0_150 = arith.constant 0 : index
    %c0_151 = arith.constant 0 : index
    %350 = vector.load %arg15[%c0_149, %c0_150, %c0_151] : memref<1x1x64xf32, #tpu.memory_space<vmem>>, vector<1x1x64xf32>
    %351 = vector.shape_cast %350 : vector<1x1x64xf32> to vector<1x64xf32>
    %352 = vector.shape_cast %349 : vector<1x64xf32> to vector<1x1x64xf32>
    tpu.vector_store %arg15[%c0_149, %c0_150, %c0_151], %352 {strides = array<i32>} : memref<1x1x64xf32, #tpu.memory_space<vmem>>, vector<1x1x64xf32>,
    %353 = arith.truncf %126 : vector<32x16xf32> to vector<32x16xbf16>
    %c0_152 = arith.constant 0 : index
    %c0_153 = arith.constant 0 : index
    %354 = vector.load %arg9[%c0_152, %c0_153] : memref<113x32xbf16, #tpu.memory_space<vmem>>, vector<16x32xbf16>
    %cst_154 = arith.constant dense<0.000000e+00> : vector<32x32xf32>
    %355 = tpu.matmul %353, %354, %cst_154 {dimension_numbers = #tpu.dot_dimension_numbers<[1], [0], [0], [1], [0, 0, 1, 1], [], []>} : vector<32x16xbf16>, vector<16x32xbf16>, vector<32x32xf32> -> vector<32x32xf32>
    %356 = arith.truncf %246 : vector<32x16xf32> to vector<32x16xbf16>
    %c16_155 = arith.constant 16 : index
    %c0_156 = arith.constant 0 : index
    %357 = vector.load %arg9[%c16_155, %c0_156] : memref<113x32xbf16, #tpu.memory_space<vmem>>, vector<16x32xbf16>
    %cst_157 = arith.constant dense<0.000000e+00> : vector<32x32xf32>
    %358 = tpu.matmul %356, %357, %cst_157 {dimension_numbers = #tpu.dot_dimension_numbers<[1], [0], [0], [1], [0, 0, 1, 1], [], []>} : vector<32x16xbf16>, vector<16x32xbf16>, vector<32x32xf32> -> vector<32x32xf32>
    %359 = arith.addf %355, %358 : vector<32x32xf32>
    %360 = arith.truncf %330 : vector<32x16xf32> to vector<32x16xbf16>
    %c32_158 = arith.constant 32 : index
    %c0_159 = arith.constant 0 : index
    %361 = vector.load %arg9[%c32_158, %c0_159] : memref<113x32xbf16, #tpu.memory_space<vmem>>, vector<16x32xbf16>
    %cst_160 = arith.constant dense<0.000000e+00> : vector<32x32xf32>
    %362 = tpu.matmul %360, %361, %cst_160 {dimension_numbers = #tpu.dot_dimension_numbers<[1], [0], [0], [1], [0, 0, 1, 1], [], []>} : vector<32x16xbf16>, vector<16x32xbf16>, vector<32x32xf32> -> vector<32x32xf32>
    %363 = arith.addf %359, %362 : vector<32x32xf32>
    %364 = arith.truncf %349 : vector<1x64xf32> to vector<1x64xbf16>
    %c48_161 = arith.constant 48 : index
    %c0_162 = arith.constant 0 : index
    %365 = vector.load %arg9[%c48_161, %c0_162] : memref<113x32xbf16, #tpu.memory_space<vmem>>, vector<64x32xbf16>
    %cst_163 = arith.constant dense<0.000000e+00> : vector<1x32xf32>
    %366 = tpu.matmul %364, %365, %cst_163 {dimension_numbers = #tpu.dot_dimension_numbers<[1], [0], [0], [1], [0, 0, 1, 1], [], []>} : vector<1x64xbf16>, vector<64x32xbf16>, vector<1x32xf32> -> vector<1x32xf32>
    %367 = vector.broadcast %366 : vector<1x32xf32> to vector<32x32xf32>
    %368 = arith.addf %363, %367 : vector<32x32xf32>
    %c112 = arith.constant 112 : index
    %c0_164 = arith.constant 0 : index
    %369 = vector.load %arg9[%c112, %c0_164] : memref<113x32xbf16, #tpu.memory_space<vmem>>, vector<1x32xbf16>
    %370 = arith.extf %369 : vector<1x32xbf16> to vector<1x32xf32>
    %371 = vector.broadcast %370 : vector<1x32xf32> to vector<32x32xf32>
    %372 = arith.addf %368, %371 : vector<32x32xf32>
    %cst_165 = arith.constant 0.000000e+00 : f32
    %373 = vector.broadcast %cst_165 : f32 to vector<32x32xf32>
    %374 = arith.maximumf %372, %373 : vector<32x32xf32>
    %375 = arith.truncf %374 : vector<32x32xf32> to vector<32x32xbf16>
    %c0_166 = arith.constant 0 : index
    %c0_167 = arith.constant 0 : index
    %376 = vector.load %arg10[%c0_166, %c0_167] : memref<33x32xbf16, #tpu.memory_space<vmem>>, vector<32x32xbf16>
    %cst_168 = arith.constant dense<0.000000e+00> : vector<32x32xf32>
    %377 = tpu.matmul %375, %376, %cst_168 {dimension_numbers = #tpu.dot_dimension_numbers<[1], [0], [0], [1], [0, 0, 1, 1], [], []>} : vector<32x32xbf16>, vector<32x32xbf16>, vector<32x32xf32> -> vector<32x32xf32>
    %c32_169 = arith.constant 32 : index
    %c0_170 = arith.constant 0 : index
    %378 = vector.load %arg10[%c32_169, %c0_170] : memref<33x32xbf16, #tpu.memory_space<vmem>>, vector<1x32xbf16>
    %379 = arith.extf %378 : vector<1x32xbf16> to vector<1x32xf32>
    %380 = vector.broadcast %379 : vector<1x32xf32> to vector<32x32xf32>
    %381 = arith.addf %377, %380 : vector<32x32xf32>
    %cst_171 = arith.constant 0.000000e+00 : f32
    %382 = vector.broadcast %cst_171 : f32 to vector<32x32xf32>
    %383 = arith.maximumf %381, %382 : vector<32x32xf32>
    %384 = arith.truncf %383 : vector<32x32xf32> to vector<32x32xbf16>
    %c0_172 = arith.constant 0 : index
    %c0_173 = arith.constant 0 : index
    %385 = vector.load %arg11[%c0_172, %c0_173] : memref<33x16xbf16, #tpu.memory_space<vmem>>, vector<32x16xbf16>
    %cst_174 = arith.constant dense<0.000000e+00> : vector<32x16xf32>
    %386 = tpu.matmul %384, %385, %cst_174 {dimension_numbers = #tpu.dot_dimension_numbers<[1], [0], [0], [1], [0, 0, 1, 1], [], []>} : vector<32x32xbf16>, vector<32x16xbf16>, vector<32x16xf32> -> vector<32x16xf32>
    %c32_175 = arith.constant 32 : index
    %c0_176 = arith.constant 0 : index
    %387 = vector.load %arg11[%c32_175, %c0_176] : memref<33x16xbf16, #tpu.memory_space<vmem>>, vector<1x16xbf16>
    %388 = arith.extf %387 : vector<1x16xbf16> to vector<1x16xf32>
    %389 = vector.broadcast %388 : vector<1x16xf32> to vector<32x16xf32>
    %390 = arith.addf %386, %389 : vector<32x16xf32>
    %cst_177 = arith.constant 0.000000e+00 : f32
    %391 = vector.broadcast %cst_177 : f32 to vector<32x16xf32>
    %392 = arith.maximumf %390, %391 : vector<32x16xf32>
    %c0_178 = arith.constant 0 : index
    %c0_179 = arith.constant 0 : index
    %393 = vector.load %arg12[%c0_178, %c0_179] : memref<8x16xbf16, #tpu.memory_space<vmem>>, vector<8x16xbf16>
    %394 = arith.truncf %392 : vector<32x16xf32> to vector<32x16xbf16>
    %cst_180 = arith.constant dense<0.000000e+00> : vector<8x32xf32>
    %395 = tpu.matmul %393, %394, %cst_180 {dimension_numbers = #tpu.dot_dimension_numbers<[1], [1], [0], [0], [0, 0, 1, 0], [], []>} : vector<8x16xbf16>, vector<32x16xbf16>, vector<8x32xf32> -> vector<8x32xf32>
    %c0_181 = arith.constant 0 : index
    %c0_182 = arith.constant 0 : index
    %396 = vector.load %arg13[%c0_181, %c0_182] : memref<8x1xf32, #tpu.memory_space<vmem>>, vector<8x1xf32>
    %397 = vector.broadcast %396 : vector<8x1xf32> to vector<8x32xf32>
    %398 = arith.addf %395, %397 : vector<8x32xf32>
    %c0_183 = arith.constant 0 : index
    %c0_184 = arith.constant 0 : index
    %c0_185 = arith.constant 0 : index
    %399 = vector.load %arg14[%c0_183, %c0_184, %c0_185] : memref<1x8x32xf32, #tpu.memory_space<vmem>>, vector<1x8x32xf32>
    %400 = vector.shape_cast %399 : vector<1x8x32xf32> to vector<8x32xf32>
    %401 = vector.shape_cast %398 : vector<8x32xf32> to vector<1x8x32xf32>
    tpu.vector_store %arg14[%c0_183, %c0_184, %c0_185], %401 {strides = array<i32>} : memref<1x8x32xf32, #tpu.memory_space<vmem>>, vector<1x8x32xf32>,
    return
  }
  func.func @transform_0(%arg0: i32) -> (i32, i32, i32) {
    %c0_i32 = arith.constant 0 : i32
    %c0_i32_0 = arith.constant 0 : i32
    %c0_i32_1 = arith.constant 0 : i32
    return %arg0, %c0_i32, %c0_i32_0 : i32, i32, i32
  }
  func.func @transform_1(%arg0: i32) -> (i32, i32, i32) {
    %c0_i32 = arith.constant 0 : i32
    %c0_i32_0 = arith.constant 0 : i32
    %c0_i32_1 = arith.constant 0 : i32
    return %arg0, %c0_i32, %c0_i32_0 : i32, i32, i32
  }
  func.func @transform_2(%arg0: i32) -> (i32, i32) {
    %c0_i32 = arith.constant 0 : i32
    %c0_i32_0 = arith.constant 0 : i32
    %c0_i32_1 = arith.constant 0 : i32
    return %c0_i32, %c0_i32_0 : i32, i32
  }
  func.func @transform_3(%arg0: i32) -> (i32, i32) {
    %c0_i32 = arith.constant 0 : i32
    %c0_i32_0 = arith.constant 0 : i32
    %c0_i32_1 = arith.constant 0 : i32
    return %c0_i32, %c0_i32_0 : i32, i32
  }
  func.func @transform_4(%arg0: i32) -> (i32, i32) {
    %c0_i32 = arith.constant 0 : i32
    %c0_i32_0 = arith.constant 0 : i32
    %c0_i32_1 = arith.constant 0 : i32
    return %c0_i32, %c0_i32_0 : i32, i32
  }
  func.func @transform_5(%arg0: i32) -> (i32, i32) {
    %c0_i32 = arith.constant 0 : i32
    %c0_i32_0 = arith.constant 0 : i32
    %c0_i32_1 = arith.constant 0 : i32
    return %c0_i32, %c0_i32_0 : i32, i32
  }
  func.func @transform_6(%arg0: i32) -> (i32, i32) {
    %c0_i32 = arith.constant 0 : i32
    %c0_i32_0 = arith.constant 0 : i32
    %c0_i32_1 = arith.constant 0 : i32
    return %c0_i32, %c0_i32_0 : i32, i32
  }
  func.func @transform_7(%arg0: i32) -> (i32, i32) {
    %c0_i32 = arith.constant 0 : i32
    %c0_i32_0 = arith.constant 0 : i32
    %c0_i32_1 = arith.constant 0 : i32
    return %c0_i32, %c0_i32_0 : i32, i32
  }
  func.func @transform_8(%arg0: i32) -> (i32, i32) {
    %c0_i32 = arith.constant 0 : i32
    %c0_i32_0 = arith.constant 0 : i32
    %c0_i32_1 = arith.constant 0 : i32
    return %c0_i32, %c0_i32_0 : i32, i32
  }
  func.func @transform_9(%arg0: i32) -> (i32, i32) {
    %c0_i32 = arith.constant 0 : i32
    %c0_i32_0 = arith.constant 0 : i32
    %c0_i32_1 = arith.constant 0 : i32
    return %c0_i32, %c0_i32_0 : i32, i32
  }
  func.func @transform_10(%arg0: i32) -> (i32, i32) {
    %c0_i32 = arith.constant 0 : i32
    %c0_i32_0 = arith.constant 0 : i32
    %c0_i32_1 = arith.constant 0 : i32
    return %c0_i32, %c0_i32_0 : i32, i32
  }
  func.func @transform_11(%arg0: i32) -> (i32, i32) {
    %c0_i32 = arith.constant 0 : i32
    %c0_i32_0 = arith.constant 0 : i32
    %c0_i32_1 = arith.constant 0 : i32
    return %c0_i32, %c0_i32_0 : i32, i32
  }
  func.func @transform_12(%arg0: i32) -> (i32, i32) {
    %c0_i32 = arith.constant 0 : i32
    %c0_i32_0 = arith.constant 0 : i32
    %c0_i32_1 = arith.constant 0 : i32
    return %c0_i32, %c0_i32_0 : i32, i32
  }
  func.func @transform_13(%arg0: i32) -> (i32, i32, i32) {
    %c0_i32 = arith.constant 0 : i32
    %c0_i32_0 = arith.constant 0 : i32
    %c0_i32_1 = arith.constant 0 : i32
    return %arg0, %c0_i32, %c0_i32_0 : i32, i32, i32
  }
  func.func @transform_14(%arg0: i32) -> (i32, i32, i32) {
    %c0_i32 = arith.constant 0 : i32
    %c0_i32_0 = arith.constant 0 : i32
    %c0_i32_1 = arith.constant 0 : i32
    return %arg0, %c0_i32, %c0_i32_0 : i32, i32, i32
  }
}

</mosaic_0001>

<bundles_post_ra>
// kernel: _forward.2
= control target key start
LH: loop header
LB: loop body
LE: loop exit
PB: predicated region body
PF: predicated region fallthrough
CT: control target
= control target key end

     0   :  { %s1740_s15 = smov 0   ;;  %s2075_s0 = inlined_call_operand.vmem [shape: f32[2,32,3], index: 0, kind: input, shape index: {}]   ;;  %s2076_s1 = inlined_call_operand.vmem [shape: bf16[33,16], index: 1, kind: input, shape index: {}]   ;;  %s2077_s2 = inlined_call_operand.vmem [shape: bf16[17,32], index: 2, kind: input, shape index: {}]   ;;  %s2078_s3 = inlined_call_operand.vmem [shape: bf16[33,64], index: 3, kind: input, shape index: {}]   ;;  %s2079_s4 = inlined_call_operand.vmem [shape: f32[2,1,64], index: 4, kind: output, shape index: {}]  }
   0x1 LB: > { %s1476_s16 = sadd.s32 4294967295, %s1708_s15   ;;  %p1480_p0 = scmp.ge.s32.totalorder %s1708_s15, 1  ;;  %s1708_s15 = sphi %s1740_s15, %s14_s15  }
   0x2   : > { %p162_p1 = scmp.lt.s32.totalorder %s1708_s15, 3 }
   0x4   : > { %p163_p2 = pnand %p1480_p0, %p162_p1 }
   0x5   : > { %v205_v0 = vld [vmem:[%s2076_s1] sm:$0x3] (!%p163_p2)  ;;  %vm216_vm0 = vcmask (!%p163_p2), 1040384   ;;  %vm217_vm1 = vcmask (!%p163_p2), 1041408   ;;  %p186_p3 = scmp.lt.s32.totalorder (!%p163_p2), %s1476_s16, 1  ;;  %v1710_v1 = vmov (!%p163_p2), 65535   ;;  %v328_v42 = vlaneseq (!%p163_p2) }
   0x6   : > { %166 = sbr.rel (%p163_p2) target bundleno = 2144 (0x860), region = 36  ;;  %v218_v2 = vsel (!%p163_p2), %vm216_vm0, 4294967295, %v1710_v1  ;;  %v206_v3 = vld [vmem:[%s2076_s1 + $0x8] sm:$0x3] (!%p163_p2)  ;;  %vm209_vm2 = vcmask (!%p163_p2), 23552   ;;  %v1711_v12 = vmov (!%p163_p2), 0.0|0.0  }
   0x7   : > { %v219_v4 = vsel (!%p163_p2), %vm217_vm1, %v218_v2, 0  ;;  %vm1712_vm3 = vmmov (!%p163_p2), 0   ;;  %v1713_v20 = vmov (!%p163_p2), 0.0   ;;  %vm1678_vm4 = vmpackc.low (!%p163_p2), %vm209_vm2, %vm209_vm2  ;;  %v1714_v27 = vmov (!%p163_p2), 1.0  }
   0x8   : > { %v221_v5 = vand.u32 (!%p163_p2), %v219_v4, %v205_v0  ;;  %v273_v6 = vand.u32 (!%p163_p2), %v219_v4, %v206_v3  ;;  %v329_v43 = vshrl.u32 (!%p163_p2), %v328_v42, 7  ;;  %v428_v62 = vand.u32 (!%p163_p2), 127, %v328_v42 }
   0x9   : > { %vm514_vm9 = vcmask (!%p163_p2), 261120  }
   0xa   : > { %1581 = vmatprep.subr.bf16.mxu0 (!%p163_p2), %v221_v5  ;;  %1587 = vmatprep.subr.bf16.mxu1 (!%p163_p2), %v273_v6  ;;  %v1811_v44 = vsub.s32 (!%p163_p2), 0, %v329_v43 }
   0xb   : > { %1582 = vmatpush3.bf16.msra.mxu0 (!%p163_p2), %v221_v5  ;;  %1588 = vmatpush3.bf16.msra.mxu1 (!%p163_p2), %v273_v6 }
   0xc   : > { %1676 = vmatprep.subr.bf16.mxu0 (!%p163_p2), %v1711_v12 }
   0xd   : > { %s2081_s16 = smov (!%p186_p3, %s1476_s16), 1 }
   0xe   : > { %s1533_s21 = sshll.u32 %s2081_s16, 5  ;;  %s193_s13 = scalar_lea.vmem %s2079_s4, %s2081_s16 }
   0xf   : > { %s190_s24 = scalar_lea.vmem %s2075_s0, %s1533_s21 }
  0x10   : > { %v195_v7 = vld [vmem:[%s190_s24] sm:$0xff]  ;;  %v196_v8 = vld [vmem:[%s190_s24 + $0x8] sm:$0xff]  ;;  %v197_v9 = vld [vmem:[%s190_s24 + $0x10] sm:$0xff] }
  0x11   : > { %v199_v10 = vpack.c.bf16 %v196_v8, %v195_v7  ;;  %v198_v11 = vld [vmem:[%s190_s24 + $0x18] sm:$0xff] }
  0x12   : > { %v200_v13 = vpack.c.bf16 %v198_v11, %v197_v9 }
  0x13   : > { %1589 = vmatprep.mubr.msk.bf16.mxu1 %vm209_vm2, %v199_v10  ;;  %1583 = vmatprep.mubr.msk.bf16.mxu0 %vm209_vm2, %v199_v10  ;;  %v201_v14 = vunpack.c.l.bf16 %v199_v10  ;;  %v202_v15 = vunpack.c.h.bf16 %v199_v10  ;;  %v211_v21 = vsel %vm209_vm2, %v199_v10, 0 }
  0x14   : > { %1590 = vmatmul.mubr.msk.bf16.vlgmr.msra.gmra.mrb[0].mxu1 %vm209_vm2, %v200_v13  ;;  %1584 = vmatmul.mubr.msk.bf16.vlgmr.msra.gmra.mrb[0].mxu0 %vm209_vm2, %v200_v13  ;;  %v203_v18 = vunpack.c.l.bf16 %v200_v13  ;;  %v204_v19 = vunpack.c.h.bf16 %v200_v13  ;;  %v214_v26 = vsel %vm209_vm2, %v200_v13, 0 }
  0x15   : > { %1684 = vmatprep.subr.msk.bf16.mxu1 %vm209_vm2, %v199_v10  ;;  %v338_v16 = vmul.f32 %v201_v14, %v201_v14  ;;  %v339_v17 = vmul.f32 %v202_v15, %v202_v15  ;;  %1601 = vmatprep.mubr.msk.f32.mxu0 %vm1712_vm3, %v1713_v20 }
  0x16   : > { %1608 = vmatprep.mubr.msk.bf16.mxu1 %vm209_vm2, %v199_v10  ;;  %1605 = vmatpush3.bf16.xpose.msra.mxu1 %v211_v21  ;;  %v340_v23 = vmul.f32 %v203_v18, %v203_v18  ;;  %v341_v24 = vmul.f32 %v204_v19, %v204_v19 }
  0x17   : > { %v1677_v22 = vpack.c.bf16 %v339_v17, %v338_v16  ;;  %1685 = vmatprep.subr.msk.bf16.mxu1 %vm209_vm2, %v200_v13 }
  0x18   : > { %v1681_v25 = vpack.c.bf16 %v341_v24, %v340_v23 }
  0x19   : > { %1679 = vmatpush3.bf16.xpose.msk.msra.mxu0 %vm1678_vm4, %v1677_v22 }
  0x1a   : > { %1680 = vmatprep.subr.bf16.mxu0 %v1711_v12 }
  0x1e   : > { %1607 = vmatpush3.bf16.xpose.msra.mxu1 %v214_v26 }
  0x21   : > { %1683 = vmatpush3.bf16.xpose.msk.msra.mxu0 %vm1678_vm4, %v1681_v25 }
  0x25   : > { %1609 = vmatmul.mubr.msk.bf16.vlgmr.msra.gmra.mrb[4].mxu1 %vm209_vm2, %v200_v13 }
  0x28   : > { %1602 = vmatmul.mubr.msk.f32.vlgmr.msra.gmra.mrb[4].mxu0 %vm209_vm2, %v1714_v27 }
  0xe7   : > { %v1774_v28 = vpop.f32.mrb[0].mxu1  ;;  %v1776_v29 = vpop.f32.mrb[0].mxu0 }
  0xe8   : > { %v1778_v30 = vpop.f32.mrb[1].mxu1  ;;  %v326_v31 = vsub.f32 %v1776_v29, %v1774_v28  ;;  %v1782_v32 = vpop.f32.mrb[1].mxu0 }
  0xe9   : > { %v1784_v33 = vpop.f32.mrb[2].mxu1  ;;  %v324_v34 = vsub.f32 %v1782_v32, %v1778_v30  ;;  %v1788_v35 = vpop.f32.mrb[2].mxu0 }
  0xea   : > { %v1792_v36 = vpack.c.bf16 %v1784_v33, %v1774_v28  ;;  %v1794_v37 = vpop.f32.mrb[3].mxu1  ;;  %v327_v38 = vsub.f32 %v1788_v35, %v1784_v33  ;;  %v1798_v39 = vpop.f32.mrb[3].mxu0 }
  0xeb   : > { %v1802_v40 = vpack.c.bf16 %v1794_v37, %v1778_v30  ;;  %v325_v41 = vsub.f32 %v1798_v39, %v1794_v37 }
  0xed   : > { %1612 = vmatprep.subr.bf16.mxu0 %v1802_v40 }
  0xee   : > { %1613 = vmatpush3.bf16.msra.mxu0 %v1802_v40 }
  0xef   : > { %1614 = vmatprep.subr.bf16.mxu0 %v1792_v36 }
  0xf2   : > { %1615 = vmatpush3.bf16.msra.mxu0 %v1792_v36 }
  0xf3   : > { %1626 = vmatprep.subr.bf16.mxu0 %v1802_v40 }
  0xf8   : > { %v1610_v46 = vpop.f32.mrb[4].mxu1 }
  0xf9   : > { %v480_v48 = vmul.f32 2.0, %v1610_v46  ;;  %v463_v50 = vpop.f32.mrb[5].mxu1 }
  0xfa   : > { %v478_v51 = vmul.f32 2.0, %v463_v50  ;;  %v1611_v52 = vpop.f32.mrb[6].mxu1 }
  0xfb   : > { %v423_v45 = vpop.f32.mrb[4].mxu0  ;;  %v481_v54 = vmul.f32 2.0, %v1611_v52  ;;  %v466_v55 = vpop.f32.mrb[7].mxu1 }
  0xfc   : > { %v485_v47 = vrot.slane %v423_v45, %v1811_v44  ;;  %v1603_v49 = vpop.f32.mrb[5].mxu0  ;;  %v479_v57 = vmul.f32 2.0, %v466_v55 }
  0xfe   : > { %v488_v53 = vsub.f32 %v485_v47, %v480_v48  ;;  %v486_v56 = vsub.f32 %v485_v47, %v478_v51  ;;  %v489_v59 = vsub.f32 %v485_v47, %v481_v54  ;;  %v487_v61 = vsub.f32 %v485_v47, %v479_v57 }
 0x100   : > { %vm496_vm5 = vcmp.ge.s32.totalorder %v488_v53, 0  ;;  %v500_v58 = vsub.s32 2147483648, %v488_v53  ;;  %vm494_vm6 = vcmp.ge.s32.totalorder %v486_v56, 0  ;;  %v498_v60 = vsub.s32 2147483648, %v486_v56 }
 0x101   : > { %vm497_vm7 = vcmp.ge.s32.totalorder %v489_v59, 0  ;;  %v501_v0 = vsub.s32 2147483648, %v489_v59  ;;  %vm495_vm8 = vcmp.ge.s32.totalorder %v487_v61, 0  ;;  %v499_v3 = vsub.s32 2147483648, %v487_v61 }
 0x102   : > { %v504_v63 = vsel %vm496_vm5, %v488_v53, %v500_v58  ;;  %v502_v2 = vsel %vm494_vm6, %v486_v56, %v498_v60  ;;  %vm668_vm6 = vcmask 130048  }
 0x103   : > { %v508_v1 = vand.u32 4294967264, %v504_v63  ;;  %v506_v4 = vand.u32 4294967264, %v502_v2  ;;  %v505_v5 = vsel %vm497_vm7, %v489_v59, %v501_v0  ;;  %v503_v7 = vsel %vm495_vm8, %v487_v61, %v499_v3 }
 0x104   : > { %v509_v6 = vand.u32 4294967264, %v505_v5  ;;  %v507_v9 = vand.u32 4294967264, %v503_v7 }
 0x105   : > { %v1814_v8 = vor.u32 %v508_v1, %v428_v62  ;;  %v1816_v10 = vor.u32 %v506_v4, %v428_v62 }
 0x106   : > { %v1820_v12 = vor.u32 %v509_v6, %v428_v62  ;;  %v1824_v15 = vor.u32 %v507_v9, %v428_v62 }
 0x107   : > { %v545_v11 = vsel %vm514_vm9, %v1814_v8, 2147483647  ;;  %v515_v14 = vsel %vm514_vm9, %v1816_v10, 2147483647 }
 0x108   : > { %v547_v13 = vshra.s32 %v545_v11, 16  ;;  %v517_v16 = vshra.s32 %v515_v14, 16  ;;  %v560_v17 = vsel %vm514_vm9, %v1820_v12, 2147483647  ;;  %v530_v21 = vsel %vm514_vm9, %v1824_v15, 2147483647 }
 0x109   : > { %v562_v19 = vshra.s32 %v560_v17, 16  ;;  %v532_v23 = vshra.s32 %v530_v21, 16  ;;  %v516_v26 = vand.u32 65535, %v515_v14  ;;  %v531_v45 = vand.u32 65535, %v530_v21 }
 0x10a   : > { %v549_v18 = vcvt.s32.f32 %v547_v13  ;;  %v519_v22 = vcvt.s32.f32 %v517_v16  ;;  %v546_v46 = vand.u32 65535, %v545_v11  ;;  %v561_v52 = vand.u32 65535, %v560_v17 }
 0x10b   : > { %v564_v24 = vcvt.s32.f32 %v562_v19  ;;  %v534_v25 = vcvt.s32.f32 %v532_v23  ;;  %v518_v43 = vcvt.s32.f32 %v516_v26  ;;  %v533_v50 = vcvt.s32.f32 %v531_v45 }
 0x10c   : > { %550 = vmin.xlane.f32.xlu1 %v549_v18  ;;  %520 = vmin.xlane.f32.xlu0 %v519_v22  ;;  %v548_v51 = vcvt.s32.f32 %v546_v46  ;;  %v563_v55 = vcvt.s32.f32 %v561_v52 }
 0x110   : > { %565 = vmin.xlane.f32.xlu1 %v564_v24  ;;  %535 = vmin.xlane.f32.xlu0 %v534_v25 }
 0x199   : > { %v551_v27 = vpop.xlane.xlu1 %550  ;;  %v521_v42 = vpop.xlane.xlu0 %520 }
 0x19a   : > { %vm522_vm10 = vcmp.eq.f32.partialorder %v519_v22, %v521_v42  ;;  %vm552_vm11 = vcmp.eq.f32.partialorder %v549_v18, %v551_v27  ;;  %v527_v57 = vcvt.f32.s32 %v521_v42  ;;  %v557_v58 = vcvt.f32.s32 %v551_v27 }
 0x19b   : > { %v523_v47 = vsel %vm522_vm10, %v518_v43, inf  ;;  %v553_v54 = vsel %vm552_vm11, %v548_v51, inf }
 0x19c   : > { %524 = vmin.xlane.f32.xlu0 %v523_v47  ;;  %v528_v60 = vshll.u32 %v527_v57, 16  ;;  %v558_v0 = vshll.u32 %v557_v58, 16 }
 0x19d   : > { %v566_v48 = vpop.xlane.xlu1 %565  ;;  %v536_v49 = vpop.xlane.xlu0 %535 }
 0x19e   : > { %vm537_vm12 = vcmp.eq.f32.partialorder %v534_v25, %v536_v49  ;;  %vm567_vm13 = vcmp.eq.f32.partialorder %v564_v24, %v566_v48  ;;  %v542_v61 = vcvt.f32.s32 %v536_v49  ;;  %v572_v1 = vcvt.f32.s32 %v566_v48 }
 0x19f   : > { %v538_v53 = vsel %vm537_vm12, %v533_v50, inf  ;;  %v568_v56 = vsel %vm567_vm13, %v563_v55, inf }
 0x1a0   : > { %539 = vmin.xlane.f32.xlu1 %v538_v53  ;;  %554 = vmin.xlane.f32.xlu0 %v553_v54  ;;  %v543_v4 = vshll.u32 %v542_v61, 16  ;;  %v573_v17 = vshll.u32 %v572_v1, 16 }
 0x1a4   : > { %569 = vmin.xlane.f32.xlu1 %v568_v56 }
 0x229   : > { %v525_v59 = vpop.xlane.xlu0 %524 }
 0x22a   : > { %v526_v62 = vcvt.f32.s32 %v525_v59 }
 0x22c   : > { %v529_v63 = vadd.s32 %v528_v60, %v526_v62 }
 0x22d   : > { %v540_v2 = vpop.xlane.xlu1 %539  ;;  %v555_v3 = vpop.xlane.xlu0 %554 }
 0x22e   : > { %vm575_vm14 = vcmp.eq.s32.totalorder %v1816_v10, %v529_v63  ;;  %v541_v5 = vcvt.f32.s32 %v540_v2  ;;  %v556_v6 = vcvt.f32.s32 %v555_v3 }
 0x22f   : > { %v1832_v7 = vsel %vm575_vm14, 2147483647, %v1816_v10  ;;  %v1494_v19 = vsel %vm575_vm14, 1.0, %v1713_v20 }
 0x230   : > { %v544_v9 = vadd.s32 %v543_v4, %v541_v5  ;;  %v559_v11 = vadd.s32 %v558_v0, %v556_v6  ;;  %v728_v13 = vsel %vm514_vm9, %v1832_v7, 2147483647  ;;  %v207_v4 = vld [vmem:[%s2076_s1 + $0x10] sm:$0x1] }
 0x231   : > { %v570_v14 = vpop.xlane.xlu1 %569  ;;  %v730_v16 = vshra.s32 %v728_v13, 16  ;;  %v729_v52 = vand.u32 65535, %v728_v13  ;;  %v208_v5 = vunpack.c.l.bf16 %v207_v4 }
 0x232   : > { %vm576_vm15 = vcmp.eq.s32.totalorder %v1824_v15, %v544_v9  ;;  %vm577_vm0 = vcmp.eq.s32.totalorder %v1814_v8, %v559_v11  ;;  %v571_v18 = vcvt.f32.s32 %v570_v14 }
 0x233   : > { %v1495_v21 = vsel %vm576_vm15, 1.0, %v1713_v20  ;;  %v732_v22 = vcvt.s32.f32 %v730_v16  ;;  %v1841_v10 = vsel %vm576_vm15, 2147483647, %v1824_v15  ;;  %v1848_v26 = vsel %vm577_vm0, 2147483647, %v1814_v8 }
 0x234   : > { %v591_v23 = vpack.c.bf16 %v1495_v21, %v1494_v19  ;;  %v574_v24 = vadd.s32 %v573_v17, %v571_v18  ;;  %v743_v25 = vsel %vm514_vm9, %v1841_v10, 2147483647  ;;  %v758_v42 = vsel %vm514_vm9, %v1848_v26, 2147483647 }
 0x235   : > { %733 = vmin.xlane.f32.xlu0 %v732_v22  ;;  %v745_v27 = vshra.s32 %v743_v25, 16  ;;  %v760_v15 = vshra.s32 %v758_v42, 16  ;;  %v1496_v43 = vsel %vm577_vm0, 1.0, %v1713_v20  ;;  %v731_v54 = vcvt.s32.f32 %v729_v52 }
 0x236   : > { %vm578_vm1 = vcmp.eq.s32.totalorder %v1820_v12, %v574_v24  ;;  %1616 = vmatprep.mubr.msk.bf16.mxu0 %vm514_vm9, %v591_v23  ;;  %v744_v55 = vand.u32 65535, %v743_v25  ;;  %v759_v56 = vand.u32 65535, %v758_v42  ;;  %v331_v6 = vrot.slane %v208_v5, %v1811_v44 }
 0x237   : > { %v1497_v45 = vsel %vm578_vm1, 1.0, %v1713_v20  ;;  %v747_v46 = vcvt.s32.f32 %v745_v27  ;;  %v1859_v47 = vsel %vm578_vm1, 2147483647, %v1820_v12  ;;  %v762_v49 = vcvt.s32.f32 %v760_v15  ;;  %v1871_v12 = vld [vmem:[%s2077_s2] sm:$0xff]  }
 0x238   : > { %v592_v48 = vpack.c.bf16 %v1497_v45, %v1496_v43  ;;  %v773_v50 = vsel %vm514_vm9, %v1859_v47, 2147483647  ;;  %1620 = vmatprep.subr.bf16.mxu1 %v1871_v12  ;;  %v746_v59 = vcvt.s32.f32 %v744_v55  ;;  %v761_v62 = vcvt.s32.f32 %v759_v56 }
 0x239   : > { %748 = vmin.xlane.f32.xlu1 %v747_v46  ;;  %v775_v51 = vshra.s32 %v773_v50, 16  ;;  %763 = vmin.xlane.f32.xlu0 %v762_v49  ;;  %v774_v60 = vand.u32 65535, %v773_v50  ;;  %v1883_v9 = vadd.f32 %v331_v6, %v326_v31  ;;  %v1888_v11 = vadd.f32 %v331_v6, %v324_v34 }
 0x23a   : > { %1617 = vmatmul.mubr.msk.bf16.vlgmr.msra.gmra.mrb[8].mxu0 %vm514_vm9, %v592_v48  ;;  %1621 = vmatpush3.bf16.msra.mxu1 %v1871_v12  ;;  %v1893_v14 = vadd.f32 %v331_v6, %v327_v38  ;;  %v1899_v28 = vadd.f32 %v331_v6, %v325_v41 }
 0x23b   : > { %1627 = vmatpush3.bf16.msra.mxu0 %v1802_v40  ;;  %v777_v8 = vcvt.s32.f32 %v775_v51  ;;  %1634 = vmatprep.subr.bf16.mxu1 %v1871_v12  ;;  %v776_v2 = vcvt.s32.f32 %v774_v60 }
 0x23c   : > { %1628 = vmatprep.subr.bf16.mxu0 %v1792_v36 }
 0x23d   : > { %778 = vmin.xlane.f32.xlu1 %v777_v8 }
 0x23f   : > { %1629 = vmatpush3.bf16.msra.mxu0 %v1792_v36 }
 0x240   : > { %1640 = vmatprep.subr.bf16.mxu0 %v1802_v40 }
 0x2c2   : > { %v734_v53 = vpop.xlane.xlu0 %733 }
 0x2c3   : > { %vm735_vm2 = vcmp.eq.f32.partialorder %v732_v22, %v734_v53  ;;  %v740_v37 = vcvt.f32.s32 %v734_v53 }
 0x2c4   : > { %v736_v57 = vsel %vm735_vm2, %v731_v54, inf }
 0x2c5   : > { %737 = vmin.xlane.f32.xlu0 %v736_v57  ;;  %v741_v41 = vshll.u32 %v740_v37, 16 }
 0x2c6   : > { %v749_v58 = vpop.xlane.xlu1 %748  ;;  %v764_v61 = vpop.xlane.xlu0 %763 }
 0x2c7   : > { %vm750_vm3 = vcmp.eq.f32.partialorder %v747_v46, %v749_v58  ;;  %vm765_vm4 = vcmp.eq.f32.partialorder %v762_v49, %v764_v61  ;;  %v755_v22 = vcvt.f32.s32 %v749_v58  ;;  %v770_v24 = vcvt.f32.s32 %v764_v61 }
 0x2c8   : > { %v751_v63 = vsel %vm750_vm3, %v746_v59, inf  ;;  %v766_v0 = vsel %vm765_vm4, %v761_v62, inf }
 0x2c9   : > { %752 = vmin.xlane.f32.xlu1 %v751_v63  ;;  %767 = vmin.xlane.f32.xlu0 %v766_v0  ;;  %v756_v42 = vshll.u32 %v755_v22, 16  ;;  %v771_v46 = vshll.u32 %v770_v24, 16 }
 0x2ca   : > { %v779_v1 = vpop.xlane.xlu1 %778 }
 0x2cb   : > { %vm780_vm5 = vcmp.eq.f32.partialorder %v777_v8, %v779_v1  ;;  %v785_v15 = vcvt.f32.s32 %v779_v1 }
 0x2cc   : > { %v781_v3 = vsel %vm780_vm5, %v776_v2, inf }
 0x2cd   : > { %782 = vmin.xlane.f32.xlu1 %v781_v3  ;;  %v786_v54 = vshll.u32 %v785_v15, 16 }
 0x30d   : > { %v1618_v13 = vpop.f32.mrb[8].mxu0 }
 0x30e   : > { %v642_v16 = vadd.f32 %v1618_v13, %v1883_v9  ;;  %v633_v17 = vpop.f32.mrb[9].mxu0 }
 0x30f   : > { %v634_v29 = vadd.f32 %v633_v17, %v1888_v11  ;;  %v1619_v31 = vpop.f32.mrb[10].mxu0 }
 0x310   : > { %v645_v30 = vadd.f32 %v1619_v31, %v1893_v14  ;;  %v636_v32 = vpop.f32.mrb[11].mxu0  ;;  %v650_v18 = vmax.f32 %v642_v16, 0.0 }
 0x311   : > { %v637_v34 = vadd.f32 %v636_v32, %v1899_v28  ;;  %v648_v35 = vmax.f32 %v634_v29, 0.0 }
 0x312   : > { %v651_v33 = vmax.f32 %v645_v30, 0.0 }
 0x313   : > { %v649_v38 = vmax.f32 %v637_v34, 0.0 }
 0x314   : > { %v653_v19 = vpack.c.bf16 %v651_v33, %v650_v18 }
 0x315   : > { %v652_v21 = vpack.c.bf16 %v649_v38, %v648_v35 }
 0x317   : > { %1622 = vmatprep.mubr.msk.bf16.mxu1 %vm668_vm6, %v652_v21 }
 0x318   : > { %1623 = vmatmul.mubr.msk.bf16.vlgmr.msra.gmra.mrb[8].mxu1 %vm668_vm6, %v653_v19 }
 0x319   : > { %1635 = vmatpush3.bf16.msra.mxu1 %v1871_v12 }
 0x31a   : > { %1648 = vmatprep.subr.bf16.mxu1 %v1871_v12 }
 0x352   : > { %v738_v39 = vpop.xlane.xlu0 %737 }
 0x353   : > { %v739_v23 = vcvt.f32.s32 %v738_v39 }
 0x355   : > { %v742_v25 = vadd.s32 %v741_v41, %v739_v23 }
 0x356   : > { %v753_v27 = vpop.xlane.xlu1 %752  ;;  %v768_v45 = vpop.xlane.xlu0 %767 }
 0x357   : > { %vm788_vm7 = vcmp.eq.s32.totalorder %v1832_v7, %v742_v25  ;;  %v754_v43 = vcvt.f32.s32 %v753_v27  ;;  %v769_v48 = vcvt.f32.s32 %v768_v45 }
 0x358   : > { %v1910_v49 = vsel %vm788_vm7, 2147483647, %v1832_v7  ;;  %v1503_v55 = vsel %vm788_vm7, 1.0, %v1713_v20 }
 0x359   : > { %v757_v50 = vadd.s32 %v756_v42, %v754_v43  ;;  %v930_v51 = vsel %vm514_vm9, %v1910_v49, 2147483647  ;;  %v772_v8 = vadd.s32 %v771_v46, %v769_v48 }
 0x35a   : > { %v783_v52 = vpop.xlane.xlu1 %782  ;;  %v932_v53 = vshra.s32 %v930_v51, 16 }
 0x35b   : > { %vm789_vm8 = vcmp.eq.s32.totalorder %v1841_v10, %v757_v50  ;;  %v784_v56 = vcvt.f32.s32 %v783_v52  ;;  %vm790_vm10 = vcmp.eq.s32.totalorder %v1848_v26, %v772_v8 }
 0x35c   : > { %v1504_v57 = vsel %vm789_vm8, 1.0, %v1713_v20  ;;  %v934_v58 = vcvt.s32.f32 %v932_v53  ;;  %v1919_v7 = vsel %vm789_vm8, 2147483647, %v1841_v10  ;;  %v1924_v63 = vsel %vm790_vm10, 2147483647, %v1848_v26 }
 0x35d   : > { %v804_v59 = vpack.c.bf16 %v1504_v57, %v1503_v55  ;;  %v787_v60 = vadd.s32 %v786_v54, %v784_v56  ;;  %v945_v61 = vsel %vm514_vm9, %v1919_v7, 2147483647  ;;  %v1505_v0 = vsel %vm790_vm10, 1.0, %v1713_v20 }
 0x35e   : > { %935 = vmin.xlane.f32.xlu0 %v934_v58  ;;  %v947_v62 = vshra.s32 %v945_v61, 16  ;;  %v960_v10 = vsel %vm514_vm9, %v1924_v63, 2147483647  ;;  %v946_v30 = vand.u32 65535, %v945_v61 }
 0x35f   : > { %vm791_vm11 = vcmp.eq.s32.totalorder %v1859_v47, %v787_v60  ;;  %1630 = vmatprep.mubr.msk.bf16.mxu0 %vm514_vm9, %v804_v59  ;;  %v962_v3 = vshra.s32 %v960_v10, 16  ;;  %v961_v33 = vand.u32 65535, %v960_v10 }
 0x360   : > { %v1506_v1 = vsel %vm791_vm11, 1.0, %v1713_v20  ;;  %v949_v2 = vcvt.s32.f32 %v947_v62  ;;  %v1933_v4 = vsel %vm791_vm11, 2147483647, %v1859_v47  ;;  %v931_v47 = vand.u32 65535, %v930_v51 }
 0x361   : > { %v805_v5 = vpack.c.bf16 %v1506_v1, %v1505_v0  ;;  %v975_v26 = vsel %vm514_vm9, %v1933_v4, 2147483647  ;;  %v964_v6 = vcvt.s32.f32 %v962_v3  ;;  %v948_v19 = vcvt.s32.f32 %v946_v30 }
 0x362   : > { %950 = vmin.xlane.f32.xlu1 %v949_v2  ;;  %v977_v13 = vshra.s32 %v975_v26, 16  ;;  %v933_v31 = vcvt.s32.f32 %v931_v47  ;;  %v976_v21 = vand.u32 65535, %v975_v26  ;;  %v963_v41 = vcvt.s32.f32 %v961_v33 }
 0x363   : > { %1631 = vmatmul.mubr.msk.bf16.vlgmr.msra.gmra.mrb[12].mxu0 %vm514_vm9, %v805_v5  ;;  %965 = vmin.xlane.f32.xlu0 %v964_v6 }
 0x364   : > { %1641 = vmatpush3.bf16.msra.mxu0 %v1802_v40  ;;  %v979_v16 = vcvt.s32.f32 %v977_v13  ;;  %v978_v24 = vcvt.s32.f32 %v976_v21 }
 0x365   : > { %1642 = vmatprep.subr.bf16.mxu0 %v1792_v36 }
 0x366   : > { %980 = vmin.xlane.f32.xlu1 %v979_v16 }
 0x368   : > { %1643 = vmatpush3.bf16.msra.mxu0 %v1792_v36 }
 0x369   : > { %1654 = vmatprep.subr.bf16.mxu0 %v1802_v40 }
 0x3eb   : > { %v936_v17 = vpop.xlane.xlu0 %935  ;;  %v1942_v29 = vpop.f32.mrb[8].mxu1 }
 0x3ec   : > { %v1944_v32 = vpop.f32.mrb[9].mxu1  ;;  %vm937_vm12 = vcmp.eq.f32.partialorder %v934_v58, %v936_v17  ;;  %v942_v56 = vcvt.f32.s32 %v936_v17 }
 0x3ed   : > { %v1946_v34 = vpop.f32.mrb[10].mxu1  ;;  %v938_v18 = vsel %vm937_vm12, %v933_v31, inf }
 0x3ee   : > { %939 = vmin.xlane.f32.xlu0 %v938_v18  ;;  %v1948_v35 = vpop.f32.mrb[11].mxu1  ;;  %v943_v58 = vshll.u32 %v942_v56, 16 }
 0x3ef   : > { %v951_v38 = vpop.xlane.xlu1 %950 }
 0x3f0   : > { %vm952_vm13 = vcmp.eq.f32.partialorder %v949_v2, %v951_v38  ;;  %v966_v37 = vpop.xlane.xlu0 %965  ;;  %v957_v59 = vcvt.f32.s32 %v951_v38 }
 0x3f1   : > { %v953_v39 = vsel %vm952_vm13, %v948_v19, inf  ;;  %vm967_vm14 = vcmp.eq.f32.partialorder %v964_v6, %v966_v37  ;;  %v972_v61 = vcvt.f32.s32 %v966_v37 }
 0x3f2   : > { %954 = vmin.xlane.f32.xlu1 %v953_v39  ;;  %v968_v22 = vsel %vm967_vm14, %v963_v41, inf  ;;  %v958_v10 = vshll.u32 %v957_v59, 16 }
 0x3f3   : > { %v981_v23 = vpop.xlane.xlu1 %980  ;;  %969 = vmin.xlane.f32.xlu0 %v968_v22  ;;  %v973_v26 = vshll.u32 %v972_v61, 16 }
 0x3f4   : > { %vm982_vm15 = vcmp.eq.f32.partialorder %v979_v16, %v981_v23  ;;  %v987_v1 = vcvt.f32.s32 %v981_v23 }
 0x3f5   : > { %v983_v25 = vsel %vm982_vm15, %v978_v24, inf }
 0x3f6   : > { %984 = vmin.xlane.f32.xlu1 %v983_v25  ;;  %v988_v31 = vshll.u32 %v987_v1, 16 }
 0x436   : > { %v1632_v27 = vpop.f32.mrb[12].mxu0 }
 0x437   : > { %v855_v42 = vadd.f32 %v1632_v27, %v1883_v9  ;;  %v846_v15 = vpop.f32.mrb[13].mxu0 }
 0x438   : > { %v847_v43 = vadd.f32 %v846_v15, %v1888_v11  ;;  %v1633_v45 = vpop.f32.mrb[14].mxu0 }
 0x439   : > { %v858_v46 = vadd.f32 %v1633_v45, %v1893_v14  ;;  %v849_v48 = vpop.f32.mrb[15].mxu0  ;;  %v863_v51 = vmax.f32 %v855_v42, 0.0 }
 0x43a   : > { %v850_v50 = vadd.f32 %v849_v48, %v1899_v28  ;;  %v861_v52 = vmax.f32 %v847_v43, 0.0 }
 0x43b   : > { %v864_v8 = vmax.f32 %v858_v46, 0.0 }
 0x43c   : > { %v862_v53 = vmax.f32 %v850_v50, 0.0 }
 0x43d   : > { %v866_v54 = vpack.c.bf16 %v864_v8, %v863_v51 }
 0x43e   : > { %v865_v55 = vpack.c.bf16 %v862_v53, %v861_v52 }
 0x440   : > { %1636 = vmatprep.mubr.msk.bf16.mxu1 %vm668_vm6, %v865_v55 }
 0x441   : > { %1637 = vmatmul.mubr.msk.bf16.vlgmr.msra.gmra.mrb[12].mxu1 %vm668_vm6, %v866_v54 }
 0x442   : > { %1649 = vmatpush3.bf16.msra.mxu1 %v1871_v12 }
 0x443   : > { %1662 = vmatprep.subr.bf16.mxu1 %v1871_v12 }
 0x47b   : > { %v940_v57 = vpop.xlane.xlu0 %939 }
 0x47c   : > { %v941_v60 = vcvt.f32.s32 %v940_v57 }
 0x47e   : > { %v944_v62 = vadd.s32 %v943_v58, %v941_v60 }
 0x47f   : > { %v955_v0 = vpop.xlane.xlu1 %954 }
 0x480   : > { %vm990_vm0 = vcmp.eq.s32.totalorder %v1910_v49, %v944_v62  ;;  %v956_v2 = vcvt.f32.s32 %v955_v0  ;;  %v970_v3 = vpop.xlane.xlu0 %969 }
 0x481   : > { %v1960_v5 = vsel %vm990_vm0, 2147483647, %v1910_v49  ;;  %v971_v13 = vcvt.f32.s32 %v970_v3  ;;  %v1511_v33 = vsel %vm990_vm0, 1.0, %v1713_v20 }
 0x482   : > { %v959_v6 = vadd.s32 %v958_v10, %v956_v2  ;;  %v1132_v16 = vsel %vm514_vm9, %v1960_v5, 2147483647 }
 0x483   : > { %v985_v47 = vpop.xlane.xlu1 %984  ;;  %v1134_v17 = vshra.s32 %v1132_v16, 16  ;;  %v974_v30 = vadd.s32 %v973_v26, %v971_v13  ;;  %v1133_v51 = vand.u32 65535, %v1132_v16 }
 0x484   : > { %vm991_vm1 = vcmp.eq.s32.totalorder %v1919_v7, %v959_v6  ;;  %v986_v18 = vcvt.f32.s32 %v985_v47 }
 0x485   : > { %v1512_v38 = vsel %vm991_vm1, 1.0, %v1713_v20  ;;  %v1136_v19 = vcvt.s32.f32 %v1134_v17  ;;  %v1968_v49 = vsel %vm991_vm1, 2147483647, %v1919_v7  ;;  %vm992_vm2 = vcmp.eq.s32.totalorder %v1924_v63, %v974_v30 }
 0x486   : > { %v1006_v21 = vpack.c.bf16 %v1512_v38, %v1511_v33  ;;  %v989_v37 = vadd.s32 %v988_v31, %v986_v18  ;;  %v1147_v39 = vsel %vm514_vm9, %v1968_v49, 2147483647  ;;  %v1974_v22 = vsel %vm992_vm2, 2147483647, %v1924_v63 }
 0x487   : > { %1137 = vmin.xlane.f32.xlu0 %v1136_v19  ;;  %v1149_v41 = vshra.s32 %v1147_v39, 16  ;;  %v1513_v23 = vsel %vm992_vm2, 1.0, %v1713_v20  ;;  %v1162_v7 = vsel %vm514_vm9, %v1974_v22, 2147483647  ;;  %v1135_v54 = vcvt.s32.f32 %v1133_v51 }
 0x488   : > { %vm993_vm3 = vcmp.eq.s32.totalorder %v1933_v4, %v989_v37  ;;  %1644 = vmatprep.mubr.msk.bf16.mxu0 %vm514_vm9, %v1006_v21  ;;  %v1164_v27 = vshra.s32 %v1162_v7, 16  ;;  %v1148_v55 = vand.u32 65535, %v1147_v39  ;;  %v1163_v61 = vand.u32 65535, %v1162_v7 }
 0x489   : > { %v1514_v24 = vsel %vm993_vm3, 1.0, %v1713_v20  ;;  %v1151_v25 = vcvt.s32.f32 %v1149_v41  ;;  %v1983_v42 = vsel %vm993_vm3, 2147483647, %v1933_v4  ;;  %v656_v4 = vld [vmem:[%s2077_s2 + $0x8] sm:$0x1] }
 0x48a   : > { %v1007_v15 = vpack.c.bf16 %v1514_v24, %v1513_v23  ;;  %v1177_v63 = vsel %vm514_vm9, %v1983_v42, 2147483647  ;;  %v1166_v43 = vcvt.s32.f32 %v1164_v27  ;;  %v657_v48 = vunpack.c.l.bf16 %v656_v4 }
 0x48b   : > { %1152 = vmin.xlane.f32.xlu1 %v1151_v25  ;;  %v1179_v45 = vshra.s32 %v1177_v63, 16  ;;  %v1150_v26 = vcvt.s32.f32 %v1148_v55  ;;  %v1178_v6 = vand.u32 65535, %v1177_v63  ;;  %v1165_v33 = vcvt.s32.f32 %v1163_v61 }
 0x48c   : > { %1645 = vmatmul.mubr.msk.bf16.vlgmr.msra.gmra.mrb[16].mxu0 %vm514_vm9, %v1007_v15  ;;  %1167 = vmin.xlane.f32.xlu0 %v1166_v43  ;;  %v1995_v50 = vrot.slane %v657_v48, %v1811_v44 }
 0x48d   : > { %1655 = vmatpush3.bf16.msra.mxu0 %v1802_v40  ;;  %v1181_v46 = vcvt.s32.f32 %v1179_v45  ;;  %v1180_v39 = vcvt.s32.f32 %v1178_v6 }
 0x48e   : > { %1656 = vmatprep.subr.bf16.mxu0 %v1792_v36  ;;  %v718_v8 = vadd.f32 %v1942_v29, %v1995_v50  ;;  %v710_v40 = vadd.f32 %v1944_v32, %v1995_v50  ;;  %v721_v52 = vadd.f32 %v1946_v34, %v1995_v50  ;;  %v713_v56 = vadd.f32 %v1948_v35, %v1995_v50 }
 0x48f   : > { %1182 = vmin.xlane.f32.xlu1 %v1181_v46 }
 0x490   : > { %v726_v29 = vmax.f32 %v718_v8, 0.0  ;;  %v724_v34 = vmax.f32 %v710_v40, 0.0  ;;  %v727_v62 = vmax.f32 %v721_v52, 0.0  ;;  %v725_v13 = vmax.f32 %v713_v56, 0.0 }
 0x491   : > { %1657 = vmatpush3.bf16.msra.mxu0 %v1792_v36 }
 0x514   : > { %v2003_v53 = vpop.xlane.xlu0 %1137  ;;  %v1638_v36 = vpop.f32.mrb[12].mxu1 }
 0x515   : > { %v916_v57 = vadd.f32 %v1638_v36, %v1995_v50  ;;  %v907_v58 = vpop.f32.mrb[13].mxu1  ;;  %vm1139_vm4 = vcmp.eq.f32.partialorder %v1136_v19, %v2003_v53  ;;  %v1144_v40 = vcvt.f32.s32 %v2003_v53 }
 0x516   : > { %v908_v59 = vadd.f32 %v907_v58, %v1995_v50  ;;  %v1639_v32 = vpop.f32.mrb[14].mxu1  ;;  %v1140_v60 = vsel %vm1139_vm4, %v1135_v54, inf }
 0x517   : > { %v924_v0 = vmax.f32 %v916_v57, 0.0  ;;  %v919_v10 = vadd.f32 %v1639_v32, %v1995_v50  ;;  %1141 = vmin.xlane.f32.xlu0 %v1140_v60  ;;  %v910_v1 = vpop.f32.mrb[15].mxu1  ;;  %v1145_v36 = vshll.u32 %v1144_v40, 16 }
 0x518   : > { %v922_v2 = vmax.f32 %v908_v59, 0.0  ;;  %v911_v35 = vadd.f32 %v910_v1, %v1995_v50  ;;  %v1153_v3 = vpop.xlane.xlu1 %1152 }
 0x519   : > { %v2012_v16 = vmax.f32 %v726_v29, %v924_v0  ;;  %v925_v47 = vmax.f32 %v919_v10, 0.0  ;;  %vm1154_vm5 = vcmp.eq.f32.partialorder %v1151_v25, %v1153_v3  ;;  %v1168_v30 = vpop.xlane.xlu0 %1167  ;;  %v1159_v54 = vcvt.f32.s32 %v1153_v3 }
 0x51a   : > { %v2014_v17 = vmax.f32 %v724_v34, %v922_v2  ;;  %v923_v31 = vmax.f32 %v911_v35, 0.0  ;;  %v1155_v18 = vsel %vm1154_vm5, %v1150_v26, inf  ;;  %vm1169_vm7 = vcmp.eq.f32.partialorder %v1166_v43, %v1168_v30 }
 0x51b   : > { %v2016_v38 = vmax.f32 %v727_v62, %v925_v47  ;;  %1156 = vmin.xlane.f32.xlu1 %v1155_v18  ;;  %v1170_v21 = vsel %vm1169_vm7, %v1165_v33, inf  ;;  %v1174_v56 = vcvt.f32.s32 %v1168_v30  ;;  %v1160_v29 = vshll.u32 %v1159_v54, 16 }
 0x51c   : > { %v2018_v19 = vmax.f32 %v725_v13, %v923_v31  ;;  %v1183_v37 = vpop.xlane.xlu1 %1182  ;;  %1171 = vmin.xlane.f32.xlu0 %v1170_v21 }
 0x51d   : > { %vm1184_vm8 = vcmp.eq.f32.partialorder %v1181_v46, %v1183_v37  ;;  %v1189_v59 = vcvt.f32.s32 %v1183_v37  ;;  %v1175_v61 = vshll.u32 %v1174_v56, 16 }
 0x51e   : > { %v1185_v41 = vsel %vm1184_vm8, %v1180_v39, inf }
 0x51f   : > { %1186 = vmin.xlane.f32.xlu1 %v1185_v41 }
 0x55f   : > { %v1646_v23 = vpop.f32.mrb[16].mxu0 }
 0x560   : > { %v1057_v7 = vadd.f32 %v1646_v23, %v1883_v9  ;;  %v1048_v24 = vpop.f32.mrb[17].mxu0 }
 0x561   : > { %v1049_v25 = vadd.f32 %v1048_v24, %v1888_v11  ;;  %v1647_v27 = vpop.f32.mrb[18].mxu0 }
 0x562   : > { %v1060_v15 = vadd.f32 %v1647_v27, %v1893_v14  ;;  %v1051_v63 = vpop.f32.mrb[19].mxu0  ;;  %v1065_v45 = vmax.f32 %v1057_v7, 0.0 }
 0x563   : > { %v1052_v43 = vadd.f32 %v1051_v63, %v1899_v28  ;;  %v1063_v48 = vmax.f32 %v1049_v25, 0.0 }
 0x564   : > { %v1066_v4 = vmax.f32 %v1060_v15, 0.0 }
 0x565   : > { %v1064_v51 = vmax.f32 %v1052_v43, 0.0 }
 0x566   : > { %v1068_v8 = vpack.c.bf16 %v1066_v4, %v1065_v45 }
 0x567   : > { %v1067_v46 = vpack.c.bf16 %v1064_v51, %v1063_v48 }
 0x569   : > { %1650 = vmatprep.mubr.msk.bf16.mxu1 %vm668_vm6, %v1067_v46 }
 0x56a   : > { %1651 = vmatmul.mubr.msk.bf16.vlgmr.msra.gmra.mrb[16].mxu1 %vm668_vm6, %v1068_v8 }
 0x56b   : > { %1663 = vmatpush3.bf16.msra.mxu1 %v1871_v12  ;;  %v1190_v12 = vshll.u32 %v1189_v59, 16 }
 0x5a4   : > { %v1142_v52 = vpop.xlane.xlu0 %1141 }
 0x5a5   : > { %v1143_v55 = vcvt.f32.s32 %v1142_v52 }
 0x5a7   : > { %v1146_v57 = vadd.s32 %v1145_v36, %v1143_v55 }
 0x5a8   : > { %v1157_v58 = vpop.xlane.xlu1 %1156 }
 0x5a9   : > { %v1158_v32 = vcvt.f32.s32 %v1157_v58  ;;  %v1172_v60 = vpop.xlane.xlu0 %1171  ;;  %vm1192_vm10 = vcmp.eq.s32.totalorder %v1960_v5, %v1146_v57 }
 0x5aa   : > { %v1173_v62 = vcvt.f32.s32 %v1172_v60  ;;  %v1519_v1 = vsel %vm1192_vm10, 1.0, %v1713_v20 }
 0x5ab   : > { %v1161_v34 = vadd.s32 %v1160_v29, %v1158_v32 }
 0x5ac   : > { %v1187_v0 = vpop.xlane.xlu1 %1186  ;;  %v1176_v53 = vadd.s32 %v1175_v61, %v1173_v62  ;;  %v1336_v62 = vld [vmem:[%s2078_s3 + $0x10] sm:$0x1] }
 0x5ad   : > { %vm1193_vm11 = vcmp.eq.s32.totalorder %v1968_v49, %v1161_v34  ;;  %v1188_v10 = vcvt.f32.s32 %v1187_v0  ;;  %v1337_v0 = vunpack.c.l.bf16 %v1336_v62 }
 0x5ae   : > { %v1520_v2 = vsel %vm1193_vm11, 1.0, %v1713_v20  ;;  %vm1194_vm12 = vcmp.eq.s32.totalorder %v1974_v22, %v1176_v53 }
 0x5af   : > { %v1204_v35 = vpack.c.bf16 %v1520_v2, %v1519_v1  ;;  %v1191_v3 = vadd.s32 %v1190_v12, %v1188_v10  ;;  %v1521_v5 = vsel %vm1194_vm12, 1.0, %v1713_v20  ;;  %v1341_v12 = vrot.slane %v1337_v0, %v1811_v44 }
 0x5b1   : > { %vm1195_vm13 = vcmp.eq.s32.totalorder %v1983_v42, %v1191_v3  ;;  %1658 = vmatprep.mubr.msk.bf16.mxu0 %vm514_vm9, %v1204_v35 }
 0x5b2   : > { %v1522_v26 = vsel %vm1195_vm13, 1.0, %v1713_v20 }
 0x5b3   : > { %v1205_v6 = vpack.c.bf16 %v1522_v26, %v1521_v5 }
 0x5b5   : > { %1659 = vmatmul.mubr.msk.bf16.vlgmr.msra.gmra.mrb[20].mxu0 %vm514_vm9, %v1205_v6 }
 0x63d   : > { %v1652_v49 = vpop.f32.mrb[16].mxu1 }
 0x63e   : > { %v1118_v13 = vadd.f32 %v1652_v49, %v1995_v50  ;;  %v1109_v47 = vpop.f32.mrb[17].mxu1 }
 0x63f   : > { %v1110_v31 = vadd.f32 %v1109_v47, %v1995_v50  ;;  %v1653_v30 = vpop.f32.mrb[18].mxu1 }
 0x640   : > { %v1126_v22 = vmax.f32 %v1118_v13, 0.0  ;;  %v1121_v18 = vadd.f32 %v1653_v30, %v1995_v50  ;;  %v1112_v42 = vpop.f32.mrb[19].mxu1 }
 0x641   : > { %v1124_v33 = vmax.f32 %v1110_v31, 0.0  ;;  %v1113_v21 = vadd.f32 %v1112_v42, %v1995_v50 }
 0x642   : > { %v1130_v37 = vmax.f32 %v2012_v16, %v1126_v22  ;;  %v1127_v20 = vmax.f32 %v1121_v18, 0.0 }
 0x643   : > { %v1128_v39 = vmax.f32 %v2014_v17, %v1124_v33  ;;  %v1125_v41 = vmax.f32 %v1113_v21, 0.0 }
 0x644   : > { %v1131_v23 = vmax.f32 %v2016_v38, %v1127_v20 }
 0x645   : > { %v1129_v7 = vmax.f32 %v2018_v19, %v1125_v41 }
 0x688   : > { %v1660_v24 = vpop.f32.mrb[20].mxu0 }
 0x689   : > { %v1255_v25 = vadd.f32 %v1660_v24, %v1883_v9  ;;  %v1246_v27 = vpop.f32.mrb[21].mxu0  ;;  %v1700_v9 = vld [vmem:[%s2078_s3] sm:$0xff]  }
 0x68a   : > { %v1247_v15 = vadd.f32 %v1246_v27, %v1888_v11  ;;  %v1661_v63 = vpop.f32.mrb[22].mxu0  ;;  %1668 = vmatprep.subr.bf16.mxu0 %v1700_v9  ;;  %v1701_v11 = vld [vmem:[%s2078_s3 + $0x8] sm:$0xff]  }
 0x68b   : > { %v1258_v43 = vadd.f32 %v1661_v63, %v1893_v14  ;;  %v1249_v45 = vpop.f32.mrb[23].mxu0  ;;  %v1263_v4 = vmax.f32 %v1255_v25, 0.0  ;;  %1669 = vmatpush3.bf16.msra.mxu0 %v1700_v9 }
 0x68c   : > { %v1250_v16 = vadd.f32 %v1249_v45, %v1899_v28  ;;  %v1261_v17 = vmax.f32 %v1247_v15, 0.0  ;;  %1670 = vmatprep.subr.bf16.mxu0 %v1701_v11 }
 0x68d   : > { %v1264_v48 = vmax.f32 %v1258_v43, 0.0 }
 0x68e   : > { %v1262_v51 = vmax.f32 %v1250_v16, 0.0 }
 0x68f   : > { %v1266_v8 = vpack.c.bf16 %v1264_v48, %v1263_v4  ;;  %1671 = vmatpush3.bf16.msra.mxu0 %v1701_v11 }
 0x690   : > { %v1265_v38 = vpack.c.bf16 %v1262_v51, %v1261_v17 }
 0x692   : > { %1664 = vmatprep.mubr.msk.bf16.mxu1 %vm668_vm6, %v1265_v38 }
 0x693   : > { %1665 = vmatmul.mubr.msk.bf16.vlgmr.msra.gmra.mrb[20].mxu1 %vm668_vm6, %v1266_v8  ;;  %vm1413_vm6 = vcmask 523264  }
 0x766   : > { %v1666_v14 = vpop.f32.mrb[20].mxu1 }
 0x767   : > { %v1316_v28 = vadd.f32 %v1666_v14, %v1995_v50  ;;  %v1307_v19 = vpop.f32.mrb[21].mxu1 }
 0x768   : > { %v1308_v46 = vadd.f32 %v1307_v19, %v1995_v50  ;;  %v1667_v40 = vpop.f32.mrb[22].mxu1 }
 0x769   : > { %v1324_v52 = vmax.f32 %v1316_v28, 0.0  ;;  %v1319_v36 = vadd.f32 %v1667_v40, %v1995_v50  ;;  %v1310_v54 = vpop.f32.mrb[23].mxu1 }
 0x76a   : > { %v1322_v55 = vmax.f32 %v1308_v46, 0.0  ;;  %v1311_v56 = vadd.f32 %v1310_v54, %v1995_v50 }
 0x76b   : > { %v1328_v57 = vmax.f32 %v1130_v37, %v1324_v52  ;;  %v1325_v58 = vmax.f32 %v1319_v36, 0.0 }
 0x76c   : > { %v1326_v29 = vmax.f32 %v1128_v39, %v1322_v55  ;;  %v1323_v59 = vmax.f32 %v1311_v56, 0.0 }
 0x76d   : > { %v1329_v32 = vmax.f32 %v1131_v23, %v1325_v58 }
 0x76e   : > { %v1327_v60 = vmax.f32 %v1129_v7, %v1323_v59 }
 0x76f   : > { %v1331_v61 = vpack.c.bf16 %v1329_v32, %v1328_v57 }
 0x770   : > { %v1330_v34 = vpack.c.bf16 %v1327_v60, %v1326_v29 }
 0x772   : > { %1672 = vmatprep.mubr.msk.bf16.mxu0 %vm514_vm9, %v1330_v34 }
 0x773   : > { %1673 = vmatmul.mubr.msk.bf16.vlgmr.msra.gmra.mrb[24].mxu0 %vm514_vm9, %v1331_v61  ;;  %vm1427_vm9 = vcmask 516096  }
 0x846   : > { %v1674_v50 = vpop.f32.mrb[24].mxu0 }
 0x847   : > { %v1403_v53 = vadd.f32 %v1674_v50, %v1341_v12  ;;  %v1394_v10 = vpop.f32.mrb[25].mxu0 }
 0x848   : > { %v1395_v1 = vadd.f32 %v1394_v10, %v1341_v12  ;;  %v1675_v2 = vpop.f32.mrb[26].mxu0 }
 0x849   : > { %v1411_v35 = vmax.f32 %v1403_v53, 0.0  ;;  %v1406_v3 = vadd.f32 %v1675_v2, %v1341_v12  ;;  %v1397_v5 = vpop.f32.mrb[27].mxu0 }
 0x84a   : > { %v1409_v26 = vmax.f32 %v1395_v1, 0.0  ;;  %v1398_v6 = vadd.f32 %v1397_v5, %v1341_v12 }
 0x84b   : > { %v1412_v49 = vmax.f32 %v1406_v3, 0.0  ;;  %v1416_v47 = vsel %vm1413_vm6, %v1411_v35, -inf }
 0x84c   : > { %v1410_v13 = vmax.f32 %v1398_v6, 0.0  ;;  %v1414_v30 = vsel %vm1413_vm6, %v1409_v26, -inf }
 0x84d   : > { %v1417_v31 = vsel %vm1413_vm6, %v1412_v49, -inf }
 0x84e   : > { %v1419_v22 = vmax.f32 %v1416_v47, %v1417_v31  ;;  %v1415_v18 = vsel %vm1413_vm6, %v1410_v13, -inf }
 0x84f   : > { %v1418_v44 = vmax.f32 %v1414_v30, %v1415_v18 }
 0x851   : > { %v1420_v42 = vmax.f32 %v1418_v44, %v1419_v22 }
 0x853   : > { %v1421_v33 = vrot.slane %v1420_v42, 4 }
 0x855   : > { %v1422_v21 = vmax.f32 %v1420_v42, %v1421_v33 }
 0x857   : > { %v1423_v37 = vrot.slane %v1422_v21, 2 }
 0x859   : > { %v1424_v20 = vmax.f32 %v1422_v21, %v1423_v37 }
 0x85b   : > { %v1425_v39 = vrot.slane %v1424_v20, 1 }
 0x85d   : > { %v1426_v41 = vmax.f32 %v1424_v20, %v1425_v39 }
 0x85f   : > { %1428 = vst.msk [vmem:[%s193_s13] sm:$0x1] %vm1427_vm9, %v1426_v41 }
 0x860 PF: > { %s14_s15 = sadd.s32 1, %s1708_s15  }
 0x861   : > { %p11_p4 = scmp.ge.s32.totalorder %s14_s15, 4  }
 0x863   :  { %13 = sbr.rel (!%p11_p4) target bundleno = 1 (0x1), region = 66 }

// kernel: _forward.3
= control target key start
LH: loop header
LB: loop body
LE: loop exit
PB: predicated region body
PF: predicated region fallthrough
CT: control target
= control target key end

     0   :  { %s6565_s0 = inlined_call_operand.vmem [shape: f32[2,32,3], index: 0, kind: input, shape index: {}]   ;;  %s6566_s1 = inlined_call_operand.vmem [shape: f32[2,3,3], index: 1, kind: input, shape index: {}]   ;;  %s6567_s2 = inlined_call_operand.vmem [shape: bf16[33,16], index: 2, kind: input, shape index: {}]   ;;  %s6568_s3 = inlined_call_operand.vmem [shape: bf16[17,16], index: 3, kind: input, shape index: {}]   ;;  %s6569_s4 = inlined_call_operand.vmem [shape: bf16[33,16], index: 4, kind: input, shape index: {}]   ;;  %s6570_s5 = inlined_call_operand.vmem [shape: bf16[17,16], index: 5, kind: input, shape index: {}]   ;;  %s6571_s6 = inlined_call_operand.vmem [shape: bf16[33,16], index: 6, kind: input, shape index: {}]   ;;  %s6572_s7 = inlined_call_operand.vmem [shape: bf16[49,64], index: 7, kind: input, shape index: {}]   ;;  %s6573_s8 = inlined_call_operand.vmem [shape: bf16[113,32], index: 8, kind: input, shape index: {}]   ;;  %s6574_s9 = inlined_call_operand.vmem [shape: bf16[33,32], index: 9, kind: input, shape index: {}]   ;;  %s6575_s10 = inlined_call_operand.vmem [shape: bf16[33,16], index: 10, kind: input, shape index: {}]   ;;  %s6576_s11 = inlined_call_operand.vmem [shape: bf16[8,16], index: 11, kind: input, shape index: {}]   ;;  %s6577_s12 = inlined_call_operand.vmem [shape: f32[8,1], index: 12, kind: input, shape index: {}]   ;;  %s6578_s13 = inlined_call_operand.hbm [shape: f32[2,8,32], index: 13, kind: output, shape index: {0}]   ;;  %s6579_s14 = inlined_call_operand.vmem [shape: f32[2,1,64], index: 14, kind: output, shape index: {1}]  }
   0x1   :  { %6581 = sst [smem:[#allocation7_spill]] %s6565_s0 }
   0x2   :  { %20 = vsyncpa [#allocation3], 0 }
   0x3   :  { %22 = vsyncpa [#allocation3 + $0x1], 0  ;;  %s5411_s29 = smov 0   ;;  %s5413_s30 = smov 0  }
   0x4   :  { %s5415_s15 = smov 0   ;;  %s5417_s16 = smov 0  }
   0x5 LB: > { %6582 = sst [smem:[#allocation5_spill]] %s5323_s15  ;;  %s5432_s17 = sadd.s32 4294967295, %s5327_s16   ;;  %s5327_s16 = sphi %s5417_s16, %s6593_s16   ;;  %s5323_s15 = sphi %s5415_s15, %s6590_s15   ;;  %s5319_s30 = sphi %s5413_s30, %s6592_s30   ;;  %s5315_s29 = sphi %s5411_s29, %s6591_s29  }
   0x6   : > { %s4509_s18 = sadd.s32 4294967294, %s5327_s16   ;;  %s5436_s19 = sadd.s32 1, %s5327_s16  }
   0x7   : > { %s318_s20 = sadd.s32 1, %s5323_s15  ;;  %s315_s21 = ssub.s32 %s5327_s16, %s5436_s19 }
   0x8   : > { %p328_p0 = scmp.ne.s32.totalorder %s5323_s15, %s5319_s30  ;;  %p316_p1 = scmp.eq.s32.totalorder %s315_s21, 0 }
   0x9   : > { %p329_p2 = scmp.eq.s32.totalorder %s5432_s17, 1  ;;  %p334_p3 = scmp.ne.s32.totalorder %s5319_s30, %s5315_s29 }
   0xa   : > { %p335_p4 = scmp.eq.s32.totalorder %s4509_s18, 1  ;;  %p4512_p7 = scmp.ge.s32.totalorder %s5327_s16, 1 }
   0xb   : > { %s5447_s22 = scalar_select %p316_p1, %s5323_s15, %s318_s20  }
   0xc   : > { %p5449_p5 = por %p329_p2, %p328_p0  ;;  %p5453_p6 = por %p335_p4, %p334_p3 }
   0xd   : > { %6583 = sst [smem:[#allocation6_spill]] %s5447_s22  ;;  %p427_p8 = scmp.lt.s32.totalorder %s5327_s16, 3 }
   0xf   : > { %p428_p9 = pnand %p4512_p7, %p427_p8 }
  0x10   : > { %p480_p10 = scmp.lt.s32.totalorder (!%p428_p9), %s5432_s17, 1  ;;  %vm501_vm0 = vcmask (!%p428_p9), 23552   ;;  %s6586_s0 = sld [smem:[#allocation7_spill]] (!%p428_p9)  ;;  %vm576_vm1 = vcmask (!%p428_p9), 1040384   ;;  %vm577_vm2 = vcmask (!%p428_p9), 1041408   ;;  %v5329_v9 = vmov (!%p428_p9), 65535  }
  0x11   : > { %431 = sbr.rel (%p428_p9) target bundleno = 6844 (0x1abc), region = 72  ;;  %v578_v10 = vsel (!%p428_p9), %vm576_vm1, 4294967295, %v5329_v9  ;;  %v566_v11 = vld [vmem:[%s6567_s2] sm:$0x3] (!%p428_p9)  ;;  %v567_v14 = vld [vmem:[%s6567_s2 + $0x8] sm:$0x3] (!%p428_p9)  ;;  %vm5154_vm4 = vmpackc.low (!%p428_p9), %vm501_vm0, %vm501_vm0  ;;  %v688_v51 = vlaneseq (!%p428_p9) }
  0x12   : > { %v579_v12 = vsel (!%p428_p9), %vm577_vm2, %v578_v10, 0  ;;  %v5330_v16 = vmov (!%p428_p9), 0.0|0.0   ;;  %vm5331_vm3 = vmmov (!%p428_p9), 0   ;;  %v5332_v17 = vmov (!%p428_p9), 0.0   ;;  %s472_s28 = sand.u32 (!%p428_p9), 1, %s5319_s30  }
  0x13   : > { %v581_v13 = vand.u32 (!%p428_p9), %v579_v12, %v566_v11  ;;  %v633_v15 = vand.u32 (!%p428_p9), %v579_v12, %v567_v14  ;;  %v5333_v36 = vmov (!%p428_p9), 1.0   ;;  %v689_v52 = vshrl.u32 (!%p428_p9), %v688_v51, 7 }
  0x14   : > { %vm874_vm9 = vcmask (!%p428_p9), 261120  }
  0x15   : > { %4843 = vmatprep.subr.bf16.mxu1 (!%p428_p9), %v581_v13  ;;  %v5540_v55 = vsub.s32 (!%p428_p9), 0, %v689_v52 }
  0x16   : > { %4844 = vmatpush3.bf16.msra.mxu1 (!%p428_p9), %v581_v13 }
  0x17   : > { %4849 = vmatprep.subr.bf16.mxu1 (!%p428_p9), %v633_v15 }
  0x18   : > { %s5461_s25 = scalar_select %p480_p10, %s5432_s17, 1 }
  0x1a   : > { %s4516_s26 = sshll.u32 %s5461_s25, 2  ;;  %s4682_s20 = sshll.u32 %s5461_s25, 5 }
  0x1b   : > { %s488_s18 = scalar_lea.vmem %s6566_s1, %s4516_s26  ;;  %s484_s15 = scalar_lea.vmem %s6586_s0, %s4682_s20 }
  0x1c   : > { %v499_v0 = vld [vmem:[%s488_s18] sm:$0x7]  ;;  %v494_v3 = vld [vmem:[%s484_s15 + $0x8] sm:$0xff]  ;;  %v495_v5 = vld [vmem:[%s484_s15 + $0x10] sm:$0xff]  ;;  %s491_s27 = scalar_lea.vmem %s6579_s14, %s5461_s25  ;;  %s4679_s18 = sshll.u32 %s5432_s17, 7 }
  0x1d   : > { %v500_v1 = vpack.c.bf16 %v499_v0, %v499_v0  ;;  %v493_v2 = vld [vmem:[%s484_s15] sm:$0xff]  ;;  %v496_v7 = vld [vmem:[%s484_s15 + $0x18] sm:$0xff]  ;;  %s4513_s15 = sshll.u32 %s472_s28, 3  ;;  %s6522_s0 = scalar_lea.hbm %s6578_s13, %s4679_s18 }
  0x1e   : > { %v497_v4 = vpack.c.bf16 %v494_v3, %v493_v2  ;;  %v498_v8 = vpack.c.bf16 %v496_v7, %v495_v5  ;;  %v5543_v7 = vand.u32 127, %v688_v51  ;;  %s474_s20 = scalar_lea.vmem [#allocation2], %s4513_s15  ;;  %s4400_s17 = scalar_lea.sflag [#allocation3], %s472_s28 }
  0x1f   : > { %5192 = vmatprep.subr.msk.bf16.mxu0 %vm501_vm0, %v500_v1  ;;  %v509_v6 = vsel %vm501_vm0, %v500_v1, 0  ;;  %s4416_s25 = sshll.u32 %s474_s20, 4  ;;  %s6524_s25 = int_to_ptr.vmem [resolvable:$true] %s4416_s25 }
  0x20   : > { %4838 = vmatpush3.bf16.xpose.msra.mxu0 %v509_v6  ;;  %4839 = vmatprep.mubr.msk.bf16.mxu0 %vm501_vm0, %v497_v4  ;;  %s5265_s26 = scalar_lea.vmem %s6524_s25, 128 }
  0x21   : > { %5152 = vmatprep.subr.bf16.mxu0 %v5330_v16  ;;  %p5266_p11 = scmp.ne.s32.totalorder %s6524_s25, %s5265_s26 }
  0x23   : > { %p5267_p12 = pnand %p5266_p11, %p5449_p5 }
  0x25   : > { %p5268_p13 = pneg %p5267_p12 }
  0x27   : > { %4840 = vmatmul.mubr.msk.bf16.vlgmr.msra.gmra.mrb[0].mxu0 %vm501_vm0, %v498_v8 }
  0x28   : > { %4863 = vmatprep.mubr.msk.f32.mxu0 %vm5331_vm3, %v5332_v17 }
  0xfa   : > { %v4841_v18 = vpop.f32.mrb[0].mxu0 }
  0xfb   : > { %v545_v19 = vpop.f32.mrb[1].mxu0 }
  0xfc   : > { %v4842_v20 = vpop.f32.mrb[2].mxu0 }
  0xfd   : > { %v561_v21 = vpack.c.bf16 %v4842_v20, %v4841_v18  ;;  %v548_v22 = vpop.f32.mrb[3].mxu0 }
  0xfe   : > { %v560_v23 = vpack.c.bf16 %v548_v22, %v545_v19 }
  0xff   : > { %v564_v29 = vunpack.c.l.bf16 %v561_v21  ;;  %v565_v30 = vunpack.c.h.bf16 %v561_v21  ;;  %v574_v35 = vsel %vm501_vm0, %v561_v21, 0 }
 0x100   : > { %4845 = vmatprep.mubr.msk.bf16.mxu1 %vm501_vm0, %v560_v23  ;;  %v562_v24 = vunpack.c.l.bf16 %v560_v23  ;;  %v563_v25 = vunpack.c.h.bf16 %v560_v23  ;;  %v571_v33 = vsel %vm501_vm0, %v560_v23, 0 }
 0x101   : > { %4846 = vmatmul.mubr.msk.bf16.vlgmr.msra.gmra.mrb[0].mxu1 %vm501_vm0, %v561_v21  ;;  %v700_v31 = vmul.f32 %v564_v29, %v564_v29  ;;  %v701_v32 = vmul.f32 %v565_v30, %v565_v30 }
 0x102   : > { %4850 = vmatpush3.bf16.msra.mxu1 %v633_v15  ;;  %4851 = vmatprep.mubr.msk.bf16.mxu1 %vm501_vm0, %v560_v23  ;;  %v698_v26 = vmul.f32 %v562_v24, %v562_v24  ;;  %v699_v27 = vmul.f32 %v563_v25, %v563_v25 }
 0x103   : > { %5193 = vmatprep.subr.msk.bf16.mxu1 %vm501_vm0, %v560_v23  ;;  %v5157_v34 = vpack.c.bf16 %v701_v32, %v700_v31 }
 0x104   : > { %v5153_v28 = vpack.c.bf16 %v699_v27, %v698_v26 }
 0x106   : > { %5155 = vmatpush3.bf16.xpose.msk.msra.mxu0 %vm5154_vm4, %v5153_v28 }
 0x107   : > { %5156 = vmatprep.subr.bf16.mxu0 %v5330_v16 }
 0x109   : > { %4852 = vmatmul.mubr.msk.bf16.vlgmr.msra.gmra.mrb[4].mxu1 %vm501_vm0, %v561_v21 }
 0x10a   : > { %4870 = vmatprep.mubr.msk.bf16.mxu1 %vm501_vm0, %v560_v23 }
 0x10b   : > { %4867 = vmatpush3.bf16.xpose.msra.mxu1 %v571_v33 }
 0x10c   : > { %5194 = vmatprep.subr.msk.bf16.mxu1 %vm501_vm0, %v561_v21 }
 0x10e   : > { %5159 = vmatpush3.bf16.xpose.msk.msra.mxu0 %vm5154_vm4, %v5157_v34 }
 0x113   : > { %4869 = vmatpush3.bf16.xpose.msra.mxu1 %v574_v35 }
 0x115   : > { %4864 = vmatmul.mubr.msk.f32.vlgmr.msra.gmra.mrb[4].mxu0 %vm501_vm0, %v5333_v36 }
 0x11a   : > { %4871 = vmatmul.mubr.msk.bf16.vlgmr.msra.gmra.mrb[8].mxu1 %vm501_vm0, %v561_v21 }
 0x1d4   : > { %v5499_v37 = vpop.f32.mrb[0].mxu1 }
 0x1d5   : > { %v5501_v38 = vpop.f32.mrb[1].mxu1 }
 0x1d6   : > { %v5503_v39 = vpop.f32.mrb[2].mxu1 }
 0x1d7   : > { %v5505_v40 = vpop.f32.mrb[3].mxu1 }
 0x1dc   : > { %v5507_v41 = vpop.f32.mrb[4].mxu1 }
 0x1dd   : > { %v686_v42 = vsub.f32 %v5499_v37, %v5507_v41  ;;  %v5511_v43 = vpop.f32.mrb[5].mxu1 }
 0x1de   : > { %v684_v44 = vsub.f32 %v5501_v38, %v5511_v43  ;;  %v5515_v45 = vpop.f32.mrb[6].mxu1 }
 0x1df   : > { %v687_v46 = vsub.f32 %v5503_v39, %v5515_v45  ;;  %v5521_v47 = vpack.c.bf16 %v5515_v45, %v5507_v41  ;;  %v5523_v48 = vpop.f32.mrb[7].mxu1 }
 0x1e0   : > { %v685_v49 = vsub.f32 %v5505_v40, %v5523_v48  ;;  %v5529_v50 = vpack.c.bf16 %v5523_v48, %v5511_v43 }
 0x1e2   : > { %4874 = vmatprep.subr.bf16.mxu1 %v5529_v50  ;;  %4888 = vmatprep.subr.bf16.mxu0 %v5529_v50 }
 0x1e3   : > { %4875 = vmatpush3.bf16.msra.mxu1 %v5529_v50  ;;  %4889 = vmatpush3.bf16.msra.mxu0 %v5529_v50 }
 0x1e4   : > { %4876 = vmatprep.subr.bf16.mxu1 %v5521_v47  ;;  %4890 = vmatprep.subr.bf16.mxu0 %v5521_v47 }
 0x1e7   : > { %4877 = vmatpush3.bf16.msra.mxu1 %v5521_v47  ;;  %4891 = vmatpush3.bf16.msra.mxu0 %v5521_v47 }
 0x1e8   : > { %4902 = vmatprep.subr.bf16.mxu0 %v5529_v50  ;;  %v783_v53 = vpop.f32.mrb[4].mxu0 }
 0x1e9   : > { %v4865_v54 = vpop.f32.mrb[5].mxu0  ;;  %v845_v56 = vrot.slane %v783_v53, %v5540_v55 }
 0x1ed   : > { %v4872_v57 = vpop.f32.mrb[8].mxu1 }
 0x1ee   : > { %v840_v58 = vmul.f32 2.0, %v4872_v57  ;;  %v823_v59 = vpop.f32.mrb[9].mxu1 }
 0x1ef   : > { %v838_v60 = vmul.f32 2.0, %v823_v59  ;;  %v4873_v61 = vpop.f32.mrb[10].mxu1 }
 0x1f0   : > { %v848_v62 = vsub.f32 %v845_v56, %v840_v58  ;;  %v841_v63 = vmul.f32 2.0, %v4873_v61  ;;  %v826_v0 = vpop.f32.mrb[11].mxu1 }
 0x1f1   : > { %v846_v1 = vsub.f32 %v845_v56, %v838_v60  ;;  %v839_v2 = vmul.f32 2.0, %v826_v0 }
 0x1f2   : > { %vm856_vm5 = vcmp.ge.s32.totalorder %v848_v62, 0  ;;  %v860_v3 = vsub.s32 2147483648, %v848_v62  ;;  %v849_v4 = vsub.f32 %v845_v56, %v841_v63 }
 0x1f3   : > { %vm854_vm6 = vcmp.ge.s32.totalorder %v846_v1, 0  ;;  %v858_v5 = vsub.s32 2147483648, %v846_v1  ;;  %v847_v6 = vsub.f32 %v845_v56, %v839_v2 }
 0x1f4   : > { %v864_v8 = vsel %vm856_vm5, %v848_v62, %v860_v3  ;;  %vm857_vm7 = vcmp.ge.s32.totalorder %v849_v4, 0  ;;  %v861_v9 = vsub.s32 2147483648, %v849_v4 }
 0x1f5   : > { %v868_v10 = vand.u32 4294967264, %v864_v8  ;;  %v862_v11 = vsel %vm854_vm6, %v846_v1, %v858_v5  ;;  %vm855_vm8 = vcmp.ge.s32.totalorder %v847_v6, 0  ;;  %v859_v12 = vsub.s32 2147483648, %v847_v6 }
 0x1f6   : > { %v866_v13 = vand.u32 4294967264, %v862_v11  ;;  %v865_v14 = vsel %vm857_vm7, %v849_v4, %v861_v9  ;;  %vm1028_vm7 = vcmask 130048  }
 0x1f7   : > { %v869_v15 = vand.u32 4294967264, %v865_v14  ;;  %v863_v18 = vsel %vm855_vm8, %v847_v6, %v859_v12  ;;  %v5546_v19 = vor.u32 %v868_v10, %v5543_v7 }
 0x1f8   : > { %v867_v20 = vand.u32 4294967264, %v863_v18  ;;  %v5549_v21 = vor.u32 %v866_v13, %v5543_v7 }
 0x1f9   : > { %v905_v22 = vsel %vm874_vm9, %v5546_v19, 2147483647  ;;  %v5554_v23 = vor.u32 %v869_v15, %v5543_v7 }
 0x1fa   : > { %v907_v24 = vshra.s32 %v905_v22, 16  ;;  %v875_v25 = vsel %vm874_vm9, %v5549_v21, 2147483647  ;;  %v5559_v26 = vor.u32 %v867_v20, %v5543_v7  ;;  %v906_v57 = vand.u32 65535, %v905_v22 }
 0x1fb   : > { %v877_v27 = vshra.s32 %v875_v25, 16  ;;  %v920_v28 = vsel %vm874_vm9, %v5554_v23, 2147483647  ;;  %v876_v51 = vand.u32 65535, %v875_v25 }
 0x1fc   : > { %v909_v29 = vcvt.s32.f32 %v907_v24  ;;  %v922_v30 = vshra.s32 %v920_v28, 16  ;;  %v890_v31 = vsel %vm874_vm9, %v5559_v26, 2147483647  ;;  %v908_v62 = vcvt.s32.f32 %v906_v57 }
 0x1fd   : > { %v879_v32 = vcvt.s32.f32 %v877_v27  ;;  %v892_v33 = vshra.s32 %v890_v31, 16  ;;  %v878_v54 = vcvt.s32.f32 %v876_v51  ;;  %v891_v56 = vand.u32 65535, %v890_v31 }
 0x1fe   : > { %910 = vmin.xlane.f32.xlu1 %v909_v29  ;;  %v924_v34 = vcvt.s32.f32 %v922_v30  ;;  %v921_v63 = vand.u32 65535, %v920_v28 }
 0x1ff   : > { %880 = vmin.xlane.f32.xlu0 %v879_v32  ;;  %v894_v35 = vcvt.s32.f32 %v892_v33  ;;  %v893_v61 = vcvt.s32.f32 %v891_v56 }
 0x200   : > { %v923_v2 = vcvt.s32.f32 %v921_v63 }
 0x202   : > { %925 = vmin.xlane.f32.xlu1 %v924_v34 }
 0x203   : > { %895 = vmin.xlane.f32.xlu0 %v894_v35 }
 0x28b   : > { %v911_v52 = vpop.xlane.xlu1 %910 }
 0x28c   : > { %v881_v53 = vpop.xlane.xlu0 %880  ;;  %vm912_vm11 = vcmp.eq.f32.partialorder %v909_v29, %v911_v52  ;;  %v917_v5 = vcvt.f32.s32 %v911_v52 }
 0x28d   : > { %vm882_vm10 = vcmp.eq.f32.partialorder %v879_v32, %v881_v53  ;;  %v913_v1 = vsel %vm912_vm11, %v908_v62, inf  ;;  %v887_v4 = vcvt.f32.s32 %v881_v53 }
 0x28e   : > { %v883_v58 = vsel %vm882_vm10, %v878_v54, inf  ;;  %v918_v12 = vshll.u32 %v917_v5, 16 }
 0x28f   : > { %884 = vmin.xlane.f32.xlu0 %v883_v58  ;;  %v926_v59 = vpop.xlane.xlu1 %925  ;;  %v888_v8 = vshll.u32 %v887_v4, 16 }
 0x290   : > { %v896_v60 = vpop.xlane.xlu0 %895  ;;  %vm927_vm13 = vcmp.eq.f32.partialorder %v924_v34, %v926_v59  ;;  %v932_v13 = vcvt.f32.s32 %v926_v59 }
 0x291   : > { %vm897_vm12 = vcmp.eq.f32.partialorder %v894_v35, %v896_v60  ;;  %v928_v3 = vsel %vm927_vm13, %v923_v2, inf  ;;  %v902_v9 = vcvt.f32.s32 %v896_v60 }
 0x292   : > { %v898_v0 = vsel %vm897_vm12, %v893_v61, inf  ;;  %v933_v31 = vshll.u32 %v932_v13, 16 }
 0x293   : > { %899 = vmin.xlane.f32.xlu1 %v898_v0  ;;  %914 = vmin.xlane.f32.xlu0 %v913_v1  ;;  %v903_v18 = vshll.u32 %v902_v9, 16 }
 0x297   : > { %929 = vmin.xlane.f32.xlu1 %v928_v3 }
 0x31c   : > { %v885_v6 = vpop.xlane.xlu0 %884 }
 0x31d   : > { %v886_v10 = vcvt.f32.s32 %v885_v6 }
 0x31f   : > { %v889_v11 = vadd.s32 %v888_v8, %v886_v10 }
 0x320   : > { %v900_v14 = vpop.xlane.xlu1 %899  ;;  %v915_v15 = vpop.xlane.xlu0 %914 }
 0x321   : > { %vm935_vm14 = vcmp.eq.s32.totalorder %v5549_v21, %v889_v11  ;;  %v901_v20 = vcvt.f32.s32 %v900_v14  ;;  %v916_v22 = vcvt.f32.s32 %v915_v15 }
 0x322   : > { %v5567_v24 = vsel %vm935_vm14, 2147483647, %v5549_v21  ;;  %v4530_v33 = vsel %vm935_vm14, 1.0, %v5332_v17 }
 0x323   : > { %v904_v25 = vadd.s32 %v903_v18, %v901_v20  ;;  %v919_v27 = vadd.s32 %v918_v12, %v916_v22  ;;  %v1088_v28 = vsel %vm874_vm9, %v5567_v24, 2147483647 }
 0x324   : > { %v930_v29 = vpop.xlane.xlu1 %929  ;;  %v1090_v30 = vshra.s32 %v1088_v28, 16 }
 0x325   : > { %vm936_vm15 = vcmp.eq.s32.totalorder %v5559_v26, %v904_v25  ;;  %vm937_vm0 = vcmp.eq.s32.totalorder %v5546_v19, %v919_v27  ;;  %v931_v32 = vcvt.f32.s32 %v930_v29  ;;  %v568_v25 = vld [vmem:[%s6567_s2 + $0x10] sm:$0x1] }
 0x326   : > { %v4531_v34 = vsel %vm936_vm15, 1.0, %v5332_v17  ;;  %v1092_v35 = vcvt.s32.f32 %v1090_v30  ;;  %v5576_v21 = vsel %vm936_vm15, 2147483647, %v5559_v26  ;;  %v5583_v54 = vsel %vm937_vm0, 2147483647, %v5546_v19  ;;  %v5602_v19 = vld [vmem:[%s6568_s3] sm:$0xff]  }
 0x327   : > { %v951_v51 = vpack.c.bf16 %v4531_v34, %v4530_v33  ;;  %v934_v52 = vadd.s32 %v933_v31, %v931_v32  ;;  %v1103_v53 = vsel %vm874_vm9, %v5576_v21, 2147483647  ;;  %v1118_v57 = vsel %vm874_vm9, %v5583_v54, 2147483647  ;;  %4882 = vmatprep.subr.bf16.mxu1 %v5602_v19 }
 0x328   : > { %1093 = vmin.xlane.f32.xlu0 %v1092_v35  ;;  %v1105_v56 = vshra.s32 %v1103_v53, 16  ;;  %v1120_v26 = vshra.s32 %v1118_v57, 16  ;;  %v4532_v58 = vsel %vm937_vm0, 1.0, %v5332_v17  ;;  %v1104_v5 = vand.u32 65535, %v1103_v53 }
 0x329   : > { %vm938_vm1 = vcmp.eq.s32.totalorder %v5554_v23, %v934_v52  ;;  %4878 = vmatprep.mubr.msk.bf16.mxu1 %vm874_vm9, %v951_v51  ;;  %v1119_v6 = vand.u32 65535, %v1118_v57  ;;  %v569_v27 = vunpack.c.l.bf16 %v568_v25 }
 0x32a   : > { %v4533_v59 = vsel %vm938_vm1, 1.0, %v5332_v17  ;;  %v1107_v60 = vcvt.s32.f32 %v1105_v56  ;;  %v5594_v61 = vsel %vm938_vm1, 2147483647, %v5554_v23  ;;  %v1122_v63 = vcvt.s32.f32 %v1120_v26 }
 0x32b   : > { %v952_v62 = vpack.c.bf16 %v4533_v59, %v4532_v58  ;;  %v1133_v0 = vsel %vm874_vm9, %v5594_v61, 2147483647  ;;  %v1089_v23 = vand.u32 65535, %v1088_v28  ;;  %v1106_v10 = vcvt.s32.f32 %v1104_v5 }
 0x32c   : > { %1108 = vmin.xlane.f32.xlu1 %v1107_v60  ;;  %v1135_v1 = vshra.s32 %v1133_v0, 16  ;;  %1123 = vmin.xlane.f32.xlu0 %v1122_v63  ;;  %v1134_v11 = vand.u32 65535, %v1133_v0  ;;  %v1121_v13 = vcvt.s32.f32 %v1119_v6  ;;  %v691_v28 = vrot.slane %v569_v27, %v5540_v55 }
 0x32d   : > { %4879 = vmatmul.mubr.msk.bf16.vlgmr.msra.gmra.mrb[12].mxu1 %vm874_vm9, %v952_v62  ;;  %v1091_v4 = vcvt.s32.f32 %v1089_v23 }
 0x32e   : > { %v1137_v2 = vcvt.s32.f32 %v1135_v1  ;;  %4883 = vmatpush3.bf16.msra.mxu1 %v5602_v19  ;;  %v1136_v20 = vcvt.s32.f32 %v1134_v11  ;;  %v5614_v29 = vadd.f32 %v691_v28, %v686_v42  ;;  %v5619_v30 = vadd.f32 %v691_v28, %v684_v44 }
 0x32f   : > { %4896 = vmatprep.subr.bf16.mxu1 %v5602_v19  ;;  %v5624_v32 = vadd.f32 %v691_v28, %v687_v46  ;;  %v5630_v37 = vadd.f32 %v691_v28, %v685_v49 }
 0x330   : > { %1138 = vmin.xlane.f32.xlu1 %v1137_v2 }
 0x3b5   : > { %v1094_v3 = vpop.xlane.xlu0 %1093 }
 0x3b6   : > { %vm1095_vm2 = vcmp.eq.f32.partialorder %v1092_v35, %v1094_v3  ;;  %v1100_v40 = vcvt.f32.s32 %v1094_v3 }
 0x3b7   : > { %v1096_v8 = vsel %vm1095_vm2, %v1091_v4, inf }
 0x3b8   : > { %1097 = vmin.xlane.f32.xlu0 %v1096_v8  ;;  %v1101_v49 = vshll.u32 %v1100_v40, 16 }
 0x3b9   : > { %v1109_v9 = vpop.xlane.xlu1 %1108  ;;  %v1124_v12 = vpop.xlane.xlu0 %1123 }
 0x3ba   : > { %vm1110_vm4 = vcmp.eq.f32.partialorder %v1107_v60, %v1109_v9  ;;  %vm1125_vm5 = vcmp.eq.f32.partialorder %v1122_v63, %v1124_v12  ;;  %v1115_v53 = vcvt.f32.s32 %v1109_v9  ;;  %v1130_v57 = vcvt.f32.s32 %v1124_v12 }
 0x3bb   : > { %v1111_v14 = vsel %vm1110_vm4, %v1106_v10, inf  ;;  %v1126_v15 = vsel %vm1125_vm5, %v1121_v13, inf }
 0x3bc   : > { %1112 = vmin.xlane.f32.xlu1 %v1111_v14  ;;  %1127 = vmin.xlane.f32.xlu0 %v1126_v15  ;;  %v1116_v59 = vshll.u32 %v1115_v53, 16  ;;  %v1131_v0 = vshll.u32 %v1130_v57, 16 }
 0x3bd   : > { %v1139_v18 = vpop.xlane.xlu1 %1138 }
 0x3be   : > { %vm1140_vm6 = vcmp.eq.f32.partialorder %v1137_v2, %v1139_v18  ;;  %v1145_v60 = vcvt.f32.s32 %v1139_v18 }
 0x3bf   : > { %v1141_v22 = vsel %vm1140_vm6, %v1136_v20, inf }
 0x3c0   : > { %1142 = vmin.xlane.f32.xlu1 %v1141_v22  ;;  %v1146_v8 = vshll.u32 %v1145_v60, 16 }
 0x400   : > { %v4880_v31 = vpop.f32.mrb[12].mxu1 }
 0x401   : > { %v1002_v33 = vadd.f32 %v4880_v31, %v5614_v29  ;;  %v993_v34 = vpop.f32.mrb[13].mxu1 }
 0x402   : > { %v994_v41 = vadd.f32 %v993_v34, %v5619_v30  ;;  %v4881_v42 = vpop.f32.mrb[14].mxu1 }
 0x403   : > { %v1005_v38 = vadd.f32 %v4881_v42, %v5624_v32  ;;  %v996_v43 = vpop.f32.mrb[15].mxu1  ;;  %v1010_v35 = vmax.f32 %v1002_v33, 0.0 }
 0x404   : > { %v997_v44 = vadd.f32 %v996_v43, %v5630_v37  ;;  %v1008_v45 = vmax.f32 %v994_v41, 0.0 }
 0x405   : > { %v1011_v39 = vmax.f32 %v1005_v38, 0.0 }
 0x406   : > { %v1009_v46 = vmax.f32 %v997_v44, 0.0 }
 0x407   : > { %v1013_v51 = vpack.c.bf16 %v1011_v39, %v1010_v35 }
 0x408   : > { %v1012_v52 = vpack.c.bf16 %v1009_v46, %v1008_v45 }
 0x40a   : > { %4884 = vmatprep.mubr.msk.bf16.mxu1 %vm1028_vm7, %v1012_v52 }
 0x40b   : > { %4885 = vmatmul.mubr.msk.bf16.vlgmr.msra.gmra.mrb[16].mxu1 %vm1028_vm7, %v1013_v51 }
 0x40c   : > { %4897 = vmatpush3.bf16.msra.mxu1 %v5602_v19 }
 0x40d   : > { %4910 = vmatprep.subr.bf16.mxu1 %v5602_v19 }
 0x445   : > { %v1098_v48 = vpop.xlane.xlu0 %1097 }
 0x446   : > { %v1099_v56 = vcvt.f32.s32 %v1098_v48 }
 0x448   : > { %v1102_v26 = vadd.s32 %v1101_v49, %v1099_v56 }
 0x449   : > { %v1113_v58 = vpop.xlane.xlu1 %1112  ;;  %v1128_v63 = vpop.xlane.xlu0 %1127 }
 0x44a   : > { %vm1148_vm8 = vcmp.eq.s32.totalorder %v5567_v24, %v1102_v26  ;;  %v1114_v62 = vcvt.f32.s32 %v1113_v58  ;;  %v1129_v1 = vcvt.f32.s32 %v1128_v63 }
 0x44b   : > { %v5641_v2 = vsel %vm1148_vm8, 2147483647, %v5567_v24  ;;  %v4539_v9 = vsel %vm1148_vm8, 1.0, %v5332_v17 }
 0x44c   : > { %v1117_v23 = vadd.s32 %v1116_v59, %v1114_v62  ;;  %v1290_v3 = vsel %vm874_vm9, %v5641_v2, 2147483647  ;;  %v1132_v4 = vadd.s32 %v1131_v0, %v1129_v1 }
 0x44d   : > { %v1143_v5 = vpop.xlane.xlu1 %1142  ;;  %v1292_v6 = vshra.s32 %v1290_v3, 16 }
 0x44e   : > { %vm1149_vm10 = vcmp.eq.s32.totalorder %v5576_v21, %v1117_v23  ;;  %v1144_v10 = vcvt.f32.s32 %v1143_v5  ;;  %vm1150_vm11 = vcmp.eq.s32.totalorder %v5583_v54, %v1132_v4 }
 0x44f   : > { %v4540_v11 = vsel %vm1149_vm10, 1.0, %v5332_v17  ;;  %v1294_v12 = vcvt.s32.f32 %v1292_v6  ;;  %v5650_v24 = vsel %vm1149_vm10, 2147483647, %v5576_v21  ;;  %v5655_v20 = vsel %vm1150_vm11, 2147483647, %v5583_v54 }
 0x450   : > { %v1164_v13 = vpack.c.bf16 %v4540_v11, %v4539_v9  ;;  %v1147_v14 = vadd.s32 %v1146_v8, %v1144_v10  ;;  %v1305_v15 = vsel %vm874_vm9, %v5650_v24, 2147483647  ;;  %v4541_v22 = vsel %vm1150_vm11, 1.0, %v5332_v17 }
 0x451   : > { %1295 = vmin.xlane.f32.xlu0 %v1294_v12  ;;  %v1307_v18 = vshra.s32 %v1305_v15, 16  ;;  %v1320_v21 = vsel %vm874_vm9, %v5655_v20, 2147483647  ;;  %v1306_v35 = vand.u32 65535, %v1305_v15 }
 0x452   : > { %vm1151_vm12 = vcmp.eq.s32.totalorder %v5594_v61, %v1147_v14  ;;  %4892 = vmatprep.mubr.msk.bf16.mxu0 %vm874_vm9, %v1164_v13  ;;  %v1322_v28 = vshra.s32 %v1320_v21, 16  ;;  %v1321_v51 = vand.u32 65535, %v1320_v21 }
 0x453   : > { %v4542_v25 = vsel %vm1151_vm12, 1.0, %v5332_v17  ;;  %v1309_v27 = vcvt.s32.f32 %v1307_v18  ;;  %v5664_v31 = vsel %vm1151_vm12, 2147483647, %v5594_v61  ;;  %v1291_v61 = vand.u32 65535, %v1290_v3 }
 0x454   : > { %v1165_v33 = vpack.c.bf16 %v4542_v25, %v4541_v22  ;;  %v1335_v54 = vsel %vm874_vm9, %v5664_v31, 2147483647  ;;  %v1324_v34 = vcvt.s32.f32 %v1322_v28  ;;  %v1308_v48 = vcvt.s32.f32 %v1306_v35 }
 0x455   : > { %1310 = vmin.xlane.f32.xlu1 %v1309_v27  ;;  %v1337_v41 = vshra.s32 %v1335_v54, 16  ;;  %v1293_v44 = vcvt.s32.f32 %v1291_v61  ;;  %v1336_v49 = vand.u32 65535, %v1335_v54  ;;  %v1323_v57 = vcvt.s32.f32 %v1321_v51 }
 0x456   : > { %4893 = vmatmul.mubr.msk.bf16.vlgmr.msra.gmra.mrb[8].mxu0 %vm874_vm9, %v1165_v33  ;;  %1325 = vmin.xlane.f32.xlu0 %v1324_v34 }
 0x457   : > { %4903 = vmatpush3.bf16.msra.mxu0 %v5529_v50  ;;  %v1339_v42 = vcvt.s32.f32 %v1337_v41  ;;  %v1338_v59 = vcvt.s32.f32 %v1336_v49 }
 0x458   : > { %4904 = vmatprep.subr.bf16.mxu0 %v5521_v47 }
 0x459   : > { %1340 = vmin.xlane.f32.xlu1 %v1339_v42 }
 0x45b   : > { %4905 = vmatpush3.bf16.msra.mxu0 %v5521_v47 }
 0x45c   : > { %4916 = vmatprep.subr.bf16.mxu0 %v5529_v50 }
 0x4de   : > { %v5673_v38 = vpop.f32.mrb[16].mxu1  ;;  %v1296_v43 = vpop.xlane.xlu0 %1295 }
 0x4df   : > { %v5675_v39 = vpop.f32.mrb[17].mxu1  ;;  %vm1297_vm13 = vcmp.eq.f32.partialorder %v1294_v12, %v1296_v43  ;;  %v1302_v13 = vcvt.f32.s32 %v1296_v43 }
 0x4e0   : > { %v5677_v45 = vpop.f32.mrb[18].mxu1  ;;  %v1298_v46 = vsel %vm1297_vm13, %v1293_v44, inf }
 0x4e1   : > { %v5679_v52 = vpop.f32.mrb[19].mxu1  ;;  %1299 = vmin.xlane.f32.xlu0 %v1298_v46  ;;  %v1303_v15 = vshll.u32 %v1302_v13, 16 }
 0x4e2   : > { %v1311_v40 = vpop.xlane.xlu1 %1310 }
 0x4e3   : > { %vm1312_vm14 = vcmp.eq.f32.partialorder %v1309_v27, %v1311_v40  ;;  %v1326_v53 = vpop.xlane.xlu0 %1325  ;;  %v1317_v18 = vcvt.f32.s32 %v1311_v40 }
 0x4e4   : > { %v1313_v56 = vsel %vm1312_vm14, %v1308_v48, inf  ;;  %vm1327_vm15 = vcmp.eq.f32.partialorder %v1324_v34, %v1326_v53  ;;  %v1332_v21 = vcvt.f32.s32 %v1326_v53 }
 0x4e5   : > { %1314 = vmin.xlane.f32.xlu1 %v1313_v56  ;;  %v1328_v26 = vsel %vm1327_vm15, %v1323_v57, inf  ;;  %v1318_v28 = vshll.u32 %v1317_v18, 16 }
 0x4e6   : > { %v1341_v58 = vpop.xlane.xlu1 %1340  ;;  %1329 = vmin.xlane.f32.xlu0 %v1328_v26 }
 0x4e7   : > { %vm1342_vm0 = vcmp.eq.f32.partialorder %v1339_v42, %v1341_v58  ;;  %v1347_v33 = vcvt.f32.s32 %v1341_v58  ;;  %v1333_v42 = vshll.u32 %v1332_v21, 16 }
 0x4e8   : > { %v1343_v60 = vsel %vm1342_vm0, %v1338_v59, inf  ;;  %vm5818_vm0 = vmpackc.low %vm1028_vm7, %vm1028_vm7 }
 0x4e9   : > { %1344 = vmin.xlane.f32.xlu1 %v1343_v60  ;;  %v1348_v51 = vshll.u32 %v1347_v33, 16 }
 0x529   : > { %v4894_v62 = vpop.f32.mrb[8].mxu0 }
 0x52a   : > { %v1215_v63 = vadd.f32 %v4894_v62, %v5614_v29  ;;  %v1206_v0 = vpop.f32.mrb[9].mxu0 }
 0x52b   : > { %v1207_v1 = vadd.f32 %v1206_v0, %v5619_v30  ;;  %v4895_v23 = vpop.f32.mrb[10].mxu0 }
 0x52c   : > { %v1218_v3 = vadd.f32 %v4895_v23, %v5624_v32  ;;  %v1209_v4 = vpop.f32.mrb[11].mxu0  ;;  %v1223_v6 = vmax.f32 %v1215_v63, 0.0 }
 0x52d   : > { %v1210_v5 = vadd.f32 %v1209_v4, %v5630_v37  ;;  %v1221_v9 = vmax.f32 %v1207_v1, 0.0 }
 0x52e   : > { %v1224_v8 = vmax.f32 %v1218_v3, 0.0 }
 0x52f   : > { %v1222_v10 = vmax.f32 %v1210_v5, 0.0 }
 0x530   : > { %v1226_v11 = vpack.c.bf16 %v1224_v8, %v1223_v6 }
 0x531   : > { %v1225_v12 = vpack.c.bf16 %v1222_v10, %v1221_v9 }
 0x533   : > { %4898 = vmatprep.mubr.msk.bf16.mxu1 %vm1028_vm7, %v1225_v12 }
 0x534   : > { %4899 = vmatmul.mubr.msk.bf16.vlgmr.msra.gmra.mrb[20].mxu1 %vm1028_vm7, %v1226_v11 }
 0x535   : > { %4911 = vmatpush3.bf16.msra.mxu1 %v5602_v19 }
 0x536   : > { %4924 = vmatprep.subr.bf16.mxu1 %v5602_v19 }
 0x56e   : > { %v1300_v14 = vpop.xlane.xlu0 %1299 }
 0x56f   : > { %v1301_v22 = vcvt.f32.s32 %v1300_v14 }
 0x571   : > { %v1304_v25 = vadd.s32 %v1303_v15, %v1301_v22 }
 0x572   : > { %v1315_v27 = vpop.xlane.xlu1 %1314 }
 0x573   : > { %vm1350_vm1 = vcmp.eq.s32.totalorder %v5641_v2, %v1304_v25  ;;  %v1316_v54 = vcvt.f32.s32 %v1315_v27  ;;  %v1330_v34 = vpop.xlane.xlu0 %1329 }
 0x574   : > { %v5691_v41 = vsel %vm1350_vm1, 2147483647, %v5641_v2  ;;  %v1331_v44 = vcvt.f32.s32 %v1330_v34  ;;  %v4547_v49 = vsel %vm1350_vm1, 1.0, %v5332_v17 }
 0x575   : > { %v1319_v61 = vadd.s32 %v1318_v28, %v1316_v54  ;;  %v1492_v43 = vsel %vm874_vm9, %v5691_v41, 2147483647 }
 0x576   : > { %v1345_v35 = vpop.xlane.xlu1 %1344  ;;  %v1494_v46 = vshra.s32 %v1492_v43, 16  ;;  %v1334_v40 = vadd.s32 %v1333_v42, %v1331_v44  ;;  %v1493_v10 = vand.u32 65535, %v1492_v43 }
 0x577   : > { %vm1351_vm2 = vcmp.eq.s32.totalorder %v5650_v24, %v1319_v61  ;;  %v1346_v48 = vcvt.f32.s32 %v1345_v35 }
 0x578   : > { %v4548_v53 = vsel %vm1351_vm2, 1.0, %v5332_v17  ;;  %v1496_v56 = vcvt.s32.f32 %v1494_v46  ;;  %v5699_v2 = vsel %vm1351_vm2, 2147483647, %v5650_v24  ;;  %vm1352_vm4 = vcmp.eq.s32.totalorder %v5655_v20, %v1334_v40 }
 0x579   : > { %v1366_v57 = vpack.c.bf16 %v4548_v53, %v4547_v49  ;;  %v1349_v26 = vadd.s32 %v1348_v51, %v1346_v48  ;;  %v1507_v58 = vsel %vm874_vm9, %v5699_v2, 2147483647  ;;  %v5705_v60 = vsel %vm1352_vm4, 2147483647, %v5655_v20 }
 0x57a   : > { %1497 = vmin.xlane.f32.xlu0 %v1496_v56  ;;  %v1509_v59 = vshra.s32 %v1507_v58, 16  ;;  %v4549_v62 = vsel %vm1352_vm4, 1.0, %v5332_v17  ;;  %v1522_v24 = vsel %vm874_vm9, %v5705_v60, 2147483647  ;;  %v1495_v14 = vcvt.s32.f32 %v1493_v10 }
 0x57b   : > { %vm1353_vm5 = vcmp.eq.s32.totalorder %v5664_v31, %v1349_v26  ;;  %4906 = vmatprep.mubr.msk.bf16.mxu0 %vm874_vm9, %v1366_v57  ;;  %v1524_v1 = vshra.s32 %v1522_v24, 16  ;;  %v1508_v15 = vand.u32 65535, %v1507_v58  ;;  %v1523_v28 = vand.u32 65535, %v1522_v24 }
 0x57c   : > { %v4550_v63 = vsel %vm1353_vm5, 1.0, %v5332_v17  ;;  %v1511_v0 = vcvt.s32.f32 %v1509_v59  ;;  %v5714_v23 = vsel %vm1353_vm5, 2147483647, %v5664_v31  ;;  %v1016_v31 = vld [vmem:[%s6568_s3 + $0x8] sm:$0x1] }
 0x57d   : > { %v1367_v3 = vpack.c.bf16 %v4550_v63, %v4549_v62  ;;  %v1537_v20 = vsel %vm874_vm9, %v5714_v23, 2147483647  ;;  %v1526_v4 = vcvt.s32.f32 %v1524_v1  ;;  %v1017_v8 = vunpack.c.l.bf16 %v1016_v31 }
 0x57e   : > { %1512 = vmin.xlane.f32.xlu1 %v1511_v0  ;;  %v1539_v5 = vshra.s32 %v1537_v20, 16  ;;  %v1510_v43 = vcvt.s32.f32 %v1508_v15  ;;  %v1538_v35 = vand.u32 65535, %v1537_v20  ;;  %v1525_v57 = vcvt.s32.f32 %v1523_v28 }
 0x57f   : > { %4907 = vmatmul.mubr.msk.bf16.vlgmr.msra.gmra.mrb[12].mxu0 %vm874_vm9, %v1367_v3  ;;  %1527 = vmin.xlane.f32.xlu0 %v1526_v4  ;;  %v5726_v9 = vrot.slane %v1017_v8, %v5540_v55 }
 0x580   : > { %4917 = vmatpush3.bf16.msra.mxu0 %v5529_v50  ;;  %v1541_v6 = vcvt.s32.f32 %v1539_v5  ;;  %v1540_v24 = vcvt.s32.f32 %v1538_v35 }
 0x581   : > { %4918 = vmatprep.subr.bf16.mxu0 %v5521_v47  ;;  %v1078_v11 = vadd.f32 %v5673_v38, %v5726_v9  ;;  %v1070_v50 = vadd.f32 %v5675_v39, %v5726_v9  ;;  %v1081_v12 = vadd.f32 %v5677_v45, %v5726_v9  ;;  %v1073_v18 = vadd.f32 %v5679_v52, %v5726_v9 }
 0x582   : > { %1542 = vmin.xlane.f32.xlu1 %v1541_v6 }
 0x583   : > { %v1086_v38 = vmax.f32 %v1078_v11, 0.0  ;;  %v1084_v45 = vmax.f32 %v1070_v50, 0.0  ;;  %v1087_v33 = vmax.f32 %v1081_v12, 0.0  ;;  %v1085_v46 = vmax.f32 %v1073_v18, 0.0 }
 0x584   : > { %4919 = vmatpush3.bf16.msra.mxu0 %v5521_v47 }
 0x607   : > { %v5734_v13 = vpop.xlane.xlu0 %1497  ;;  %v4900_v47 = vpop.f32.mrb[20].mxu1 }
 0x608   : > { %v1276_v22 = vadd.f32 %v4900_v47, %v5726_v9  ;;  %v1267_v21 = vpop.f32.mrb[21].mxu1  ;;  %vm1499_vm6 = vcmp.eq.f32.partialorder %v1496_v56, %v5734_v13 }
 0x609   : > { %v1268_v25 = vadd.f32 %v1267_v21, %v5726_v9  ;;  %v4901_v39 = vpop.f32.mrb[22].mxu1  ;;  %v1500_v27 = vsel %vm1499_vm6, %v1495_v14, inf  ;;  %v1504_v14 = vcvt.f32.s32 %v5734_v13 }
 0x60a   : > { %v1284_v54 = vmax.f32 %v1276_v22, 0.0  ;;  %v1279_v34 = vadd.f32 %v4901_v39, %v5726_v9  ;;  %1501 = vmin.xlane.f32.xlu0 %v1500_v27  ;;  %v1270_v42 = vpop.f32.mrb[23].mxu1 }
 0x60b   : > { %v1282_v61 = vmax.f32 %v1268_v25, 0.0  ;;  %v1271_v52 = vadd.f32 %v1270_v42, %v5726_v9  ;;  %v1513_v44 = vpop.xlane.xlu1 %1512  ;;  %v1505_v18 = vshll.u32 %v1504_v14, 16 }
 0x60c   : > { %v5743_v51 = vmax.f32 %v1086_v38, %v1284_v54  ;;  %v1285_v40 = vmax.f32 %v1279_v34, 0.0  ;;  %vm1514_vm8 = vcmp.eq.f32.partialorder %v1511_v0, %v1513_v44  ;;  %v1528_v53 = vpop.xlane.xlu0 %1527  ;;  %v1519_v22 = vcvt.f32.s32 %v1513_v44 }
 0x60d   : > { %v5745_v48 = vmax.f32 %v1084_v45, %v1282_v61  ;;  %v1283_v49 = vmax.f32 %v1271_v52, 0.0  ;;  %v1515_v56 = vsel %vm1514_vm8, %v1510_v43, inf  ;;  %vm1529_vm10 = vcmp.eq.f32.partialorder %v1526_v4, %v1528_v53 }
 0x60e   : > { %v5747_v26 = vmax.f32 %v1087_v33, %v1285_v40  ;;  %1516 = vmin.xlane.f32.xlu1 %v1515_v56  ;;  %v1530_v59 = vsel %vm1529_vm10, %v1525_v57, inf  ;;  %v1534_v38 = vcvt.f32.s32 %v1528_v53  ;;  %v1520_v27 = vshll.u32 %v1519_v22, 16 }
 0x60f   : > { %v5749_v58 = vmax.f32 %v1085_v46, %v1283_v49  ;;  %v1543_v62 = vpop.xlane.xlu1 %1542  ;;  %1531 = vmin.xlane.f32.xlu0 %v1530_v59 }
 0x610   : > { %vm1544_vm11 = vcmp.eq.f32.partialorder %v1541_v6, %v1543_v62  ;;  %v1549_v28 = vcvt.f32.s32 %v1543_v62  ;;  %v1535_v54 = vshll.u32 %v1534_v38, 16 }
 0x611   : > { %v1545_v63 = vsel %vm1544_vm11, %v1540_v24, inf }
 0x612   : > { %1546 = vmin.xlane.f32.xlu1 %v1545_v63 }
 0x652   : > { %v4908_v0 = vpop.f32.mrb[12].mxu0 }
 0x653   : > { %v1417_v1 = vadd.f32 %v4908_v0, %v5614_v29  ;;  %v1408_v3 = vpop.f32.mrb[13].mxu0 }
 0x654   : > { %v1409_v20 = vadd.f32 %v1408_v3, %v5619_v30  ;;  %v4909_v5 = vpop.f32.mrb[14].mxu0 }
 0x655   : > { %v1420_v31 = vadd.f32 %v4909_v5, %v5624_v32  ;;  %v1411_v8 = vpop.f32.mrb[15].mxu0  ;;  %v1425_v10 = vmax.f32 %v1417_v1, 0.0 }
 0x656   : > { %v1412_v4 = vadd.f32 %v1411_v8, %v5630_v37  ;;  %v1423_v50 = vmax.f32 %v1409_v20, 0.0 }
 0x657   : > { %v1426_v11 = vmax.f32 %v1420_v31, 0.0 }
 0x658   : > { %v1424_v12 = vmax.f32 %v1412_v4, 0.0 }
 0x659   : > { %v1428_v47 = vpack.c.bf16 %v1426_v11, %v1425_v10 }
 0x65a   : > { %v1427_v6 = vpack.c.bf16 %v1424_v12, %v1423_v50 }
 0x65c   : > { %4912 = vmatprep.mubr.msk.bf16.mxu1 %vm1028_vm7, %v1427_v6 }
 0x65d   : > { %4913 = vmatmul.mubr.msk.bf16.vlgmr.msra.gmra.mrb[24].mxu1 %vm1028_vm7, %v1428_v47 }
 0x65e   : > { %4925 = vmatpush3.bf16.msra.mxu1 %v5602_v19  ;;  %v1550_v19 = vshll.u32 %v1549_v28, 16 }
 0x697   : > { %v1502_v15 = vpop.xlane.xlu0 %1501 }
 0x698   : > { %v1503_v21 = vcvt.f32.s32 %v1502_v15 }
 0x69a   : > { %v1506_v25 = vadd.s32 %v1505_v18, %v1503_v21 }
 0x69b   : > { %v1517_v39 = vpop.xlane.xlu1 %1516 }
 0x69c   : > { %v1518_v45 = vcvt.f32.s32 %v1517_v39  ;;  %v1532_v33 = vpop.xlane.xlu0 %1531  ;;  %vm1552_vm12 = vcmp.eq.s32.totalorder %v5691_v41, %v1506_v25 }
 0x69d   : > { %v1533_v42 = vcvt.f32.s32 %v1532_v33  ;;  %v4555_v44 = vsel %vm1552_vm12, 1.0, %v5332_v17 }
 0x69e   : > { %v1521_v34 = vadd.s32 %v1520_v27, %v1518_v45 }
 0x69f   : > { %v1547_v61 = vpop.xlane.xlu1 %1546  ;;  %v1536_v13 = vadd.s32 %v1535_v54, %v1533_v42 }
 0x6a0   : > { %vm1553_vm13 = vcmp.eq.s32.totalorder %v5699_v2, %v1521_v34  ;;  %v1548_v52 = vcvt.f32.s32 %v1547_v61 }
 0x6a1   : > { %v4556_v43 = vsel %vm1553_vm13, 1.0, %v5332_v17  ;;  %vm1554_vm14 = vcmp.eq.s32.totalorder %v5705_v60, %v1536_v13 }
 0x6a2   : > { %v1564_v35 = vpack.c.bf16 %v4556_v43, %v4555_v44  ;;  %v1551_v46 = vadd.s32 %v1550_v19, %v1548_v52  ;;  %v4557_v41 = vsel %vm1554_vm14, 1.0, %v5332_v17 }
 0x6a4   : > { %vm1555_vm15 = vcmp.eq.s32.totalorder %v5714_v23, %v1551_v46  ;;  %4920 = vmatprep.mubr.msk.bf16.mxu0 %vm874_vm9, %v1564_v35 }
 0x6a5   : > { %v4558_v40 = vsel %vm1555_vm15, 1.0, %v5332_v17 }
 0x6a6   : > { %v1565_v49 = vpack.c.bf16 %v4558_v40, %v4557_v41 }
 0x6a8   : > { %4921 = vmatmul.mubr.msk.bf16.vlgmr.msra.gmra.mrb[16].mxu0 %vm874_vm9, %v1565_v49 }
 0x730   : > { %v4914_v2 = vpop.f32.mrb[24].mxu1 }
 0x731   : > { %v1478_v53 = vadd.f32 %v4914_v2, %v5726_v9  ;;  %v1469_v56 = vpop.f32.mrb[25].mxu1 }
 0x732   : > { %v1470_v57 = vadd.f32 %v1469_v56, %v5726_v9  ;;  %v4915_v59 = vpop.f32.mrb[26].mxu1 }
 0x733   : > { %v1486_v60 = vmax.f32 %v1478_v53, 0.0  ;;  %v1481_v62 = vadd.f32 %v4915_v59, %v5726_v9  ;;  %v1472_v23 = vpop.f32.mrb[27].mxu1 }
 0x734   : > { %v1484_v24 = vmax.f32 %v1470_v57, 0.0  ;;  %v1473_v63 = vadd.f32 %v1472_v23, %v5726_v9 }
 0x735   : > { %v1490_v0 = vmax.f32 %v5743_v51, %v1486_v60  ;;  %v1487_v1 = vmax.f32 %v1481_v62, 0.0 }
 0x736   : > { %v1488_v3 = vmax.f32 %v5745_v48, %v1484_v24  ;;  %v1485_v20 = vmax.f32 %v1473_v63, 0.0 }
 0x737   : > { %v1491_v5 = vmax.f32 %v5747_v26, %v1487_v1 }
 0x738   : > { %v1489_v31 = vmax.f32 %v5749_v58, %v1485_v20 }
 0x77b   : > { %v4922_v8 = vpop.f32.mrb[16].mxu0 }
 0x77c   : > { %v1615_v4 = vadd.f32 %v4922_v8, %v5614_v29  ;;  %v1606_v10 = vpop.f32.mrb[17].mxu0  ;;  %v5246_v29 = vld [vmem:[%s6569_s4 + $0x8] sm:$0xff]  }
 0x77d   : > { %v1607_v11 = vadd.f32 %v1606_v10, %v5619_v30  ;;  %v4923_v50 = vpop.f32.mrb[18].mxu0  ;;  %4936 = vmatprep.subr.bf16.mxu1 %v5246_v29  ;;  %v5247_v30 = vld [vmem:[%s6569_s4] sm:$0xff]  }
 0x77e   : > { %v1618_v12 = vadd.f32 %v4923_v50, %v5624_v32  ;;  %v1609_v47 = vpop.f32.mrb[19].mxu0  ;;  %v1623_v6 = vmax.f32 %v1615_v4, 0.0  ;;  %4930 = vmatprep.subr.bf16.mxu0 %v5247_v30 }
 0x77f   : > { %v1610_v51 = vadd.f32 %v1609_v47, %v5630_v37  ;;  %v1621_v48 = vmax.f32 %v1607_v11, 0.0  ;;  %4931 = vmatpush3.bf16.msra.mxu0 %v5247_v30 }
 0x780   : > { %v1624_v14 = vmax.f32 %v1618_v12, 0.0  ;;  %5160 = vmatprep.subr.bf16.mxu0 %v5330_v16 }
 0x781   : > { %v1622_v15 = vmax.f32 %v1610_v51, 0.0 }
 0x782   : > { %v1626_v18 = vpack.c.bf16 %v1624_v14, %v1623_v6 }
 0x783   : > { %v1625_v26 = vpack.c.bf16 %v1622_v15, %v1621_v48 }
 0x785   : > { %4926 = vmatprep.mubr.msk.bf16.mxu1 %vm1028_vm7, %v1625_v26 }
 0x786   : > { %4927 = vmatmul.mubr.msk.bf16.vlgmr.msra.gmra.mrb[28].mxu1 %vm1028_vm7, %v1626_v18 }
 0x787   : > { %4937 = vmatpush3.bf16.msra.mxu1 %v5246_v29 }
 0x859   : > { %v4928_v32 = vpop.f32.mrb[28].mxu1 }
 0x85a   : > { %v1676_v37 = vadd.f32 %v4928_v32, %v5726_v9  ;;  %v1667_v58 = vpop.f32.mrb[29].mxu1 }
 0x85b   : > { %v1668_v22 = vadd.f32 %v1667_v58, %v5726_v9  ;;  %v4929_v21 = vpop.f32.mrb[30].mxu1 }
 0x85c   : > { %v1684_v38 = vmax.f32 %v1676_v37, 0.0  ;;  %v1679_v25 = vadd.f32 %v4929_v21, %v5726_v9  ;;  %v1670_v39 = vpop.f32.mrb[31].mxu1 }
 0x85d   : > { %v1682_v27 = vmax.f32 %v1668_v22, 0.0  ;;  %v1671_v28 = vadd.f32 %v1670_v39, %v5726_v9 }
 0x85e   : > { %v1688_v45 = vmax.f32 %v1490_v0, %v1684_v38  ;;  %v1685_v33 = vmax.f32 %v1679_v25, 0.0 }
 0x85f   : > { %v1686_v54 = vmax.f32 %v1488_v3, %v1682_v27  ;;  %v1683_v34 = vmax.f32 %v1671_v28, 0.0 }
 0x860   : > { %v1689_v42 = vmax.f32 %v1491_v5, %v1685_v33 }
 0x861   : > { %v1687_v61 = vmax.f32 %v1489_v31, %v1683_v34 }
 0x862   : > { %v5794_v19 = vpack.c.bf16 %v1689_v42, %v1688_v45 }
 0x863   : > { %v5796_v13 = vpack.c.bf16 %v1687_v61, %v1686_v54 }
 0x864   : > { %v1694_v40 = vunpack.c.l.bf16 %v5794_v19  ;;  %v1695_v49 = vunpack.c.h.bf16 %v5794_v19  ;;  %v1712_v56 = vsel %vm1028_vm7, %v5794_v19, 0 }
 0x865   : > { %4932 = vmatprep.mubr.msk.bf16.mxu0 %vm1028_vm7, %v5796_v13  ;;  %4938 = vmatprep.mubr.msk.bf16.mxu1 %vm1028_vm7, %v5796_v13  ;;  %v1709_v52 = vsel %vm1028_vm7, %v5796_v13, 0  ;;  %v1692_v9 = vunpack.c.l.bf16 %v5796_v13  ;;  %v1693_v44 = vunpack.c.h.bf16 %v5796_v13 }
 0x866   : > { %5195 = vmatprep.subr.msk.bf16.mxu1 %vm1028_vm7, %v5796_v13  ;;  %4933 = vmatmul.mubr.msk.bf16.vlgmr.msra.gmra.mrb[20].mxu0 %vm1028_vm7, %v5794_v19  ;;  %v1834_v2 = vmul.f32 %v1694_v40, %v1694_v40  ;;  %v1835_v53 = vmul.f32 %v1695_v49, %v1695_v49 }
 0x867   : > { %4939 = vmatmul.mubr.msk.bf16.vlgmr.msra.gmra.mrb[32].mxu1 %vm1028_vm7, %v5794_v19  ;;  %v1832_v43 = vmul.f32 %v1692_v9, %v1692_v9  ;;  %v1833_v35 = vmul.f32 %v1693_v44, %v1693_v44  ;;  %4950 = vmatprep.mubr.msk.f32.mxu0 %vm5331_vm3, %v5332_v17 }
 0x868   : > { %4954 = vmatpush3.bf16.xpose.msra.mxu1 %v1709_v52  ;;  %4957 = vmatprep.mubr.msk.bf16.mxu1 %vm1028_vm7, %v5796_v13  ;;  %v5165_v57 = vpack.c.bf16 %v1835_v53, %v1834_v2 }
 0x869   : > { %5196 = vmatprep.subr.msk.bf16.mxu1 %vm1028_vm7, %v5794_v19  ;;  %v5161_v41 = vpack.c.bf16 %v1833_v35, %v1832_v43 }
 0x86b   : > { %5163 = vmatpush3.bf16.xpose.msk.msra.mxu0 %vm5818_vm0, %v5161_v41 }
 0x86c   : > { %5164 = vmatprep.subr.bf16.mxu0 %v5330_v16 }
 0x870   : > { %4956 = vmatpush3.bf16.xpose.msra.mxu1 %v1712_v56 }
 0x873   : > { %5167 = vmatpush3.bf16.xpose.msk.msra.mxu0 %vm5818_vm0, %v5165_v57 }
 0x877   : > { %4958 = vmatmul.mubr.msk.bf16.vlgmr.msra.gmra.mrb[36].mxu1 %vm1028_vm7, %v5794_v19 }
 0x87a   : > { %4951 = vmatmul.mubr.msk.f32.vlgmr.msra.gmra.mrb[6].mxu0 %vm1028_vm7, %v5333_v36 }
 0x939   : > { %v5837_v59 = vpop.f32.mrb[20].mxu0 }
 0x93a   : > { %v5839_v60 = vpop.f32.mrb[32].mxu1  ;;  %v5841_v62 = vpop.f32.mrb[21].mxu0 }
 0x93b   : > { %v1820_v23 = vsub.f32 %v5837_v59, %v5839_v60  ;;  %v5845_v24 = vpop.f32.mrb[33].mxu1  ;;  %v5847_v63 = vpop.f32.mrb[22].mxu0 }
 0x93c   : > { %v1818_v0 = vsub.f32 %v5841_v62, %v5845_v24  ;;  %v5851_v1 = vpop.f32.mrb[34].mxu1  ;;  %v5853_v3 = vpop.f32.mrb[23].mxu0 }
 0x93d   : > { %v1821_v20 = vsub.f32 %v5847_v63, %v5851_v1  ;;  %v5859_v5 = vpack.c.bf16 %v5851_v1, %v5839_v60  ;;  %v5861_v31 = vpop.f32.mrb[35].mxu1 }
 0x93e   : > { %v1819_v8 = vsub.f32 %v5853_v3, %v5861_v31  ;;  %v5867_v4 = vpack.c.bf16 %v5861_v31, %v5845_v24 }
 0x940   : > { %4961 = vmatprep.subr.bf16.mxu0 %v5867_v4 }
 0x941   : > { %4962 = vmatpush3.bf16.msra.mxu0 %v5867_v4 }
 0x942   : > { %4963 = vmatprep.subr.bf16.mxu0 %v5859_v5 }
 0x945   : > { %4964 = vmatpush3.bf16.msra.mxu0 %v5859_v5 }
 0x946   : > { %4975 = vmatprep.subr.bf16.mxu0 %v5867_v4 }
 0x94a   : > { %v4959_v10 = vpop.f32.mrb[36].mxu1 }
 0x94b   : > { %v1954_v11 = vpop.f32.mrb[37].mxu1  ;;  %v1971_v12 = vmul.f32 2.0, %v4959_v10 }
 0x94c   : > { %v4960_v50 = vpop.f32.mrb[38].mxu1  ;;  %v1969_v6 = vmul.f32 2.0, %v1954_v11 }
 0x94d   : > { %v1957_v47 = vpop.f32.mrb[39].mxu1  ;;  %v1916_v51 = vpop.f32.mrb[6].mxu0  ;;  %v1972_v14 = vmul.f32 2.0, %v4960_v50 }
 0x94e   : > { %v1970_v48 = vmul.f32 2.0, %v1957_v47  ;;  %v1976_v15 = vrot.slane %v1916_v51, %v5540_v55  ;;  %v4952_v18 = vpop.f32.mrb[7].mxu0 }
 0x950   : > { %v1977_v26 = vsub.f32 %v1976_v15, %v1969_v6  ;;  %v1978_v29 = vsub.f32 %v1976_v15, %v1970_v48  ;;  %v1979_v30 = vsub.f32 %v1976_v15, %v1971_v12  ;;  %v1980_v32 = vsub.f32 %v1976_v15, %v1972_v14 }
 0x952   : > { %v1989_v37 = vsub.s32 2147483648, %v1977_v26  ;;  %v1990_v58 = vsub.s32 2147483648, %v1978_v29  ;;  %v1991_v22 = vsub.s32 2147483648, %v1979_v30  ;;  %v1992_v21 = vsub.s32 2147483648, %v1980_v32 }
 0x953   : > { %vm1986_vm1 = vcmp.ge.s32.totalorder %v1978_v29, 0  ;;  %vm1985_vm2 = vcmp.ge.s32.totalorder %v1977_v26, 0  ;;  %vm1988_vm4 = vcmp.ge.s32.totalorder %v1980_v32, 0  ;;  %vm1987_vm5 = vcmp.ge.s32.totalorder %v1979_v30, 0 }
 0x954   : > { %v1994_v38 = vsel %vm1986_vm1, %v1978_v29, %v1990_v58  ;;  %v1993_v25 = vsel %vm1985_vm2, %v1977_v26, %v1989_v37  ;;  %v1996_v39 = vsel %vm1988_vm4, %v1980_v32, %v1992_v21  ;;  %v1995_v27 = vsel %vm1987_vm5, %v1979_v30, %v1991_v22 }
 0x955   : > { %v1998_v28 = vand.u32 4294967264, %v1994_v38  ;;  %v1997_v45 = vand.u32 4294967264, %v1993_v25  ;;  %v2000_v33 = vand.u32 4294967264, %v1996_v39  ;;  %v1999_v54 = vand.u32 4294967264, %v1995_v27 }
 0x957   : > { %v5876_v34 = vor.u32 %v1998_v28, %v5543_v7  ;;  %v5879_v42 = vor.u32 %v1997_v45, %v5543_v7  ;;  %v5882_v61 = vor.u32 %v2000_v33, %v5543_v7  ;;  %v5885_v52 = vor.u32 %v1999_v54, %v5543_v7 }
 0x959   : > { %v2020_v9 = vsel %vm874_vm9, %v5876_v34, 2147483647  ;;  %v2005_v44 = vsel %vm874_vm9, %v5879_v42, 2147483647  ;;  %v2050_v43 = vsel %vm874_vm9, %v5882_v61, 2147483647 }
 0x95a   : > { %v2022_v35 = vshra.s32 %v2020_v9, 16  ;;  %v2007_v41 = vshra.s32 %v2005_v44, 16  ;;  %v2035_v40 = vsel %vm874_vm9, %v5885_v52, 2147483647  ;;  %v2052_v53 = vshra.s32 %v2050_v43, 16 }
 0x95b   : > { %v2037_v56 = vshra.s32 %v2035_v40, 16  ;;  %v2021_v11 = vand.u32 65535, %v2020_v9  ;;  %v2006_v50 = vand.u32 65535, %v2005_v44  ;;  %v2051_v14 = vand.u32 65535, %v2050_v43 }
 0x95c   : > { %v2024_v49 = vcvt.s32.f32 %v2022_v35  ;;  %v2009_v2 = vcvt.s32.f32 %v2007_v41  ;;  %v2054_v57 = vcvt.s32.f32 %v2052_v53  ;;  %v2036_v48 = vand.u32 65535, %v2035_v40 }
 0x95d   : > { %v2039_v10 = vcvt.s32.f32 %v2037_v56  ;;  %v2023_v51 = vcvt.s32.f32 %v2021_v11  ;;  %v2008_v6 = vcvt.s32.f32 %v2006_v50  ;;  %v2053_v30 = vcvt.s32.f32 %v2051_v14 }
 0x95e   : > { %2025 = vmin.xlane.f32.xlu1 %v2024_v49  ;;  %2010 = vmin.xlane.f32.xlu0 %v2009_v2  ;;  %v2038_v32 = vcvt.s32.f32 %v2036_v48 }
 0x962   : > { %2055 = vmin.xlane.f32.xlu1 %v2054_v57  ;;  %2040 = vmin.xlane.f32.xlu0 %v2039_v10 }
 0x9eb   : > { %v2026_v12 = vpop.xlane.xlu1 %2025  ;;  %v2011_v47 = vpop.xlane.xlu0 %2010 }
 0x9ec   : > { %vm2027_vm6 = vcmp.eq.f32.partialorder %v2024_v49, %v2026_v12  ;;  %vm2012_vm8 = vcmp.eq.f32.partialorder %v2009_v2, %v2011_v47  ;;  %v2032_v22 = vcvt.f32.s32 %v2026_v12  ;;  %v2017_v21 = vcvt.f32.s32 %v2011_v47 }
 0x9ed   : > { %v2028_v15 = vsel %vm2027_vm6, %v2023_v51, inf  ;;  %v2013_v18 = vsel %vm2012_vm8, %v2008_v6, inf }
 0x9ee   : > { %2029 = vmin.xlane.f32.xlu1 %v2028_v15  ;;  %2014 = vmin.xlane.f32.xlu0 %v2013_v18  ;;  %v2033_v28 = vshll.u32 %v2032_v22, 16  ;;  %v2018_v45 = vshll.u32 %v2017_v21, 16 }
 0x9ef   : > { %v2056_v26 = vpop.xlane.xlu1 %2055  ;;  %v2041_v29 = vpop.xlane.xlu0 %2040 }
 0x9f0   : > { %vm2057_vm10 = vcmp.eq.f32.partialorder %v2054_v57, %v2056_v26  ;;  %vm2042_vm11 = vcmp.eq.f32.partialorder %v2039_v10, %v2041_v29  ;;  %v2062_v38 = vcvt.f32.s32 %v2056_v26  ;;  %v2047_v25 = vcvt.f32.s32 %v2041_v29 }
 0x9f1   : > { %v2058_v37 = vsel %vm2057_vm10, %v2053_v30, inf  ;;  %v2043_v58 = vsel %vm2042_vm11, %v2038_v32, inf }
 0x9f2   : > { %2059 = vmin.xlane.f32.xlu1 %v2058_v37  ;;  %2044 = vmin.xlane.f32.xlu0 %v2043_v58  ;;  %v2063_v43 = vshll.u32 %v2062_v38, 16  ;;  %v2048_v35 = vshll.u32 %v2047_v25, 16 }
 0xa7b   : > { %v2030_v39 = vpop.xlane.xlu1 %2029  ;;  %v2015_v27 = vpop.xlane.xlu0 %2014 }
 0xa7c   : > { %v2031_v33 = vcvt.f32.s32 %v2030_v39  ;;  %v2016_v54 = vcvt.f32.s32 %v2015_v27 }
 0xa7e   : > { %v2034_v9 = vadd.s32 %v2033_v28, %v2031_v33  ;;  %v2019_v44 = vadd.s32 %v2018_v45, %v2016_v54 }
 0xa7f   : > { %v2060_v41 = vpop.xlane.xlu1 %2059  ;;  %v2045_v40 = vpop.xlane.xlu0 %2044 }
 0xa80   : > { %vm2066_vm12 = vcmp.eq.s32.totalorder %v5876_v34, %v2034_v9  ;;  %vm2065_vm13 = vcmp.eq.s32.totalorder %v5879_v42, %v2019_v44  ;;  %v2061_v49 = vcvt.f32.s32 %v2060_v41  ;;  %v2046_v2 = vcvt.f32.s32 %v2045_v40 }
 0xa81   : > { %v4577_v53 = vsel %vm2066_vm12, 1.0, %v5332_v17  ;;  %v4576_v56 = vsel %vm2065_vm13, 1.0, %v5332_v17  ;;  %v5900_v57 = vsel %vm2066_vm12, 2147483647, %v5876_v34  ;;  %v5903_v10 = vsel %vm2065_vm13, 2147483647, %v5879_v42 }
 0xa82   : > { %v2081_v11 = vpack.c.bf16 %v4577_v53, %v4576_v56  ;;  %v2064_v50 = vadd.s32 %v2063_v43, %v2061_v49  ;;  %v2049_v12 = vadd.s32 %v2048_v35, %v2046_v2  ;;  %v2232_v47 = vsel %vm874_vm9, %v5900_v57, 2147483647  ;;  %v1700_v2 = vld [vmem:[%s6569_s4 + $0x10] sm:$0x1] }
 0xa83   : > { %v2234_v51 = vshra.s32 %v2232_v47, 16  ;;  %v2217_v6 = vsel %vm874_vm9, %v5903_v10, 2147483647  ;;  %v2233_v21 = vand.u32 65535, %v2232_v47  ;;  %v1701_v53 = vunpack.c.l.bf16 %v1700_v2 }
 0xa84   : > { %vm2068_vm14 = vcmp.eq.s32.totalorder %v5882_v61, %v2064_v50  ;;  %vm2067_vm15 = vcmp.eq.s32.totalorder %v5885_v52, %v2049_v12  ;;  %4965 = vmatprep.mubr.msk.bf16.mxu0 %vm874_vm9, %v2081_v11  ;;  %v2219_v34 = vshra.s32 %v2217_v6, 16  ;;  %v2218_v38 = vand.u32 65535, %v2217_v6 }
 0xa85   : > { %v4579_v42 = vsel %vm2068_vm14, 1.0, %v5332_v17  ;;  %v4578_v14 = vsel %vm2067_vm15, 1.0, %v5332_v17  ;;  %v2236_v48 = vcvt.s32.f32 %v2234_v51  ;;  %v5915_v15 = vsel %vm2068_vm14, 2147483647, %v5882_v61 }
 0xa86   : > { %v2082_v18 = vpack.c.bf16 %v4579_v42, %v4578_v14  ;;  %v2221_v26 = vcvt.s32.f32 %v2219_v34  ;;  %v2262_v29 = vsel %vm874_vm9, %v5915_v15, 2147483647  ;;  %v5920_v30 = vsel %vm2067_vm15, 2147483647, %v5885_v52  ;;  %v5932_v52 = vld [vmem:[%s6570_s5] sm:$0xff]  }
 0xa87   : > { %2237 = vmin.xlane.f32.xlu1 %v2236_v48  ;;  %v2264_v32 = vshra.s32 %v2262_v29, 16  ;;  %v2247_v37 = vsel %vm874_vm9, %v5920_v30, 2147483647  ;;  %4969 = vmatprep.subr.bf16.mxu1 %v5932_v52  ;;  %v2235_v39 = vcvt.s32.f32 %v2233_v21  ;;  %v2263_v27 = vand.u32 65535, %v2262_v29 }
 0xa88   : > { %2222 = vmin.xlane.f32.xlu0 %v2221_v26  ;;  %4966 = vmatmul.mubr.msk.bf16.vlgmr.msra.gmra.mrb[24].mxu0 %vm874_vm9, %v2082_v18  ;;  %v2249_v58 = vshra.s32 %v2247_v37, 16  ;;  %v2220_v45 = vcvt.s32.f32 %v2218_v38  ;;  %v2248_v33 = vand.u32 65535, %v2247_v37  ;;  %v1825_v56 = vrot.slane %v1701_v53, %v5540_v55 }
 0xa89   : > { %4976 = vmatpush3.bf16.msra.mxu0 %v5867_v4  ;;  %v2266_v61 = vcvt.s32.f32 %v2264_v32  ;;  %4970 = vmatpush3.bf16.msra.mxu1 %v5932_v52  ;;  %v2265_v43 = vcvt.s32.f32 %v2263_v27 }
 0xa8a   : > { %4977 = vmatprep.subr.bf16.mxu0 %v5859_v5  ;;  %v2251_v22 = vcvt.s32.f32 %v2249_v58  ;;  %4983 = vmatprep.subr.bf16.mxu1 %v5932_v52  ;;  %v2250_v41 = vcvt.s32.f32 %v2248_v33  ;;  %v5944_v11 = vadd.f32 %v1825_v56, %v1820_v23  ;;  %v5949_v50 = vadd.f32 %v1825_v56, %v1818_v0 }
 0xa8b   : > { %2267 = vmin.xlane.f32.xlu1 %v2266_v61  ;;  %v5954_v47 = vadd.f32 %v1825_v56, %v1821_v20  ;;  %v5960_v59 = vadd.f32 %v1825_v56, %v1819_v8 }
 0xa8c   : > { %2252 = vmin.xlane.f32.xlu0 %v2251_v22 }
 0xa8d   : > { %4978 = vmatpush3.bf16.msra.mxu0 %v5859_v5 }
 0xa8e   : > { %4989 = vmatprep.subr.bf16.mxu0 %v5867_v4 }
 0xb14   : > { %v2238_v25 = vpop.xlane.xlu1 %2237 }
 0xb15   : > { %v2223_v28 = vpop.xlane.xlu0 %2222  ;;  %vm2239_vm1 = vcmp.eq.f32.partialorder %v2236_v48, %v2238_v25  ;;  %v2244_v3 = vcvt.f32.s32 %v2238_v25 }
 0xb16   : > { %v2240_v54 = vsel %vm2239_vm1, %v2235_v39, inf  ;;  %vm2224_vm2 = vcmp.eq.f32.partialorder %v2221_v26, %v2223_v28  ;;  %v2229_v31 = vcvt.f32.s32 %v2223_v28 }
 0xb17   : > { %2241 = vmin.xlane.f32.xlu1 %v2240_v54  ;;  %v2225_v9 = vsel %vm2224_vm2, %v2220_v45, inf  ;;  %v2245_v48 = vshll.u32 %v2244_v3, 16 }
 0xb18   : > { %2226 = vmin.xlane.f32.xlu0 %v2225_v9  ;;  %v2268_v44 = vpop.xlane.xlu1 %2267  ;;  %v2230_v37 = vshll.u32 %v2229_v31, 16 }
 0xb19   : > { %v2253_v35 = vpop.xlane.xlu0 %2252  ;;  %vm2269_vm4 = vcmp.eq.f32.partialorder %v2266_v61, %v2268_v44  ;;  %v2274_v18 = vcvt.f32.s32 %v2268_v44 }
 0xb1a   : > { %v2270_v40 = vsel %vm2269_vm4, %v2265_v43, inf  ;;  %vm2254_vm5 = vcmp.eq.f32.partialorder %v2251_v22, %v2253_v35  ;;  %v2259_v26 = vcvt.f32.s32 %v2253_v35 }
 0xb1b   : > { %2271 = vmin.xlane.f32.xlu1 %v2270_v40  ;;  %v2255_v49 = vsel %vm2254_vm5, %v2250_v41, inf  ;;  %v2275_v38 = vshll.u32 %v2274_v18, 16 }
 0xb1c   : > { %2256 = vmin.xlane.f32.xlu0 %v2255_v49  ;;  %v2260_v39 = vshll.u32 %v2259_v26, 16 }
 0xb5b   : > { %v4967_v12 = vpop.f32.mrb[24].mxu0 }
 0xb5c   : > { %v2132_v51 = vadd.f32 %v4967_v12, %v5944_v11  ;;  %v2123_v6 = vpop.f32.mrb[25].mxu0 }
 0xb5d   : > { %v2124_v60 = vadd.f32 %v2123_v6, %v5949_v50  ;;  %v4968_v23 = vpop.f32.mrb[26].mxu0 }
 0xb5e   : > { %v2135_v62 = vadd.f32 %v4968_v23, %v5954_v47  ;;  %v2126_v24 = vpop.f32.mrb[27].mxu0  ;;  %v2140_v34 = vmax.f32 %v2132_v51, 0.0 }
 0xb5f   : > { %v2127_v0 = vadd.f32 %v2126_v24, %v5960_v59  ;;  %v2138_v1 = vmax.f32 %v2124_v60, 0.0 }
 0xb60   : > { %v2141_v63 = vmax.f32 %v2135_v62, 0.0 }
 0xb61   : > { %v2139_v20 = vmax.f32 %v2127_v0, 0.0 }
 0xb62   : > { %v2143_v42 = vpack.c.bf16 %v2141_v63, %v2140_v34 }
 0xb63   : > { %v2142_v14 = vpack.c.bf16 %v2139_v20, %v2138_v1 }
 0xb65   : > { %4971 = vmatprep.mubr.msk.bf16.mxu1 %vm1028_vm7, %v2142_v14 }
 0xb66   : > { %4972 = vmatmul.mubr.msk.bf16.vlgmr.msra.gmra.mrb[40].mxu1 %vm1028_vm7, %v2143_v42 }
 0xb67   : > { %4984 = vmatpush3.bf16.msra.mxu1 %v5932_v52 }
 0xb68   : > { %4997 = vmatprep.subr.bf16.mxu1 %v5932_v52 }
 0xba4   : > { %v2242_v8 = vpop.xlane.xlu1 %2241 }
 0xba5   : > { %v2243_v29 = vcvt.f32.s32 %v2242_v8  ;;  %v2227_v32 = vpop.xlane.xlu0 %2226 }
 0xba6   : > { %v2228_v58 = vcvt.f32.s32 %v2227_v32 }
 0xba7   : > { %v2246_v61 = vadd.s32 %v2245_v48, %v2243_v29 }
 0xba8   : > { %v2231_v22 = vadd.s32 %v2230_v37, %v2228_v58  ;;  %v2272_v21 = vpop.xlane.xlu1 %2271 }
 0xba9   : > { %vm2278_vm6 = vcmp.eq.s32.totalorder %v5900_v57, %v2246_v61  ;;  %v2273_v27 = vcvt.f32.s32 %v2272_v21  ;;  %v2257_v45 = vpop.xlane.xlu0 %2256 }
 0xbaa   : > { %v4586_v25 = vsel %vm2278_vm6, 1.0, %v5332_v17  ;;  %vm2277_vm8 = vcmp.eq.s32.totalorder %v5903_v10, %v2231_v22  ;;  %v2258_v28 = vcvt.f32.s32 %v2257_v45  ;;  %v5973_v33 = vsel %vm2278_vm6, 2147483647, %v5900_v57 }
 0xbab   : > { %v4585_v54 = vsel %vm2277_vm8, 1.0, %v5332_v17  ;;  %v2276_v9 = vadd.s32 %v2275_v38, %v2273_v27  ;;  %v2434_v44 = vsel %vm874_vm9, %v5973_v33, 2147483647  ;;  %v5979_v43 = vsel %vm2277_vm8, 2147483647, %v5903_v10 }
 0xbac   : > { %v2293_v35 = vpack.c.bf16 %v4586_v25, %v4585_v54  ;;  %v2261_v41 = vadd.s32 %v2260_v39, %v2258_v28  ;;  %v2436_v40 = vshra.s32 %v2434_v44, 16  ;;  %v2419_v49 = vsel %vm874_vm9, %v5979_v43, 2147483647 }
 0xbad   : > { %vm2280_vm10 = vcmp.eq.s32.totalorder %v5915_v15, %v2276_v9  ;;  %v2421_v2 = vshra.s32 %v2419_v49, 16  ;;  %v2435_v34 = vand.u32 65535, %v2434_v44  ;;  %v2420_v1 = vand.u32 65535, %v2419_v49 }
 0xbae   : > { %v4588_v57 = vsel %vm2280_vm10, 1.0, %v5332_v17  ;;  %vm2279_vm11 = vcmp.eq.s32.totalorder %v5920_v30, %v2261_v41  ;;  %4979 = vmatprep.mubr.msk.bf16.mxu0 %vm874_vm9, %v2293_v35  ;;  %v2438_v53 = vcvt.s32.f32 %v2436_v40  ;;  %v5988_v56 = vsel %vm2280_vm10, 2147483647, %v5915_v15 }
 0xbaf   : > { %v4587_v10 = vsel %vm2279_vm11, 1.0, %v5332_v17  ;;  %v2423_v12 = vcvt.s32.f32 %v2421_v2  ;;  %v2464_v51 = vsel %vm874_vm9, %v5988_v56, 2147483647  ;;  %v5994_v6 = vsel %vm2279_vm11, 2147483647, %v5920_v30 }
 0xbb0   : > { %v2294_v60 = vpack.c.bf16 %v4588_v57, %v4587_v10  ;;  %2439 = vmin.xlane.f32.xlu1 %v2438_v53  ;;  %v2466_v23 = vshra.s32 %v2464_v51, 16  ;;  %v2449_v62 = vsel %vm874_vm9, %v5994_v6, 2147483647  ;;  %v2437_v3 = vcvt.s32.f32 %v2435_v34 }
 0xbb1   : > { %2424 = vmin.xlane.f32.xlu0 %v2423_v12  ;;  %v2451_v24 = vshra.s32 %v2449_v62, 16  ;;  %v2465_v31 = vand.u32 65535, %v2464_v51  ;;  %v2422_v48 = vcvt.s32.f32 %v2420_v1  ;;  %v2450_v18 = vand.u32 65535, %v2449_v62 }
 0xbb2   : > { %4980 = vmatmul.mubr.msk.bf16.vlgmr.msra.gmra.mrb[28].mxu0 %vm874_vm9, %v2294_v60  ;;  %v2468_v15 = vcvt.s32.f32 %v2466_v23 }
 0xbb3   : > { %4990 = vmatpush3.bf16.msra.mxu0 %v5867_v4  ;;  %v2453_v0 = vcvt.s32.f32 %v2451_v24  ;;  %v2467_v37 = vcvt.s32.f32 %v2465_v31  ;;  %v2452_v61 = vcvt.s32.f32 %v2450_v18 }
 0xbb4   : > { %4991 = vmatprep.subr.bf16.mxu0 %v5859_v5  ;;  %2469 = vmin.xlane.f32.xlu1 %v2468_v15 }
 0xbb5   : > { %2454 = vmin.xlane.f32.xlu0 %v2453_v0 }
 0xbb7   : > { %4992 = vmatpush3.bf16.msra.mxu0 %v5859_v5 }
 0xbb8   : > { %5003 = vmatprep.subr.bf16.mxu0 %v5867_v4 }
 0xc39   : > { %v6003_v30 = vpop.f32.mrb[40].mxu1 }
 0xc3a   : > { %v6005_v63 = vpop.f32.mrb[41].mxu1 }
 0xc3b   : > { %v6007_v20 = vpop.f32.mrb[42].mxu1 }
 0xc3c   : > { %v6009_v42 = vpop.f32.mrb[43].mxu1 }
 0xc3d   : > { %v2440_v14 = vpop.xlane.xlu1 %2439 }
 0xc3e   : > { %v2425_v8 = vpop.xlane.xlu0 %2424  ;;  %vm2441_vm12 = vcmp.eq.f32.partialorder %v2438_v53, %v2440_v14  ;;  %v2446_v57 = vcvt.f32.s32 %v2440_v14 }
 0xc3f   : > { %v2442_v26 = vsel %vm2441_vm12, %v2437_v3, inf  ;;  %vm2426_vm13 = vcmp.eq.f32.partialorder %v2423_v12, %v2425_v8  ;;  %v2431_v53 = vcvt.f32.s32 %v2425_v8 }
 0xc40   : > { %2443 = vmin.xlane.f32.xlu1 %v2442_v26  ;;  %v2427_v29 = vsel %vm2426_vm13, %v2422_v48, inf  ;;  %v2447_v12 = vshll.u32 %v2446_v57, 16 }
 0xc41   : > { %2428 = vmin.xlane.f32.xlu0 %v2427_v29  ;;  %v2470_v32 = vpop.xlane.xlu1 %2469  ;;  %v2432_v24 = vshll.u32 %v2431_v53, 16 }
 0xc42   : > { %v2455_v58 = vpop.xlane.xlu0 %2454  ;;  %vm2471_vm14 = vcmp.eq.f32.partialorder %v2468_v15, %v2470_v32  ;;  %v2476_v51 = vcvt.f32.s32 %v2470_v32 }
 0xc43   : > { %v2472_v22 = vsel %vm2471_vm14, %v2467_v37, inf  ;;  %vm2456_vm15 = vcmp.eq.f32.partialorder %v2453_v0, %v2455_v58  ;;  %v2461_v60 = vcvt.f32.s32 %v2455_v58 }
 0xc44   : > { %2473 = vmin.xlane.f32.xlu1 %v2472_v22  ;;  %v2457_v21 = vsel %vm2456_vm15, %v2452_v61, inf  ;;  %v2477_v3 = vshll.u32 %v2476_v51, 16 }
 0xc45   : > { %2458 = vmin.xlane.f32.xlu0 %v2457_v21  ;;  %v2462_v31 = vshll.u32 %v2461_v60, 16 }
 0xc85   : > { %v4981_v38 = vpop.f32.mrb[28].mxu0 }
 0xc86   : > { %v2344_v39 = vadd.f32 %v4981_v38, %v5944_v11  ;;  %v2335_v27 = vpop.f32.mrb[29].mxu0 }
 0xc87   : > { %v2336_v45 = vadd.f32 %v2335_v27, %v5949_v50  ;;  %v4982_v25 = vpop.f32.mrb[30].mxu0 }
 0xc88   : > { %v2347_v28 = vadd.f32 %v4982_v25, %v5954_v47  ;;  %v2338_v54 = vpop.f32.mrb[31].mxu0  ;;  %v2352_v44 = vmax.f32 %v2344_v39, 0.0 }
 0xc89   : > { %v2339_v9 = vadd.f32 %v2338_v54, %v5960_v59  ;;  %v2350_v41 = vmax.f32 %v2336_v45, 0.0 }
 0xc8a   : > { %v2353_v35 = vmax.f32 %v2347_v28, 0.0 }
 0xc8b   : > { %v2351_v40 = vmax.f32 %v2339_v9, 0.0 }
 0xc8c   : > { %v2355_v49 = vpack.c.bf16 %v2353_v35, %v2352_v44 }
 0xc8d   : > { %v2354_v2 = vpack.c.bf16 %v2351_v40, %v2350_v41 }
 0xc8f   : > { %4985 = vmatprep.mubr.msk.bf16.mxu1 %vm1028_vm7, %v2354_v2 }
 0xc90   : > { %4986 = vmatmul.mubr.msk.bf16.vlgmr.msra.gmra.mrb[44].mxu1 %vm1028_vm7, %v2355_v49 }
 0xc91   : > { %4998 = vmatpush3.bf16.msra.mxu1 %v5932_v52 }
 0xc92   : > { %5011 = vmatprep.subr.bf16.mxu1 %v5932_v52 }
 0xccd   : > { %v2444_v10 = vpop.xlane.xlu1 %2443 }
 0xcce   : > { %v2445_v23 = vcvt.f32.s32 %v2444_v10  ;;  %v2429_v62 = vpop.xlane.xlu0 %2428 }
 0xccf   : > { %v2430_v15 = vcvt.f32.s32 %v2429_v62 }
 0xcd0   : > { %v2448_v0 = vadd.s32 %v2447_v12, %v2445_v23 }
 0xcd1   : > { %v2433_v34 = vadd.s32 %v2432_v24, %v2430_v15  ;;  %v2474_v1 = vpop.xlane.xlu1 %2473 }
 0xcd2   : > { %vm2480_vm1 = vcmp.eq.s32.totalorder %v5973_v33, %v2448_v0  ;;  %v2475_v48 = vcvt.f32.s32 %v2474_v1  ;;  %v2459_v18 = vpop.xlane.xlu0 %2458 }
 0xcd3   : > { %v4594_v14 = vsel %vm2480_vm1, 1.0, %v5332_v17  ;;  %vm2479_vm2 = vcmp.eq.s32.totalorder %v5979_v43, %v2433_v34  ;;  %v2460_v8 = vcvt.f32.s32 %v2459_v18  ;;  %v6023_v26 = vsel %vm2480_vm1, 2147483647, %v5973_v33 }
 0xcd4   : > { %v4593_v29 = vsel %vm2479_vm2, 1.0, %v5332_v17  ;;  %v2478_v32 = vadd.s32 %v2477_v3, %v2475_v48  ;;  %v2636_v37 = vsel %vm874_vm9, %v6023_v26, 2147483647  ;;  %v6029_v58 = vsel %vm2479_vm2, 2147483647, %v5979_v43 }
 0xcd5   : > { %v2495_v61 = vpack.c.bf16 %v4594_v14, %v4593_v29  ;;  %v2463_v22 = vadd.s32 %v2462_v31, %v2460_v8  ;;  %v2638_v21 = vshra.s32 %v2636_v37, 16  ;;  %v2621_v38 = vsel %vm874_vm9, %v6029_v58, 2147483647 }
 0xcd6   : > { %vm2482_vm4 = vcmp.eq.s32.totalorder %v5988_v56, %v2478_v32  ;;  %v2623_v39 = vshra.s32 %v2621_v38, 16  ;;  %v2637_v10 = vand.u32 65535, %v2636_v37  ;;  %v2622_v23 = vand.u32 65535, %v2621_v38 }
 0xcd7   : > { %v4596_v33 = vsel %vm2482_vm4, 1.0, %v5332_v17  ;;  %vm2481_vm5 = vcmp.eq.s32.totalorder %v5994_v6, %v2463_v22  ;;  %4993 = vmatprep.mubr.msk.bf16.mxu0 %vm874_vm9, %v2495_v61  ;;  %v2640_v27 = vcvt.s32.f32 %v2638_v21  ;;  %v6038_v45 = vsel %vm2482_vm4, 2147483647, %v5988_v56 }
 0xcd8   : > { %v4595_v43 = vsel %vm2481_vm5, 1.0, %v5332_v17  ;;  %v2625_v25 = vcvt.s32.f32 %v2623_v39  ;;  %v2666_v28 = vsel %vm874_vm9, %v6038_v45, 2147483647  ;;  %v6044_v54 = vsel %vm2481_vm5, 2147483647, %v5994_v6 }
 0xcd9   : > { %v2496_v9 = vpack.c.bf16 %v4596_v33, %v4595_v43  ;;  %2641 = vmin.xlane.f32.xlu1 %v2640_v27  ;;  %v2668_v44 = vshra.s32 %v2666_v28, 16  ;;  %v2651_v35 = vsel %vm874_vm9, %v6044_v54, 2147483647  ;;  %v2146_v6 = vld [vmem:[%s6570_s5 + $0x8] sm:$0x1]  ;;  %v2639_v3 = vcvt.s32.f32 %v2637_v10 }
 0xcda   : > { %2626 = vmin.xlane.f32.xlu0 %v2625_v25  ;;  %v2653_v41 = vshra.s32 %v2651_v35, 16  ;;  %v2147_v49 = vunpack.c.l.bf16 %v2146_v6  ;;  %v2667_v31 = vand.u32 65535, %v2666_v28  ;;  %v2652_v8 = vand.u32 65535, %v2651_v35 }
 0xcdb   : > { %4994 = vmatmul.mubr.msk.bf16.vlgmr.msra.gmra.mrb[32].mxu0 %vm874_vm9, %v2496_v9  ;;  %v2670_v56 = vcvt.s32.f32 %v2668_v44  ;;  %v2624_v37 = vcvt.s32.f32 %v2622_v23 }
 0xcdc   : > { %5004 = vmatpush3.bf16.msra.mxu0 %v5867_v4  ;;  %v2655_v40 = vcvt.s32.f32 %v2653_v41  ;;  %v6056_v2 = vrot.slane %v2147_v49, %v5540_v55  ;;  %v2669_v43 = vcvt.s32.f32 %v2667_v31  ;;  %v2654_v9 = vcvt.s32.f32 %v2652_v8 }
 0xcdd   : > { %5005 = vmatprep.subr.bf16.mxu0 %v5859_v5  ;;  %2671 = vmin.xlane.f32.xlu1 %v2670_v56 }
 0xcde   : > { %2656 = vmin.xlane.f32.xlu0 %v2655_v40  ;;  %v2207_v57 = vadd.f32 %v6003_v30, %v6056_v2  ;;  %v2199_v4 = vadd.f32 %v6005_v63, %v6056_v2  ;;  %v2210_v53 = vadd.f32 %v6007_v20, %v6056_v2  ;;  %v2202_v15 = vadd.f32 %v6009_v42, %v6056_v2 }
 0xce0   : > { %5006 = vmatpush3.bf16.msra.mxu0 %v5859_v5  ;;  %v2215_v5 = vmax.f32 %v2207_v57, 0.0  ;;  %v2213_v62 = vmax.f32 %v2199_v4, 0.0  ;;  %v2216_v24 = vmax.f32 %v2210_v53, 0.0  ;;  %v2214_v61 = vmax.f32 %v2202_v15, 0.0 }
 0xd63   : > { %v4987_v12 = vpop.f32.mrb[44].mxu1 }
 0xd64   : > { %v2405_v51 = vadd.f32 %v4987_v12, %v6056_v2  ;;  %v2396_v60 = vpop.f32.mrb[45].mxu1 }
 0xd65   : > { %v2397_v30 = vadd.f32 %v2396_v60, %v6056_v2  ;;  %v4988_v0 = vpop.f32.mrb[46].mxu1 }
 0xd66   : > { %v2413_v34 = vmax.f32 %v2405_v51, 0.0  ;;  %v2408_v63 = vadd.f32 %v4988_v0, %v6056_v2  ;;  %v2399_v1 = vpop.f32.mrb[47].mxu1  ;;  %v2642_v20 = vpop.xlane.xlu1 %2641 }
 0xd67   : > { %v2411_v48 = vmax.f32 %v2397_v30, 0.0  ;;  %v2400_v18 = vadd.f32 %v2399_v1, %v6056_v2  ;;  %v2627_v14 = vpop.xlane.xlu0 %2626  ;;  %vm2643_vm6 = vcmp.eq.f32.partialorder %v2640_v27, %v2642_v20  ;;  %v2648_v23 = vcvt.f32.s32 %v2642_v20 }
 0xd68   : > { %v6070_v29 = vmax.f32 %v2215_v5, %v2413_v34  ;;  %v2414_v32 = vmax.f32 %v2408_v63, 0.0  ;;  %v2644_v42 = vsel %vm2643_vm6, %v2639_v3, inf  ;;  %vm2628_vm8 = vcmp.eq.f32.partialorder %v2625_v25, %v2627_v14 }
 0xd69   : > { %v6072_v22 = vmax.f32 %v2213_v62, %v2411_v48  ;;  %v2412_v21 = vmax.f32 %v2400_v18, 0.0  ;;  %2645 = vmin.xlane.f32.xlu1 %v2644_v42  ;;  %v2629_v39 = vsel %vm2628_vm8, %v2624_v37, inf  ;;  %v2633_v62 = vcvt.f32.s32 %v2627_v14 }
 0xd6a   : > { %v6074_v38 = vmax.f32 %v2216_v24, %v2414_v32  ;;  %v2672_v33 = vpop.xlane.xlu1 %2671  ;;  %2630 = vmin.xlane.f32.xlu0 %v2629_v39  ;;  %v2649_v15 = vshll.u32 %v2648_v23, 16 }
 0xd6b   : > { %v6076_v28 = vmax.f32 %v2214_v61, %v2412_v21  ;;  %v2657_v27 = vpop.xlane.xlu0 %2656  ;;  %vm2673_vm10 = vcmp.eq.f32.partialorder %v2670_v56, %v2672_v33  ;;  %v2678_v30 = vcvt.f32.s32 %v2672_v33  ;;  %v2634_v63 = vshll.u32 %v2633_v62, 16 }
 0xd6c   : > { %v2674_v44 = vsel %vm2673_vm10, %v2669_v43, inf  ;;  %vm2658_vm11 = vcmp.eq.f32.partialorder %v2655_v40, %v2657_v27  ;;  %v2663_v1 = vcvt.f32.s32 %v2657_v27 }
 0xd6d   : > { %2675 = vmin.xlane.f32.xlu1 %v2674_v44  ;;  %v2659_v35 = vsel %vm2658_vm11, %v2654_v9, inf  ;;  %v2679_v18 = vshll.u32 %v2678_v30, 16 }
 0xd6e   : > { %2660 = vmin.xlane.f32.xlu0 %v2659_v35  ;;  %v2664_v20 = vshll.u32 %v2663_v1, 16 }
 0xdae   : > { %v4995_v41 = vpop.f32.mrb[32].mxu0 }
 0xdaf   : > { %v2546_v6 = vadd.f32 %v4995_v41, %v5944_v11  ;;  %v2537_v25 = vpop.f32.mrb[33].mxu0 }
 0xdb0   : > { %v2538_v49 = vadd.f32 %v2537_v25, %v5949_v50  ;;  %v4996_v57 = vpop.f32.mrb[34].mxu0 }
 0xdb1   : > { %v2549_v4 = vadd.f32 %v4996_v57, %v5954_v47  ;;  %v2540_v53 = vpop.f32.mrb[35].mxu0  ;;  %v2554_v12 = vmax.f32 %v2546_v6, 0.0 }
 0xdb2   : > { %v2541_v10 = vadd.f32 %v2540_v53, %v5960_v59  ;;  %v2552_v5 = vmax.f32 %v2538_v49, 0.0 }
 0xdb3   : > { %v2555_v56 = vmax.f32 %v2549_v4, 0.0 }
 0xdb4   : > { %v2553_v51 = vmax.f32 %v2541_v10, 0.0 }
 0xdb5   : > { %v2557_v40 = vpack.c.bf16 %v2555_v56, %v2554_v12 }
 0xdb6   : > { %v2556_v60 = vpack.c.bf16 %v2553_v51, %v2552_v5 }
 0xdb8   : > { %4999 = vmatprep.mubr.msk.bf16.mxu1 %vm1028_vm7, %v2556_v60 }
 0xdb9   : > { %5000 = vmatmul.mubr.msk.bf16.vlgmr.msra.gmra.mrb[48].mxu1 %vm1028_vm7, %v2557_v40 }
 0xdba   : > { %5012 = vmatpush3.bf16.msra.mxu1 %v5932_v52 }
 0xdf6   : > { %v2646_v24 = vpop.xlane.xlu1 %2645 }
 0xdf7   : > { %v2647_v0 = vcvt.f32.s32 %v2646_v24  ;;  %v2631_v34 = vpop.xlane.xlu0 %2630 }
 0xdf8   : > { %v2632_v31 = vcvt.f32.s32 %v2631_v34 }
 0xdf9   : > { %v2650_v3 = vadd.s32 %v2649_v15, %v2647_v0 }
 0xdfa   : > { %v2676_v48 = vpop.xlane.xlu1 %2675  ;;  %v2635_v8 = vadd.s32 %v2634_v63, %v2632_v31 }
 0xdfb   : > { %vm2682_vm12 = vcmp.eq.s32.totalorder %v6023_v26, %v2650_v3  ;;  %v2677_v32 = vcvt.f32.s32 %v2676_v48  ;;  %v2661_v52 = vpop.xlane.xlu0 %2660 }
 0xdfc   : > { %v4602_v42 = vsel %vm2682_vm12, 1.0, %v5332_v17  ;;  %vm2681_vm13 = vcmp.eq.s32.totalorder %v6029_v58, %v2635_v8  ;;  %v2662_v37 = vcvt.f32.s32 %v2661_v52 }
 0xdfd   : > { %v2680_v14 = vadd.s32 %v2679_v18, %v2677_v32  ;;  %v4601_v61 = vsel %vm2681_vm13, 1.0, %v5332_v17 }
 0xdfe   : > { %v2693_v21 = vpack.c.bf16 %v4602_v42, %v4601_v61  ;;  %v2665_v39 = vadd.s32 %v2664_v20, %v2662_v37 }
 0xdff   : > { %vm2684_vm14 = vcmp.eq.s32.totalorder %v6038_v45, %v2680_v14 }
 0xe00   : > { %v4604_v33 = vsel %vm2684_vm14, 1.0, %v5332_v17  ;;  %vm2683_vm15 = vcmp.eq.s32.totalorder %v6044_v54, %v2665_v39  ;;  %5007 = vmatprep.mubr.msk.bf16.mxu0 %vm874_vm9, %v2693_v21 }
 0xe01   : > { %v4603_v26 = vsel %vm2683_vm15, 1.0, %v5332_v17 }
 0xe02   : > { %v2694_v43 = vpack.c.bf16 %v4604_v33, %v4603_v26 }
 0xe04   : > { %5008 = vmatmul.mubr.msk.bf16.vlgmr.msra.gmra.mrb[36].mxu0 %vm874_vm9, %v2694_v43 }
 0xe8c   : > { %v5001_v58 = vpop.f32.mrb[48].mxu1 }
 0xe8d   : > { %v2607_v27 = vadd.f32 %v5001_v58, %v6056_v2  ;;  %v2598_v9 = vpop.f32.mrb[49].mxu1 }
 0xe8e   : > { %v2599_v44 = vadd.f32 %v2598_v9, %v6056_v2  ;;  %v5002_v35 = vpop.f32.mrb[50].mxu1 }
 0xe8f   : > { %v2615_v45 = vmax.f32 %v2607_v27, 0.0  ;;  %v2610_v41 = vadd.f32 %v5002_v35, %v6056_v2  ;;  %v2601_v6 = vpop.f32.mrb[51].mxu1 }
 0xe90   : > { %v2613_v25 = vmax.f32 %v2599_v44, 0.0  ;;  %v2602_v54 = vadd.f32 %v2601_v6, %v6056_v2 }
 0xe91   : > { %v2619_v49 = vmax.f32 %v6070_v29, %v2615_v45  ;;  %v2616_v57 = vmax.f32 %v2610_v41, 0.0 }
 0xe92   : > { %v2617_v4 = vmax.f32 %v6072_v22, %v2613_v25  ;;  %v2614_v53 = vmax.f32 %v2602_v54, 0.0 }
 0xe93   : > { %v2620_v10 = vmax.f32 %v6074_v38, %v2616_v57 }
 0xe94   : > { %v2618_v12 = vmax.f32 %v6076_v28, %v2614_v53 }
 0xed7   : > { %v5009_v56 = vpop.f32.mrb[36].mxu0 }
 0xed8   : > { %v2744_v5 = vadd.f32 %v5009_v56, %v5944_v11  ;;  %v2735_v51 = vpop.f32.mrb[37].mxu0  ;;  %v5249_v11 = vld [vmem:[%s6571_s6 + $0x8] sm:$0xff]  }
 0xed9   : > { %v2736_v40 = vadd.f32 %v2735_v51, %v5949_v50  ;;  %v5010_v60 = vpop.f32.mrb[38].mxu0  ;;  %5023 = vmatprep.subr.bf16.mxu1 %v5249_v11  ;;  %v5250_v50 = vld [vmem:[%s6571_s6] sm:$0xff]  }
 0xeda   : > { %v2747_v23 = vadd.f32 %v5010_v60, %v5954_v47  ;;  %v2738_v62 = vpop.f32.mrb[39].mxu0  ;;  %v2752_v24 = vmax.f32 %v2744_v5, 0.0  ;;  %5017 = vmatprep.subr.bf16.mxu0 %v5250_v50 }
 0xedb   : > { %v2739_v29 = vadd.f32 %v2738_v62, %v5960_v59  ;;  %v2750_v22 = vmax.f32 %v2736_v40, 0.0  ;;  %5018 = vmatpush3.bf16.msra.mxu0 %v5250_v50 }
 0xedc   : > { %v2753_v15 = vmax.f32 %v2747_v23, 0.0  ;;  %5168 = vmatprep.subr.bf16.mxu0 %v5330_v16 }
 0xedd   : > { %v2751_v30 = vmax.f32 %v2739_v29, 0.0 }
 0xede   : > { %v2755_v0 = vpack.c.bf16 %v2753_v15, %v2752_v24 }
 0xedf   : > { %v2754_v38 = vpack.c.bf16 %v2751_v30, %v2750_v22 }
 0xee1   : > { %5013 = vmatprep.mubr.msk.bf16.mxu1 %vm1028_vm7, %v2754_v38 }
 0xee2   : > { %5014 = vmatmul.mubr.msk.bf16.vlgmr.msra.gmra.mrb[52].mxu1 %vm1028_vm7, %v2755_v0 }
 0xee3   : > { %5024 = vmatpush3.bf16.msra.mxu1 %v5249_v11 }
 0xfb5   : > { %v5015_v47 = vpop.f32.mrb[52].mxu1 }
 0xfb6   : > { %v2805_v59 = vadd.f32 %v5015_v47, %v6056_v2  ;;  %v2796_v28 = vpop.f32.mrb[53].mxu1 }
 0xfb7   : > { %v2797_v34 = vadd.f32 %v2796_v28, %v6056_v2  ;;  %v5016_v63 = vpop.f32.mrb[54].mxu1 }
 0xfb8   : > { %v2813_v1 = vmax.f32 %v2805_v59, 0.0  ;;  %v2808_v3 = vadd.f32 %v5016_v63, %v6056_v2  ;;  %v2799_v31 = vpop.f32.mrb[55].mxu1 }
 0xfb9   : > { %v2811_v48 = vmax.f32 %v2797_v34, 0.0  ;;  %v2800_v18 = vadd.f32 %v2799_v31, %v6056_v2 }
 0xfba   : > { %v2817_v8 = vmax.f32 %v2619_v49, %v2813_v1  ;;  %v2814_v32 = vmax.f32 %v2808_v3, 0.0 }
 0xfbb   : > { %v2815_v42 = vmax.f32 %v2617_v4, %v2811_v48  ;;  %v2812_v52 = vmax.f32 %v2800_v18, 0.0 }
 0xfbc   : > { %v2818_v20 = vmax.f32 %v2620_v10, %v2814_v32 }
 0xfbd   : > { %v2816_v14 = vmax.f32 %v2618_v12, %v2812_v52 }
 0xfbe   : > { %v6120_v37 = vpack.c.bf16 %v2818_v20, %v2817_v8 }
 0xfbf   : > { %v6122_v61 = vpack.c.bf16 %v2816_v14, %v2815_v42 }
 0xfc0   : > { %v2823_v58 = vunpack.c.l.bf16 %v6120_v37  ;;  %v2824_v27 = vunpack.c.h.bf16 %v6120_v37  ;;  %v2841_v35 = vsel %vm1028_vm7, %v6120_v37, 0 }
 0xfc1   : > { %5019 = vmatprep.mubr.msk.bf16.mxu0 %vm1028_vm7, %v6122_v61  ;;  %5025 = vmatprep.mubr.msk.bf16.mxu1 %vm1028_vm7, %v6122_v61  ;;  %v2838_v21 = vsel %vm1028_vm7, %v6122_v61, 0  ;;  %v2821_v2 = vunpack.c.l.bf16 %v6122_v61  ;;  %v2822_v39 = vunpack.c.h.bf16 %v6122_v61 }
 0xfc2   : > { %5197 = vmatprep.subr.msk.bf16.mxu1 %vm1028_vm7, %v6122_v61  ;;  %5020 = vmatmul.mubr.msk.bf16.vlgmr.msra.gmra.mrb[40].mxu0 %vm1028_vm7, %v6120_v37  ;;  %v2963_v9 = vmul.f32 %v2823_v58, %v2823_v58  ;;  %v2964_v44 = vmul.f32 %v2824_v27, %v2824_v27 }
 0xfc3   : > { %5026 = vmatmul.mubr.msk.bf16.vlgmr.msra.gmra.mrb[56].mxu1 %vm1028_vm7, %v6120_v37  ;;  %v2961_v33 = vmul.f32 %v2821_v2, %v2821_v2  ;;  %v2962_v26 = vmul.f32 %v2822_v39, %v2822_v39  ;;  %5037 = vmatprep.mubr.msk.f32.mxu0 %vm5331_vm3, %v5332_v17 }
 0xfc4   : > { %5041 = vmatpush3.bf16.xpose.msra.mxu1 %v2838_v21  ;;  %5044 = vmatprep.mubr.msk.bf16.mxu1 %vm1028_vm7, %v6122_v61  ;;  %v5173_v45 = vpack.c.bf16 %v2964_v44, %v2963_v9 }
 0xfc5   : > { %5198 = vmatprep.subr.msk.bf16.mxu1 %vm1028_vm7, %v6120_v37  ;;  %v5169_v43 = vpack.c.bf16 %v2962_v26, %v2961_v33 }
 0xfc7   : > { %5171 = vmatpush3.bf16.xpose.msk.msra.mxu0 %vm5818_vm0, %v5169_v43 }
 0xfc8   : > { %5172 = vmatprep.subr.bf16.mxu0 %v5330_v16 }
 0xfcc   : > { %5043 = vmatpush3.bf16.xpose.msra.mxu1 %v2841_v35 }
 0xfcf   : > { %5175 = vmatpush3.bf16.xpose.msk.msra.mxu0 %vm5818_vm0, %v5173_v45 }
 0xfd3   : > { %5045 = vmatmul.mubr.msk.bf16.vlgmr.msra.gmra.mrb[60].mxu1 %vm1028_vm7, %v6120_v37 }
 0xfd6   : > { %5038 = vmatmul.mubr.msk.f32.vlgmr.msra.gmra.mrb[44].mxu0 %vm1028_vm7, %v5333_v36 }
0x1095   : > { %v6157_v41 = vpop.f32.mrb[40].mxu0 }
0x1096   : > { %v6159_v6 = vpop.f32.mrb[56].mxu1  ;;  %v6161_v16 = vpop.f32.mrb[41].mxu0 }
0x1097   : > { %v2949_v25 = vsub.f32 %v6157_v41, %v6159_v6  ;;  %v6165_v54 = vpop.f32.mrb[57].mxu1  ;;  %v6167_v49 = vpop.f32.mrb[42].mxu0 }
0x1098   : > { %v2947_v46 = vsub.f32 %v6161_v16, %v6165_v54  ;;  %v6171_v57 = vpop.f32.mrb[58].mxu1  ;;  %v6173_v4 = vpop.f32.mrb[43].mxu0 }
0x1099   : > { %v2950_v36 = vsub.f32 %v6167_v49, %v6171_v57  ;;  %v6179_v53 = vpack.c.bf16 %v6171_v57, %v6159_v6  ;;  %v6181_v10 = vpop.f32.mrb[59].mxu1 }
0x109a   : > { %v2948_v12 = vsub.f32 %v6173_v4, %v6181_v10  ;;  %v6187_v56 = vpack.c.bf16 %v6181_v10, %v6165_v54 }
0x109c   : > { %5048 = vmatprep.subr.bf16.mxu0 %v6187_v56  ;;  %5056 = vmatprep.subr.bf16.mxu1 %v6187_v56 }
0x109d   : > { %5049 = vmatpush3.bf16.msra.mxu0 %v6187_v56  ;;  %5057 = vmatpush3.bf16.msra.mxu1 %v6187_v56 }
0x109e   : > { %5050 = vmatprep.subr.bf16.mxu0 %v6179_v53  ;;  %5058 = vmatprep.subr.bf16.mxu1 %v6179_v53 }
0x10a1   : > { %5051 = vmatpush3.bf16.msra.mxu0 %v6179_v53  ;;  %5059 = vmatpush3.bf16.msra.mxu1 %v6179_v53 }
0x10a2   : > { %5064 = vmatprep.subr.bf16.mxu0 %v6187_v56  ;;  %5072 = vmatprep.subr.bf16.mxu1 %v6187_v56 }
0x10a6   : > { %v5046_v5 = vpop.f32.mrb[60].mxu1 }
0x10a7   : > { %v3081_v51 = vpop.f32.mrb[61].mxu1  ;;  %v3098_v60 = vmul.f32 2.0, %v5046_v5 }
0x10a8   : > { %v5047_v40 = vpop.f32.mrb[62].mxu1  ;;  %v3096_v29 = vmul.f32 2.0, %v3081_v51 }
0x10a9   : > { %v3084_v23 = vpop.f32.mrb[63].mxu1  ;;  %v3043_v62 = vpop.f32.mrb[44].mxu0  ;;  %v3099_v24 = vmul.f32 2.0, %v5047_v40 }
0x10aa   : > { %v3097_v15 = vmul.f32 2.0, %v3084_v23  ;;  %v3103_v22 = vrot.slane %v3043_v62, %v5540_v55  ;;  %v5039_v30 = vpop.f32.mrb[45].mxu0 }
0x10ac   : > { %v3104_v0 = vsub.f32 %v3103_v22, %v3096_v29  ;;  %v3105_v38 = vsub.f32 %v3103_v22, %v3097_v15  ;;  %v3106_v11 = vsub.f32 %v3103_v22, %v3098_v60  ;;  %v3107_v50 = vsub.f32 %v3103_v22, %v3099_v24 }
0x10ae   : > { %v3116_v47 = vsub.s32 2147483648, %v3104_v0  ;;  %v3117_v59 = vsub.s32 2147483648, %v3105_v38  ;;  %v3118_v28 = vsub.s32 2147483648, %v3106_v11  ;;  %v3119_v34 = vsub.s32 2147483648, %v3107_v50 }
0x10af   : > { %vm3113_vm0 = vcmp.ge.s32.totalorder %v3105_v38, 0  ;;  %vm3112_vm1 = vcmp.ge.s32.totalorder %v3104_v0, 0  ;;  %vm3115_vm2 = vcmp.ge.s32.totalorder %v3107_v50, 0  ;;  %vm3114_vm4 = vcmp.ge.s32.totalorder %v3106_v11, 0 }
0x10b0   : > { %v3121_v63 = vsel %vm3113_vm0, %v3105_v38, %v3117_v59  ;;  %v3120_v1 = vsel %vm3112_vm1, %v3104_v0, %v3116_v47  ;;  %v3123_v3 = vsel %vm3115_vm2, %v3107_v50, %v3119_v34  ;;  %v3122_v31 = vsel %vm3114_vm4, %v3106_v11, %v3118_v28 }
0x10b1   : > { %v3125_v48 = vand.u32 4294967264, %v3121_v63  ;;  %v3124_v18 = vand.u32 4294967264, %v3120_v1  ;;  %v3127_v8 = vand.u32 4294967264, %v3123_v3  ;;  %v3126_v32 = vand.u32 4294967264, %v3122_v31 }
0x10b3   : > { %v6201_v42 = vor.u32 %v3125_v48, %v5543_v7  ;;  %v6204_v52 = vor.u32 %v3124_v18, %v5543_v7  ;;  %v6207_v20 = vor.u32 %v3127_v8, %v5543_v7  ;;  %v6210_v14 = vor.u32 %v3126_v32, %v5543_v7 }
0x10b5   : > { %v3147_v21 = vsel %vm874_vm9, %v6201_v42, 2147483647  ;;  %v3132_v2 = vsel %vm874_vm9, %v6204_v52, 2147483647  ;;  %v3177_v39 = vsel %vm874_vm9, %v6207_v20, 2147483647 }
0x10b6   : > { %v3149_v33 = vshra.s32 %v3147_v21, 16  ;;  %v3134_v26 = vshra.s32 %v3132_v2, 16  ;;  %v3162_v43 = vsel %vm874_vm9, %v6210_v14, 2147483647  ;;  %v3179_v9 = vshra.s32 %v3177_v39, 16 }
0x10b7   : > { %v3164_v44 = vshra.s32 %v3162_v43, 16  ;;  %v3148_v45 = vand.u32 65535, %v3147_v21  ;;  %v3133_v5 = vand.u32 65535, %v3132_v2  ;;  %v3178_v62 = vand.u32 65535, %v3177_v39 }
0x10b8   : > { %v3151_v58 = vcvt.s32.f32 %v3149_v33  ;;  %v3136_v27 = vcvt.s32.f32 %v3134_v26  ;;  %v3181_v7 = vcvt.s32.f32 %v3179_v9  ;;  %v3163_v29 = vand.u32 65535, %v3162_v43 }
0x10b9   : > { %v3166_v35 = vcvt.s32.f32 %v3164_v44  ;;  %v3150_v60 = vcvt.s32.f32 %v3148_v45  ;;  %v3135_v23 = vcvt.s32.f32 %v3133_v5  ;;  %v3180_v0 = vcvt.s32.f32 %v3178_v62 }
0x10ba   : > { %3152 = vmin.xlane.f32.xlu1 %v3151_v58  ;;  %3137 = vmin.xlane.f32.xlu0 %v3136_v27  ;;  %v3165_v38 = vcvt.s32.f32 %v3163_v29 }
0x10be   : > { %3182 = vmin.xlane.f32.xlu1 %v3181_v7  ;;  %3167 = vmin.xlane.f32.xlu0 %v3166_v35 }
0x1147   : > { %v3153_v51 = vpop.xlane.xlu1 %3152  ;;  %v3138_v40 = vpop.xlane.xlu0 %3137 }
0x1148   : > { %vm3154_vm5 = vcmp.eq.f32.partialorder %v3151_v58, %v3153_v51  ;;  %vm3139_vm6 = vcmp.eq.f32.partialorder %v3136_v27, %v3138_v40  ;;  %v3159_v47 = vcvt.f32.s32 %v3153_v51  ;;  %v3144_v59 = vcvt.f32.s32 %v3138_v40 }
0x1149   : > { %v3155_v24 = vsel %vm3154_vm5, %v3150_v60, inf  ;;  %v3140_v15 = vsel %vm3139_vm6, %v3135_v23, inf }
0x114a   : > { %3156 = vmin.xlane.f32.xlu1 %v3155_v24  ;;  %3141 = vmin.xlane.f32.xlu0 %v3140_v15  ;;  %v3160_v3 = vshll.u32 %v3159_v47, 16  ;;  %v3145_v31 = vshll.u32 %v3144_v59, 16 }
0x114b   : > { %v3183_v22 = vpop.xlane.xlu1 %3182  ;;  %v3168_v30 = vpop.xlane.xlu0 %3167 }
0x114c   : > { %vm3184_vm8 = vcmp.eq.f32.partialorder %v3181_v7, %v3183_v22  ;;  %vm3169_vm10 = vcmp.eq.f32.partialorder %v3166_v35, %v3168_v30  ;;  %v3189_v28 = vcvt.f32.s32 %v3183_v22  ;;  %v3174_v34 = vcvt.f32.s32 %v3168_v30 }
0x114d   : > { %v3185_v11 = vsel %vm3184_vm8, %v3180_v0, inf  ;;  %v3170_v50 = vsel %vm3169_vm10, %v3165_v38, inf }
0x114e   : > { %3186 = vmin.xlane.f32.xlu1 %v3185_v11  ;;  %3171 = vmin.xlane.f32.xlu0 %v3170_v50  ;;  %v3190_v21 = vshll.u32 %v3189_v28, 16  ;;  %v3175_v2 = vshll.u32 %v3174_v34, 16 }
0x11d7   : > { %v3157_v63 = vpop.xlane.xlu1 %3156  ;;  %v3142_v1 = vpop.xlane.xlu0 %3141 }
0x11d8   : > { %v3158_v48 = vcvt.f32.s32 %v3157_v63  ;;  %v3143_v18 = vcvt.f32.s32 %v3142_v1 }
0x11da   : > { %v3161_v8 = vadd.s32 %v3160_v3, %v3158_v48  ;;  %v3146_v32 = vadd.s32 %v3145_v31, %v3143_v18 }
0x11db   : > { %v3187_v39 = vpop.xlane.xlu1 %3186  ;;  %v3172_v33 = vpop.xlane.xlu0 %3171 }
0x11dc   : > { %vm3193_vm11 = vcmp.eq.s32.totalorder %v6201_v42, %v3161_v8  ;;  %vm3192_vm12 = vcmp.eq.s32.totalorder %v6204_v52, %v3146_v32  ;;  %v3188_v26 = vcvt.f32.s32 %v3187_v39  ;;  %v3173_v43 = vcvt.f32.s32 %v3172_v33  ;;  %v2829_v39 = vld [vmem:[%s6571_s6 + $0x10] sm:$0x1] }
0x11dd   : > { %v4623_v58 = vsel %vm3193_vm11, 1.0, %v5332_v17  ;;  %v4622_v27 = vsel %vm3192_vm12, 1.0, %v5332_v17  ;;  %v6225_v9 = vsel %vm3193_vm11, 2147483647, %v6201_v42  ;;  %v6228_v44 = vsel %vm3192_vm12, 2147483647, %v6204_v52 }
0x11de   : > { %v3208_v7 = vpack.c.bf16 %v4623_v58, %v4622_v27  ;;  %v3191_v35 = vadd.s32 %v3190_v21, %v3188_v26  ;;  %v3176_v45 = vadd.s32 %v3175_v2, %v3173_v43  ;;  %v3284_v5 = vsel %vm874_vm9, %v6225_v9, 2147483647 }
0x11df   : > { %v3286_v51 = vshra.s32 %v3284_v5, 16  ;;  %v3269_v40 = vsel %vm874_vm9, %v6228_v44, 2147483647  ;;  %v2830_v33 = vunpack.c.l.bf16 %v2829_v39 }
0x11e0   : > { %vm3195_vm13 = vcmp.eq.s32.totalorder %v6207_v20, %v3191_v35  ;;  %vm3194_vm14 = vcmp.eq.s32.totalorder %v6210_v14, %v3176_v45  ;;  %5052 = vmatprep.mubr.msk.bf16.mxu0 %vm874_vm9, %v3208_v7  ;;  %v3271_v42 = vshra.s32 %v3269_v40, 16  ;;  %v3270_v50 = vand.u32 65535, %v3269_v40 }
0x11e1   : > { %v4625_v52 = vsel %vm3195_vm13, 1.0, %v5332_v17  ;;  %v4624_v60 = vsel %vm3194_vm14, 1.0, %v5332_v17  ;;  %v3288_v23 = vcvt.s32.f32 %v3286_v51  ;;  %v6240_v62 = vsel %vm3195_vm13, 2147483647, %v6207_v20 }
0x11e2   : > { %v3209_v29 = vpack.c.bf16 %v4625_v52, %v4624_v60  ;;  %v3273_v24 = vcvt.s32.f32 %v3271_v42  ;;  %v3314_v15 = vsel %vm874_vm9, %v6240_v62, 2147483647  ;;  %v6245_v22 = vsel %vm3194_vm14, 2147483647, %v6210_v14 }
0x11e3   : > { %3289 = vmin.xlane.f32.xlu1 %v3288_v23  ;;  %v3316_v30 = vshra.s32 %v3314_v15, 16  ;;  %v3299_v0 = vsel %vm874_vm9, %v6245_v22, 2147483647  ;;  %v3285_v14 = vand.u32 65535, %v3284_v5  ;;  %v3315_v28 = vand.u32 65535, %v3314_v15 }
0x11e4   : > { %3274 = vmin.xlane.f32.xlu0 %v3273_v24  ;;  %5053 = vmatmul.mubr.msk.bf16.vlgmr.msra.gmra.mrb[48].mxu0 %vm874_vm9, %v3209_v29  ;;  %v3301_v38 = vshra.s32 %v3299_v0, 16  ;;  %v3272_v63 = vcvt.s32.f32 %v3270_v50  ;;  %v3300_v1 = vand.u32 65535, %v3299_v0  ;;  %v2954_v26 = vrot.slane %v2830_v33, %v5540_v55 }
0x11e5   : > { %5065 = vmatpush3.bf16.msra.mxu0 %v6187_v56  ;;  %v3318_v20 = vcvt.s32.f32 %v3316_v30  ;;  %v3287_v59 = vcvt.s32.f32 %v3285_v14  ;;  %v3317_v18 = vcvt.s32.f32 %v3315_v28 }
0x11e6   : > { %5066 = vmatprep.subr.bf16.mxu0 %v6179_v53  ;;  %v3303_v11 = vcvt.s32.f32 %v3301_v38  ;;  %v3302_v32 = vcvt.s32.f32 %v3300_v1  ;;  %v6260_v43 = vadd.f32 %v2954_v26, %v2949_v25  ;;  %v6265_v58 = vadd.f32 %v2954_v26, %v2947_v46 }
0x11e7   : > { %3319 = vmin.xlane.f32.xlu1 %v3318_v20  ;;  %v6270_v7 = vadd.f32 %v2954_v26, %v2950_v36  ;;  %v6278_v41 = vadd.f32 %v2954_v26, %v2948_v12 }
0x11e8   : > { %3304 = vmin.xlane.f32.xlu0 %v3303_v11 }
0x11e9   : > { %5067 = vmatpush3.bf16.msra.mxu0 %v6179_v53 }
0x1270   : > { %v3290_v47 = vpop.xlane.xlu1 %3289 }
0x1271   : > { %v3275_v34 = vpop.xlane.xlu0 %3274  ;;  %vm3291_vm15 = vcmp.eq.f32.partialorder %v3288_v23, %v3290_v47  ;;  %v3296_v46 = vcvt.f32.s32 %v3290_v47 }
0x1272   : > { %v3292_v3 = vsel %vm3291_vm15, %v3287_v59, inf  ;;  %vm3276_vm0 = vcmp.eq.f32.partialorder %v3273_v24, %v3275_v34  ;;  %v3281_v57 = vcvt.f32.s32 %v3275_v34 }
0x1273   : > { %3293 = vmin.xlane.f32.xlu1 %v3292_v3  ;;  %v3277_v31 = vsel %vm3276_vm0, %v3272_v63, inf  ;;  %v3297_v5 = vshll.u32 %v3296_v46, 16 }
0x1274   : > { %3278 = vmin.xlane.f32.xlu0 %v3277_v31  ;;  %v3320_v48 = vpop.xlane.xlu1 %3319  ;;  %v3282_v12 = vshll.u32 %v3281_v57, 16 }
0x1275   : > { %v3305_v8 = vpop.xlane.xlu0 %3304  ;;  %vm3321_vm1 = vcmp.eq.f32.partialorder %v3318_v20, %v3320_v48  ;;  %v3326_v51 = vcvt.f32.s32 %v3320_v48 }
0x1276   : > { %v3322_v21 = vsel %vm3321_vm1, %v3317_v18, inf  ;;  %vm3306_vm2 = vcmp.eq.f32.partialorder %v3303_v11, %v3305_v8  ;;  %v3311_v40 = vcvt.f32.s32 %v3305_v8 }
0x1277   : > { %3323 = vmin.xlane.f32.xlu1 %v3322_v21  ;;  %v3307_v2 = vsel %vm3306_vm2, %v3302_v32, inf  ;;  %v3327_v29 = vshll.u32 %v3326_v51, 16 }
0x1278   : > { %3308 = vmin.xlane.f32.xlu0 %v3307_v2  ;;  %v3312_v24 = vshll.u32 %v3311_v40, 16 }
0x12b7   : > { %v5054_v27 = vpop.f32.mrb[48].mxu0 }
0x12b8   : > { %v6273_v35 = vadd.f32 %v5054_v27, %v6260_v43  ;;  %v3250_v45 = vpop.f32.mrb[49].mxu0 }
0x12b9   : > { %v6281_v6 = vadd.f32 %v3250_v45, %v6265_v58  ;;  %v5055_v16 = vpop.f32.mrb[50].mxu0 }
0x12ba   : > { %v6284_v25 = vadd.f32 %v5055_v16, %v6270_v7  ;;  %v3253_v54 = vpop.f32.mrb[51].mxu0 }
0x12bb   : > { %v6287_v49 = vadd.f32 %v3253_v54, %v6278_v41 }
0x1300   : > { %v3294_v36 = vpop.xlane.xlu1 %3293 }
0x1301   : > { %v3295_v4 = vcvt.f32.s32 %v3294_v36  ;;  %v3279_v10 = vpop.xlane.xlu0 %3278 }
0x1302   : > { %v3280_v42 = vcvt.f32.s32 %v3279_v10 }
0x1303   : > { %v3298_v52 = vadd.s32 %v3297_v5, %v3295_v4 }
0x1304   : > { %v3283_v60 = vadd.s32 %v3282_v12, %v3280_v42  ;;  %v3324_v23 = vpop.xlane.xlu1 %3323  ;;  %v6325_v12 = vld [vmem:[%s6572_s7 + $0x8] sm:$0xff]  }
0x1305   : > { %vm3330_vm4 = vcmp.eq.s32.totalorder %v6225_v9, %v3298_v52  ;;  %v3325_v15 = vcvt.f32.s32 %v3324_v23  ;;  %v3309_v30 = vpop.xlane.xlu0 %3308  ;;  %5080 = vmatprep.subr.bf16.mxu0 %v6325_v12 }
0x1306   : > { %v4629_v0 = vsel %vm3330_vm4, 1.0, %v5332_v17  ;;  %vm3329_vm5 = vcmp.eq.s32.totalorder %v6228_v44, %v3283_v60  ;;  %v3310_v38 = vcvt.f32.s32 %v3309_v30  ;;  %v6293_v20 = vsel %vm3330_vm4, 2147483647, %v6225_v9 }
0x1307   : > { %v4628_v11 = vsel %vm3329_vm5, 1.0, %v5332_v17  ;;  %v3328_v14 = vadd.s32 %v3327_v29, %v3325_v15  ;;  %v3425_v50 = vsel %vm874_vm9, %v6293_v20, 2147483647  ;;  %v6299_v47 = vsel %vm3329_vm5, 2147483647, %v6228_v44 }
0x1308   : > { %v3345_v59 = vpack.c.bf16 %v4629_v0, %v4628_v11  ;;  %v3313_v28 = vadd.s32 %v3312_v24, %v3310_v38  ;;  %v3427_v34 = vshra.s32 %v3425_v50, 16  ;;  %v3410_v63 = vsel %vm874_vm9, %v6299_v47, 2147483647 }
0x1309   : > { %vm3332_vm6 = vcmp.eq.s32.totalorder %v6240_v62, %v3328_v14  ;;  %v3412_v1 = vshra.s32 %v3410_v63, 16  ;;  %v3411_v26 = vand.u32 65535, %v3410_v63  ;;  %v3267_v24 = vmax.f32 %v6273_v35, 0.0 }
0x130a   : > { %v4631_v9 = vsel %vm3332_vm6, 1.0, %v5332_v17  ;;  %vm3331_vm8 = vcmp.eq.s32.totalorder %v6245_v22, %v3313_v28  ;;  %5060 = vmatprep.mubr.msk.bf16.mxu1 %vm874_vm9, %v3345_v59  ;;  %v3429_v3 = vcvt.s32.f32 %v3427_v34  ;;  %v6308_v31 = vsel %vm3332_vm6, 2147483647, %v6240_v62 }
0x130b   : > { %v4630_v44 = vsel %vm3331_vm8, 1.0, %v5332_v17  ;;  %v3414_v48 = vcvt.s32.f32 %v3412_v1  ;;  %v3455_v18 = vsel %vm874_vm9, %v6308_v31, 2147483647  ;;  %v6314_v8 = vsel %vm3331_vm8, 2147483647, %v6245_v22 }
0x130c   : > { %v3346_v32 = vpack.c.bf16 %v4631_v9, %v4630_v44  ;;  %3430 = vmin.xlane.f32.xlu1 %v3429_v3  ;;  %v3457_v21 = vshra.s32 %v3455_v18, 16  ;;  %v3440_v2 = vsel %vm874_vm9, %v6314_v8, 2147483647  ;;  %v3426_v22 = vand.u32 65535, %v3425_v50 }
0x130d   : > { %3415 = vmin.xlane.f32.xlu0 %v3414_v48  ;;  %v3442_v39 = vshra.s32 %v3440_v2, 16  ;;  %v3456_v16 = vand.u32 65535, %v3455_v18  ;;  %v3413_v46 = vcvt.s32.f32 %v3411_v26  ;;  %v3441_v57 = vand.u32 65535, %v3440_v2 }
0x130e   : > { %5061 = vmatmul.mubr.msk.bf16.vlgmr.msra.gmra.mrb[64].mxu1 %vm874_vm9, %v3346_v32  ;;  %v3459_v62 = vcvt.s32.f32 %v3457_v21  ;;  %v3428_v45 = vcvt.s32.f32 %v3426_v22  ;;  %v3265_v38 = vmax.f32 %v6281_v6, 0.0  ;;  %v3268_v50 = vmax.f32 %v6284_v25, 0.0 }
0x130f   : > { %5073 = vmatpush3.bf16.msra.mxu1 %v6187_v56  ;;  %v3444_v33 = vcvt.s32.f32 %v3442_v39  ;;  %v3458_v51 = vcvt.s32.f32 %v3456_v16  ;;  %v3443_v4 = vcvt.s32.f32 %v3441_v57  ;;  %v3266_v34 = vmax.f32 %v6287_v49, 0.0 }
0x1310   : > { %5074 = vmatprep.subr.bf16.mxu1 %v6179_v53  ;;  %3460 = vmin.xlane.f32.xlu1 %v3459_v62 }
0x1311   : > { %3445 = vmin.xlane.f32.xlu0 %v3444_v33 }
0x1313   : > { %5075 = vmatpush3.bf16.msra.mxu1 %v6179_v53 }
0x1399   : > { %v3431_v27 = vpop.xlane.xlu1 %3430 }
0x139a   : > { %v3416_v54 = vpop.xlane.xlu0 %3415  ;;  %vm3432_vm10 = vcmp.eq.f32.partialorder %v3429_v3, %v3431_v27  ;;  %v3437_v3 = vcvt.f32.s32 %v3431_v27 }
0x139b   : > { %v3433_v36 = vsel %vm3432_vm10, %v3428_v45, inf  ;;  %vm3417_vm11 = vcmp.eq.f32.partialorder %v3414_v48, %v3416_v54  ;;  %v3422_v44 = vcvt.f32.s32 %v3416_v54 }
0x139c   : > { %3434 = vmin.xlane.f32.xlu1 %v3433_v36  ;;  %v3418_v56 = vsel %vm3417_vm11, %v3413_v46, inf  ;;  %v3438_v48 = vshll.u32 %v3437_v3, 16 }
0x139d   : > { %3419 = vmin.xlane.f32.xlu0 %v3418_v56  ;;  %v3461_v5 = vpop.xlane.xlu1 %3460  ;;  %v3423_v2 = vshll.u32 %v3422_v44, 16 }
0x139e   : > { %v3446_v40 = vpop.xlane.xlu0 %3445  ;;  %vm3462_vm12 = vcmp.eq.f32.partialorder %v3459_v62, %v3461_v5  ;;  %v3467_v18 = vcvt.f32.s32 %v3461_v5 }
0x139f   : > { %v3463_v53 = vsel %vm3462_vm12, %v3458_v51, inf  ;;  %vm3447_vm13 = vcmp.eq.f32.partialorder %v3444_v33, %v3446_v40  ;;  %v3452_v32 = vcvt.f32.s32 %v3446_v40 }
0x13a0   : > { %3464 = vmin.xlane.f32.xlu1 %v3463_v53  ;;  %v3448_v10 = vsel %vm3447_vm13, %v3443_v4, inf  ;;  %v3468_v22 = vshll.u32 %v3467_v18, 16  ;;  %vm3885_vm13 = vcmask 523264  }
0x13a1   : > { %3449 = vmin.xlane.f32.xlu0 %v3448_v10  ;;  %v3453_v26 = vshll.u32 %v3452_v32, 16 }
0x13e1   : > { %v5062_v42 = vpop.f32.mrb[64].mxu1 }
0x13e2   : > { %v3396_v52 = vadd.f32 %v5062_v42, %v6260_v43  ;;  %v3387_v60 = vpop.f32.mrb[65].mxu1 }
0x13e3   : > { %v3388_v23 = vadd.f32 %v3387_v60, %v6265_v58  ;;  %v5063_v29 = vpop.f32.mrb[66].mxu1 }
0x13e4   : > { %v3404_v15 = vmax.f32 %v3396_v52, 0.0  ;;  %v3399_v30 = vadd.f32 %v5063_v29, %v6270_v7  ;;  %v3390_v0 = vpop.f32.mrb[67].mxu1 }
0x13e5   : > { %v3402_v11 = vmax.f32 %v3388_v23, 0.0  ;;  %v3391_v14 = vadd.f32 %v3390_v0, %v6278_v41 }
0x13e6   : > { %v6335_v59 = vmax.f32 %v3267_v24, %v3404_v15  ;;  %v3405_v28 = vmax.f32 %v3399_v30, 0.0 }
0x13e7   : > { %v6338_v63 = vmax.f32 %v3265_v38, %v3402_v11  ;;  %v3403_v1 = vmax.f32 %v3391_v14, 0.0 }
0x13e8   : > { %v6340_v35 = vmax.f32 %v3268_v50, %v3405_v28 }
0x13e9   : > { %v6342_v9 = vmax.f32 %v3266_v34, %v3403_v1 }
0x1429   : > { %v3435_v6 = vpop.xlane.xlu1 %3434 }
0x142a   : > { %v3436_v21 = vcvt.f32.s32 %v3435_v6  ;;  %v3420_v25 = vpop.xlane.xlu0 %3419 }
0x142b   : > { %v3421_v39 = vcvt.f32.s32 %v3420_v25 }
0x142c   : > { %v3439_v62 = vadd.s32 %v3438_v48, %v3436_v21 }
0x142d   : > { %v3424_v33 = vadd.s32 %v3423_v2, %v3421_v39  ;;  %v3465_v49 = vpop.xlane.xlu1 %3464  ;;  %v5253_v39 = vld [vmem:[%s6573_s8 + $0x8] sm:$0xff]  }
0x142e   : > { %vm3471_vm14 = vcmp.eq.s32.totalorder %v6293_v20, %v3439_v62  ;;  %v3466_v45 = vcvt.f32.s32 %v3465_v49  ;;  %v3450_v16 = vpop.xlane.xlu0 %3449  ;;  %5098 = vmatprep.subr.bf16.mxu1 %v5253_v39 }
0x142f   : > { %v4635_v27 = vsel %vm3471_vm14, 1.0, %v5332_v17  ;;  %vm3470_vm15 = vcmp.eq.s32.totalorder %v6299_v47, %v3424_v33  ;;  %v3451_v54 = vcvt.f32.s32 %v3450_v16  ;;  %v6348_v46 = vsel %vm3471_vm14, 2147483647, %v6293_v20 }
0x1430   : > { %v4634_v57 = vsel %vm3470_vm15, 1.0, %v5332_v17  ;;  %v3469_v36 = vadd.s32 %v3468_v22, %v3466_v45  ;;  %v3566_v56 = vsel %vm874_vm9, %v6348_v46, 2147483647  ;;  %v6354_v5 = vsel %vm3470_vm15, 2147483647, %v6299_v47 }
0x1431   : > { %v3486_v51 = vpack.c.bf16 %v4635_v27, %v4634_v57  ;;  %v3454_v40 = vadd.s32 %v3453_v26, %v3451_v54  ;;  %v3568_v4 = vshra.s32 %v3566_v56, 16  ;;  %v3551_v53 = vsel %vm874_vm9, %v6354_v5, 2147483647 }
0x1432   : > { %vm3473_vm0 = vcmp.eq.s32.totalorder %v6308_v31, %v3469_v36  ;;  %v3553_v10 = vshra.s32 %v3551_v53, 16  ;;  %v3567_v11 = vand.u32 65535, %v3566_v56  ;;  %v3552_v14 = vand.u32 65535, %v3551_v53 }
0x1433   : > { %v4637_v20 = vsel %vm3473_vm0, 1.0, %v5332_v17  ;;  %vm3472_vm1 = vcmp.eq.s32.totalorder %v6314_v8, %v3454_v40  ;;  %5068 = vmatprep.mubr.msk.bf16.mxu0 %vm874_vm9, %v3486_v51  ;;  %v3570_v42 = vcvt.s32.f32 %v3568_v4  ;;  %v6363_v52 = vsel %vm3473_vm0, 2147483647, %v6308_v31  ;;  %v5252_v31 = vld [vmem:[%s6572_s7] sm:$0xff]  }
0x1434   : > { %v4636_v47 = vsel %vm3472_vm1, 1.0, %v5332_v17  ;;  %v3555_v60 = vcvt.s32.f32 %v3553_v10  ;;  %v3596_v23 = vsel %vm874_vm9, %v6363_v52, 2147483647  ;;  %v6369_v29 = vsel %vm3472_vm1, 2147483647, %v6314_v8 }
0x1435   : > { %v3487_v24 = vpack.c.bf16 %v4637_v20, %v4636_v47  ;;  %3571 = vmin.xlane.f32.xlu1 %v3570_v42  ;;  %v3598_v15 = vshra.s32 %v3596_v23, 16  ;;  %v3581_v30 = vsel %vm874_vm9, %v6369_v29, 2147483647  ;;  %v3569_v28 = vcvt.s32.f32 %v3567_v11 }
0x1436   : > { %3556 = vmin.xlane.f32.xlu0 %v3555_v60  ;;  %v3583_v0 = vshra.s32 %v3581_v30, 16  ;;  %v3597_v34 = vand.u32 65535, %v3596_v23  ;;  %v3582_v3 = vand.u32 65535, %v3581_v30  ;;  %vm3899_vm14 = vcmask 516096  }
0x1437   : > { %5069 = vmatmul.mubr.msk.bf16.vlgmr.msra.gmra.mrb[52].mxu0 %vm874_vm9, %v3487_v24  ;;  %v3600_v38 = vcvt.s32.f32 %v3598_v15 }
0x1438   : > { %5082 = vmatprep.mubr.msk.bf16.mxu0 %vm1028_vm7, %v6122_v61  ;;  %v3585_v8 = vcvt.s32.f32 %v3583_v0  ;;  %5081 = vmatpush3.bf16.msra.mxu0 %v6325_v12  ;;  %v3554_v12 = vcvt.s32.f32 %v3552_v14  ;;  %v3599_v18 = vcvt.s32.f32 %v3597_v34  ;;  %v3584_v21 = vcvt.s32.f32 %v3582_v3 }
0x1439   : > { %3601 = vmin.xlane.f32.xlu1 %v3600_v38  ;;  %5086 = vmatprep.subr.bf16.mxu0 %v5252_v31 }
0x143a   : > { %3586 = vmin.xlane.f32.xlu0 %v3585_v8 }
0x143f   : > { %5083 = vmatmul.mubr.msk.bf16.vlgmr.msra.gmra.mrb[56].mxu0 %vm1028_vm7, %v6120_v37 }
0x1440   : > { %5088 = vmatprep.mubr.msk.bf16.mxu0 %vm1028_vm7, %v5796_v13  ;;  %5087 = vmatpush3.bf16.msra.mxu0 %v5252_v31 }
0x144b   : > { %5089 = vmatmul.mubr.msk.bf16.vlgmr.msra.gmra.mrb[56].mxu0 %vm1028_vm7, %v5794_v19 }
0x14c2   : > { %v3572_v50 = vpop.xlane.xlu1 %3571 }
0x14c3   : > { %v3557_v1 = vpop.xlane.xlu0 %3556  ;;  %vm3573_vm2 = vcmp.eq.f32.partialorder %v3570_v42, %v3572_v50  ;;  %v3578_v10 = vcvt.f32.s32 %v3572_v50 }
0x14c4   : > { %v3574_v44 = vsel %vm3573_vm2, %v3569_v28, inf  ;;  %vm3558_vm4 = vcmp.eq.f32.partialorder %v3555_v60, %v3557_v1  ;;  %v3563_v20 = vcvt.f32.s32 %v3557_v1 }
0x14c5   : > { %3575 = vmin.xlane.f32.xlu1 %v3574_v44  ;;  %v3559_v6 = vsel %vm3558_vm4, %v3554_v12, inf  ;;  %v3579_v47 = vshll.u32 %v3578_v10, 16 }
0x14c6   : > { %3560 = vmin.xlane.f32.xlu0 %v3559_v6  ;;  %v3602_v48 = vpop.xlane.xlu1 %3601 }
0x14c7   : > { %v3587_v32 = vpop.xlane.xlu0 %3586  ;;  %vm3603_vm5 = vcmp.eq.f32.partialorder %v3600_v38, %v3602_v48  ;;  %v3608_v60 = vcvt.f32.s32 %v3602_v48 }
0x14c8   : > { %v3604_v25 = vsel %vm3603_vm5, %v3599_v18, inf  ;;  %vm3588_vm6 = vcmp.eq.f32.partialorder %v3585_v8, %v3587_v32  ;;  %v3593_v15 = vcvt.f32.s32 %v3587_v32 }
0x14c9   : > { %3605 = vmin.xlane.f32.xlu1 %v3604_v25  ;;  %v3589_v2 = vsel %vm3588_vm6, %v3584_v21, inf  ;;  %v3609_v38 = vshll.u32 %v3608_v60, 16 }
0x14ca   : > { %3590 = vmin.xlane.f32.xlu0 %v3589_v2 }
0x150a   : > { %v5070_v62 = vpop.f32.mrb[52].mxu0 }
0x150b   : > { %v3537_v33 = vadd.f32 %v5070_v62, %v6260_v43  ;;  %v3528_v49 = vpop.f32.mrb[53].mxu0 }
0x150c   : > { %v3529_v22 = vadd.f32 %v3528_v49, %v6265_v58  ;;  %v5071_v26 = vpop.f32.mrb[54].mxu0 }
0x150d   : > { %v3545_v45 = vmax.f32 %v3537_v33, 0.0  ;;  %v3540_v16 = vadd.f32 %v5071_v26, %v6270_v7  ;;  %v3531_v27 = vpop.f32.mrb[55].mxu0  ;;  %v5260_v26 = vld [vmem:[%s6573_s8 + $0x30] sm:$0xff]  }
0x150e   : > { %v3543_v54 = vmax.f32 %v3529_v22, 0.0  ;;  %v3532_v57 = vadd.f32 %v3531_v27, %v6278_v41  ;;  %v5259_v22 = vld [vmem:[%s6573_s8 + $0x28] sm:$0xff]  }
0x150f   : > { %v6394_v36 = vmax.f32 %v6335_v59, %v3545_v45  ;;  %v3546_v56 = vmax.f32 %v3540_v16, 0.0  ;;  %v3564_v59 = vshll.u32 %v3563_v20, 16  ;;  %v3871_v45 = vld [vmem:[%s6572_s7 + $0x18] sm:$0x1] }
0x1510   : > { %v6397_v51 = vmax.f32 %v6338_v63, %v3543_v54  ;;  %v3544_v40 = vmax.f32 %v3532_v57, 0.0  ;;  %v3872_v16 = vunpack.c.l.bf16 %v3871_v45 }
0x1511   : > { %v6400_v4 = vmax.f32 %v6340_v35, %v3546_v56 }
0x1512   : > { %v6403_v53 = vmax.f32 %v6342_v9, %v3544_v40  ;;  %v3594_v9 = vshll.u32 %v3593_v15, 16  ;;  %v3876_v27 = vrot.slane %v3872_v16, %v5540_v55 }
0x1552   : > { %v3576_v42 = vpop.xlane.xlu1 %3575 }
0x1553   : > { %v3577_v23 = vcvt.f32.s32 %v3576_v42  ;;  %v3561_v24 = vpop.xlane.xlu0 %3560 }
0x1554   : > { %v3562_v30 = vcvt.f32.s32 %v3561_v24 }
0x1555   : > { %v3580_v31 = vadd.s32 %v3579_v47, %v3577_v23 }
0x1556   : > { %v3565_v63 = vadd.s32 %v3564_v59, %v3562_v30  ;;  %v3606_v0 = vpop.xlane.xlu1 %3605 }
0x1557   : > { %vm3612_vm8 = vcmp.eq.s32.totalorder %v6348_v46, %v3580_v31  ;;  %v3607_v35 = vcvt.f32.s32 %v3606_v0  ;;  %v3591_v8 = vpop.xlane.xlu0 %3590 }
0x1558   : > { %v4641_v11 = vsel %vm3612_vm8, 1.0, %v5332_v17  ;;  %vm3611_vm10 = vcmp.eq.s32.totalorder %v6354_v5, %v3565_v63  ;;  %v3592_v14 = vcvt.f32.s32 %v3591_v8  ;;  %v5254_v5 = vld [vmem:[%s6573_s8] sm:$0xff]  }
0x1559   : > { %v4640_v50 = vsel %vm3611_vm10, 1.0, %v5332_v17  ;;  %v3610_v28 = vadd.s32 %v3609_v38, %v3607_v35 }
0x155a   : > { %v3623_v34 = vpack.c.bf16 %v4641_v11, %v4640_v50  ;;  %v3595_v1 = vadd.s32 %v3594_v9, %v3592_v14 }
0x155b   : > { %vm3614_vm11 = vcmp.eq.s32.totalorder %v6363_v52, %v3610_v28  ;;  %v5255_v52 = vld [vmem:[%s6572_s7 + $0x10] sm:$0xff]  }
0x155c   : > { %v4643_v12 = vsel %vm3614_vm11, 1.0, %v5332_v17  ;;  %vm3613_vm12 = vcmp.eq.s32.totalorder %v6369_v29, %v3595_v1  ;;  %5076 = vmatprep.mubr.msk.bf16.mxu1 %vm874_vm9, %v3623_v34  ;;  %5092 = vmatprep.subr.bf16.mxu0 %v5255_v52  ;;  %v5261_v1 = vld [vmem:[%s6574_s9] sm:$0xff]  }
0x155d   : > { %v4642_v46 = vsel %vm3613_vm12, 1.0, %v5332_v17  ;;  %5093 = vmatpush3.bf16.msra.mxu0 %v5255_v52 }
0x155e   : > { %v3624_v3 = vpack.c.bf16 %v4643_v12, %v4642_v46  ;;  %5116 = vmatprep.subr.bf16.mxu0 %v5332_v17  ;;  %v5262_v12 = vld [vmem:[%s6574_s9 + $0x8] sm:$0xff]   ;;  %v4160_v46 = vld [vmem:[%s6573_s8 + $0x38] sm:$0x1] }
0x1560   : > { %5077 = vmatmul.mubr.msk.bf16.vlgmr.msra.gmra.mrb[68].mxu1 %vm874_vm9, %v3624_v3  ;;  %v4161_v3 = vunpack.c.l.bf16 %v4160_v46 }
0x1561   : > { %5100 = vmatprep.mubr.msk.bf16.mxu1 %vm1028_vm7, %v6122_v61  ;;  %5099 = vmatpush3.bf16.msra.mxu1 %v5253_v39  ;;  %v5256_v61 = vld [vmem:[%s6573_s8 + $0x10] sm:$0xff]  }
0x1562   : > { %5104 = vmatprep.subr.bf16.mxu1 %v5254_v5 }
0x1568   : > { %5101 = vmatmul.mubr.msk.bf16.vlgmr.msra.gmra.mrb[72].mxu1 %vm1028_vm7, %v6120_v37 }
0x1569   : > { %5106 = vmatprep.mubr.msk.bf16.mxu1 %vm1028_vm7, %v5796_v13  ;;  %5105 = vmatpush3.bf16.msra.mxu1 %v5254_v5 }
0x156a   : > { %5110 = vmatprep.subr.bf16.mxu1 %v5256_v61 }
0x1574   : > { %5107 = vmatmul.mubr.msk.bf16.vlgmr.msra.gmra.mrb[72].mxu1 %vm1028_vm7, %v5794_v19 }
0x1575   : > { %5111 = vmatpush3.bf16.msra.mxu1 %v5256_v61  ;;  %v4165_v61 = vrot.slane %v4161_v3, %v5540_v55 }
0x1576   : > { %5128 = vmatprep.subr.bf16.mxu1 %v5261_v1 }
0x1633   : > { %v5078_v37 = vpop.f32.mrb[68].mxu1 }
0x1634   : > { %v3674_v13 = vadd.f32 %v5078_v37, %v6260_v43  ;;  %v3665_v29 = vpop.f32.mrb[69].mxu1 }
0x1635   : > { %v3666_v19 = vadd.f32 %v3665_v29, %v6265_v58  ;;  %v5079_v44 = vpop.f32.mrb[70].mxu1 }
0x1636   : > { %v3682_v6 = vmax.f32 %v3674_v13, 0.0  ;;  %v3677_v48 = vadd.f32 %v5079_v44, %v6270_v7  ;;  %v3668_v18 = vpop.f32.mrb[71].mxu1  ;;  %v5257_v7 = vld [vmem:[%s6573_s8 + $0x18] sm:$0xff]  }
0x1637   : > { %v3680_v32 = vmax.f32 %v3666_v19, 0.0  ;;  %v3669_v21 = vadd.f32 %v3668_v18, %v6278_v41  ;;  %v5258_v41 = vld [vmem:[%s6573_s8 + $0x20] sm:$0xff]  }
0x1638   : > { %v3686_v25 = vmax.f32 %v6394_v36, %v3682_v6  ;;  %v3683_v2 = vmax.f32 %v3677_v48, 0.0 }
0x1639   : > { %v3684_v39 = vmax.f32 %v6397_v51, %v3680_v32  ;;  %v3681_v62 = vmax.f32 %v3669_v21, 0.0 }
0x163a   : > { %v3687_v33 = vmax.f32 %v6400_v4, %v3683_v2 }
0x163b   : > { %v3685_v43 = vmax.f32 %v6403_v53, %v3681_v62 }
0x163c   : > { %v3803_v49 = vpack.c.bf16 %v3687_v33, %v3686_v25 }
0x163d   : > { %v3802_v58 = vpack.c.bf16 %v3685_v43, %v3684_v39 }
0x163f   : > { %5094 = vmatprep.mubr.msk.bf16.mxu0 %vm1028_vm7, %v3802_v58  ;;  %5112 = vmatprep.mubr.msk.bf16.mxu1 %vm1028_vm7, %v3802_v58  ;;  %v5263_v58 = vld [vmem:[%s6575_s10] sm:$0xff]  }
0x1640   : > { %5095 = vmatmul.mubr.msk.bf16.vlgmr.msra.gmra.mrb[56].mxu0 %vm1028_vm7, %v3803_v49  ;;  %5113 = vmatmul.mubr.msk.bf16.vlgmr.msra.gmra.mrb[72].mxu1 %vm1028_vm7, %v3803_v49 }
0x1641   : > { %5124 = vmatprep.mubr.msk.bf16.mxu0 %vm5331_vm3, %v5332_v17  ;;  %5117 = vmatpush3.bf16.msra.mxu0 %v5257_v7  ;;  %v5264_v7 = vld [vmem:[%s6575_s10 + $0x8] sm:$0xff]  }
0x1642   : > { %5118 = vmatprep.subr.bf16.mxu0 %v5332_v17  ;;  %5129 = vmatpush3.bf16.msra.mxu1 %v5261_v1 }
0x1643   : > { %5130 = vmatprep.subr.bf16.mxu1 %v5262_v12 }
0x1645   : > { %5119 = vmatpush3.bf16.msra.mxu0 %v5258_v41  ;;  %v4180_v41 = vld [vmem:[%s6574_s9 + $0x10] sm:$0x1] }
0x1646   : > { %5120 = vmatprep.subr.bf16.mxu0 %v5332_v17  ;;  %5131 = vmatpush3.bf16.msra.mxu1 %v5262_v12  ;;  %v4340_v12 = vld [vmem:[%s6576_s11] sm:$0xf] }
0x1647   : > { %5136 = vmatprep.subr.bf16.mxu1 %v5263_v58 }
0x1649   : > { %5121 = vmatpush3.bf16.msra.mxu0 %v5259_v22  ;;  %v4181_v22 = vunpack.c.l.bf16 %v4180_v41 }
0x164a   : > { %5122 = vmatprep.subr.bf16.mxu0 %v5332_v17 }
0x164d   : > { %5123 = vmatpush3.bf16.msra.mxu0 %v5260_v26  ;;  %v4185_v26 = vrot.slane %v4181_v22, %v5540_v55 }
0x164e   : > { %5144 = vmatprep.subr.bf16.mxu0 %v5332_v17 }
0x1713   : > { %v5096_v54 = vpop.f32.mrb[56].mxu0  ;;  %v5114_v57 = vpop.f32.mrb[72].mxu1 }
0x1714   : > { %v3879_v36 = vadd.f32 %v5096_v54, %v3876_v27  ;;  %v3852_v56 = vpop.f32.mrb[57].mxu0  ;;  %v4057_v51 = vpop.f32.mrb[73].mxu1 }
0x1715   : > { %v3877_v40 = vadd.f32 %v3876_v27, %v3852_v56  ;;  %v5097_v4 = vpop.f32.mrb[58].mxu0  ;;  %v5115_v53 = vpop.f32.mrb[74].mxu1 }
0x1716   : > { %v3883_v10 = vmax.f32 %v3879_v36, 0.0  ;;  %v3880_v20 = vadd.f32 %v5097_v4, %v3876_v27  ;;  %v3855_v42 = vpop.f32.mrb[59].mxu0  ;;  %v4060_v47 = vpop.f32.mrb[75].mxu1 }
0x1717   : > { %v3881_v60 = vmax.f32 %v3877_v40, 0.0  ;;  %v3878_v23 = vadd.f32 %v3876_v27, %v3855_v42 }
0x1718   : > { %v3884_v24 = vmax.f32 %v3880_v20, 0.0  ;;  %v3888_v15 = vsel %vm3885_vm13, %v3883_v10, -inf }
0x1719   : > { %v3882_v59 = vmax.f32 %v3878_v23, 0.0  ;;  %v3886_v31 = vsel %vm3885_vm13, %v3881_v60, -inf  ;;  %v5334_v60 = vmov 0   ;;  %v4263_v23 = vld [vmem:[%s6575_s10 + $0x10] sm:$0x1] }
0x171a   : > { %v3889_v30 = vsel %vm3885_vm13, %v3884_v24, -inf  ;;  %5244 = vset.pattern.permute.xlu0 %v5334_v60  ;;  %v4264_v24 = vunpack.c.l.bf16 %v4263_v23 }
0x171b   : > { %v3891_v63 = vmax.f32 %v3888_v15, %v3889_v30  ;;  %v3887_v0 = vsel %vm3885_vm13, %v3882_v59, -inf }
0x171c   : > { %v3890_v38 = vmax.f32 %v3886_v31, %v3887_v0  ;;  %v4268_v59 = vrot.slane %v4264_v24, %v5540_v55 }
0x171e   : > { %v3892_v35 = vmax.f32 %v3890_v38, %v3891_v63 }
0x1720   : > { %v3893_v8 = vrot.slane %v3892_v35, 4 }
0x1722   : > { %v3894_v9 = vmax.f32 %v3892_v35, %v3893_v8 }
0x1724   : > { %v3895_v11 = vrot.slane %v3894_v9, 2 }
0x1726   : > { %v3896_v14 = vmax.f32 %v3894_v9, %v3895_v11 }
0x1728   : > { %v3897_v50 = vrot.slane %v3896_v14, 1 }
0x172a   : > { %v3898_v28 = vmax.f32 %v3896_v14, %v3897_v50 }
0x172c   : > { %3900 = vst.msk [vmem:[%s491_s27] sm:$0x1] %vm3899_vm14, %v3898_v28  ;;  %v4076_v34 = vpack.c.bf16 %v3898_v28, %v3898_v28  ;;  %s5335_s27 = smov [#allocation2]  }
0x172d   : > { %s5269_s15 = sshll.u32 %s5335_s27, 4  ;;  %s5270_s15 = int_to_ptr.vmem [resolvable:$false] %s5269_s15 }
0x172e   : > { %5125 = vmatmul.mubr.msk.bf16.vlgmr.msra.gmra.mrb[60].mxu0 %vm3885_vm13, %v4076_v34  ;;  %s5271_s18 = scalar_lea.vmem %s5270_s15, 256  ;;  %p5272_p0 = scmp.lt.s32.totalorder %s6524_s25, %s5270_s15 }
0x172f   : > { %5148 = vmatprep.mubr.msk.bf16.mxu0 %vm5331_vm3, %v5332_v17  ;;  %p5273_p1 = scmp.lt.s32.totalorder %s5271_s18, %s5265_s26 }
0x1731   : > { %p5274_p2 = por %p5273_p1, %p5272_p0 }
0x1733   : > { %p5275_p3 = pnand %p5274_p2, %p5268_p13 }
0x1801   : > { %v4146_v5 = vpop.f32.mrb[60].mxu0 }
0x1802   : > { %v4155_v52 = vrot.slane %v4146_v5, %v5540_v55  ;;  %v5126_v37 = vpop.f32.mrb[61].mxu0 }
0x1803   : > { %v4149_v13 = vpop.f32.mrb[62].mxu0 }
0x1804   : > { %v4156_v29 = vadd.f32 %v4155_v52, %v4057_v51  ;;  %v4157_v19 = vadd.f32 %v4155_v52, %v4060_v47  ;;  %v4158_v44 = vadd.f32 %v5114_v57, %v4155_v52  ;;  %v4159_v6 = vadd.f32 %v5115_v53, %v4155_v52  ;;  %v5127_v48 = vpop.f32.mrb[63].mxu0  ;;  %v4343_v47 = vld [vmem:[%s6577_s12] sm:$0xff] }
0x1805   : > { %4346 = vperm.xlu0 %5244, %v4343_v47  }
0x1806   : > { %v4168_v18 = vadd.f32 %v4165_v61, %v4158_v44  ;;  %v4169_v32 = vadd.f32 %v4165_v61, %v4159_v6  ;;  %v4166_v21 = vadd.f32 %v4165_v61, %v4156_v29  ;;  %v4167_v25 = vadd.f32 %v4165_v61, %v4157_v19 }
0x1808   : > { %v4172_v2 = vmax.f32 %v4168_v18, 0.0  ;;  %v4173_v39 = vmax.f32 %v4169_v32, 0.0  ;;  %v4170_v62 = vmax.f32 %v4166_v21, 0.0  ;;  %v4171_v33 = vmax.f32 %v4167_v25, 0.0 }
0x180a   : > { %v4174_v43 = vpack.c.bf16 %v4171_v33, %v4170_v62  ;;  %v4175_v49 = vpack.c.bf16 %v4173_v39, %v4172_v2 }
0x180c   : > { %5132 = vmatprep.mubr.msk.bf16.mxu1 %vm874_vm9, %v4174_v43 }
0x180d   : > { %5133 = vmatmul.mubr.msk.bf16.vlgmr.msra.gmra.mrb[76].mxu1 %vm874_vm9, %v4175_v49 }
0x180e   : > { %5137 = vmatpush3.bf16.msra.mxu1 %v5263_v58 }
0x180f   : > { %5138 = vmatprep.subr.bf16.mxu1 %v5264_v7 }
0x1812   : > { %5139 = vmatpush3.bf16.msra.mxu1 %v5264_v7 }
0x1884   : > { %v4347_v46 = vpop.permute.xlu0 %4346 }
0x18e0   : > { %v5134_v45 = vpop.f32.mrb[76].mxu1 }
0x18e1   : > { %v4247_v16 = vadd.f32 %v5134_v45, %v4185_v26  ;;  %v4238_v27 = vpop.f32.mrb[77].mxu1 }
0x18e2   : > { %v4239_v54 = vadd.f32 %v4238_v27, %v4185_v26  ;;  %v5135_v57 = vpop.f32.mrb[78].mxu1 }
0x18e3   : > { %v4250_v36 = vadd.f32 %v5135_v57, %v4185_v26  ;;  %v4241_v56 = vpop.f32.mrb[79].mxu1  ;;  %v4255_v40 = vmax.f32 %v4247_v16, 0.0 }
0x18e4   : > { %v4242_v51 = vadd.f32 %v4241_v56, %v4185_v26  ;;  %v4253_v53 = vmax.f32 %v4239_v54, 0.0 }
0x18e5   : > { %v4256_v4 = vmax.f32 %v4250_v36, 0.0 }
0x18e6   : > { %v4254_v10 = vmax.f32 %v4242_v51, 0.0 }
0x18e7   : > { %v4258_v20 = vpack.c.bf16 %v4256_v4, %v4255_v40 }
0x18e8   : > { %v4257_v42 = vpack.c.bf16 %v4254_v10, %v4253_v53 }
0x18ea   : > { %5140 = vmatprep.mubr.msk.bf16.mxu1 %vm874_vm9, %v4257_v42 }
0x18eb   : > { %5141 = vmatmul.mubr.msk.bf16.vlgmr.msra.gmra.mrb[80].mxu1 %vm874_vm9, %v4258_v20 }
0x19be   : > { %v5142_v15 = vpop.f32.mrb[80].mxu1 }
0x19bf   : > { %v4330_v30 = vadd.f32 %v5142_v15, %v4268_v59  ;;  %v4321_v31 = vpop.f32.mrb[81].mxu1 }
0x19c0   : > { %v4322_v63 = vadd.f32 %v4321_v31, %v4268_v59  ;;  %v5143_v0 = vpop.f32.mrb[82].mxu1 }
0x19c1   : > { %v4333_v38 = vadd.f32 %v5143_v0, %v4268_v59  ;;  %v4324_v35 = vpop.f32.mrb[83].mxu1  ;;  %v4338_v9 = vmax.f32 %v4330_v30, 0.0 }
0x19c2   : > { %v4325_v8 = vadd.f32 %v4324_v35, %v4268_v59  ;;  %v4336_v14 = vmax.f32 %v4322_v63, 0.0 }
0x19c3   : > { %v4339_v11 = vmax.f32 %v4333_v38, 0.0 }
0x19c4   : > { %v4337_v50 = vmax.f32 %v4325_v8, 0.0 }
0x19c5   : > { %v4342_v28 = vpack.c.bf16 %v4339_v11, %v4338_v9 }
0x19c6   : > { %v4341_v34 = vpack.c.bf16 %v4337_v50, %v4336_v14 }
0x19c7   : > { %v4356_v55 = vsel %vm1028_vm7, %v4342_v28, 0 }
0x19c8   : > { %v4353_v1 = vsel %vm1028_vm7, %v4341_v34, 0 }
0x19c9   : > { %5145 = vmatpush3.bf16.xpose.msra.mxu0 %v4353_v1 }
0x19ca   : > { %5146 = vmatprep.subr.bf16.mxu0 %v5332_v17 }
0x19d1   : > { %5147 = vmatpush3.bf16.xpose.msra.mxu0 %v4356_v55 }
0x19d8   : > { %5149 = vmatmul.mubr.msk.bf16.vlgmr.msra.gmra.mrb[64].mxu0 %vm1028_vm7, %v4340_v12 }
0x1aab   : > { %v4392_v3 = vpop.f32.mrb[64].mxu0 }
0x1aac   : > { %v4393_v5 = vadd.f32 %v4392_v3, %v4347_v46  ;;  %v5150_v52 = vpop.f32.mrb[65].mxu0 }
0x1aad   : > { %v4395_v17 = vpop.f32.mrb[66].mxu0 }
0x1aae   : > { %v5151_v61 = vpop.f32.mrb[67].mxu0  ;;  %4398 = vst.msk [vmem:[%s474_s20] sm:$0xff] %vm874_vm9, %v4393_v5 }
0x1aaf   : > { %5278 = shalt.err (!%p5275_p3)
}
0x1ab0   : > { %s5279_s28 = scalar_lea.hbm %s6522_s0, 128  ;;  %s5283_s22 = scalar_lea.hbm %s6578_s13, 256 }
0x1ab1   : > { %p5280_p4 = scmp.ne.s32.totalorder %s6522_s0, %s5279_s28  ;;  %p5284_p9 = scmp.lt.u32.totalorder %s6522_s0, %s6578_s13 }
0x1ab2   : > { %p5285_p10 = scmp.lt.u32.totalorder %s5283_s22, %s5279_s28  ;;  %p5287_p12 = scmp.lt.u32.totalorder %s5279_s28, %s6522_s0 }
0x1ab3   : > { %p5281_p7 = pnand %p5280_p4, %p5449_p5 }
0x1ab4   : > { %p5286_p11 = por %p5285_p10, %p5284_p9 }
0x1ab5   : > { %p5282_p8 = pneg %p5281_p7 }
0x1ab6   : > { %p5288_p13 = por %p5287_p12, %p5286_p11 }
0x1ab8   : > { %p5289_p0 = pnand %p5288_p13, %p5282_p8 }
0x1aba   : > { %5292 = shalt.err (!%p5289_p0)
}
0x1abb   : > { %5199 = dma.vmem_to_hbm [thread:$0]  (%p5449_p5), %s6524_s25, 128, %s6522_s0, %s4400_s17  }
0x1abc PF: > { %p5205_p1 = scmp.ge.s32.totalorder %s5327_s16, 2  ;;  %s4431_s26 = sand.u32 1, %s5315_s29  }
0x1abd   : > { %s4432_s18 = scalar_lea.sflag [#allocation3], %s4431_s26 }
0x1abe   : > { %p5202_p2 = pnand %p5205_p1, %p5453_p6 }
0x1ac0   : > { %5310 = dma.done.wait (!%p5202_p2), %s4432_s18, 128  }
0x1ac1   : > { %5312 = vsyncadd (!%p5202_p2), %s4432_s18, 4294967168  ;;  %s6589_s28 = sld [smem:[#allocation5_spill]]  ;;  %s6590_s15 = sld [smem:[#allocation6_spill]] }
0x1ac2   : > { %p25_p3 = scmp.ge.s32.totalorder %s5436_s19, 4   ;;  %s6591_s29 = smov %s5319_s30 }
0x1ac3   : > { %s6593_s16 = smov %s5436_s19 }
0x1ac4   :  { %27 = sbr.rel (!%p25_p3) target bundleno = 5 (0x5), region = 122 }
0x1ac7   : > { %s6592_s30 = smov %s6589_s28 }
0x1acb   :  { %4443 = vsyncpa [#allocation3], 1 }
0x1acc   :  { %4445 = vsyncpa [#allocation3 + $0x1], 1 }

</bundles_post_ra>
